<compile_context>
chip_gen: v7x
topology: tpu7x:2x2x1
jax: 0.10.0
libtpu: 0.0.40
codegen_flags: <defaults>
</compile_context>

<pallas_src>
import functools

import jax
import jax.numpy as jnp
from jax.experimental import pallas as pl
from jax.experimental.pallas import tpu as pltpu

LANE = 128      # TPU lane tile
SUBLANE = 8     # f32 sublane tile


def _round_up(x, m):
    return (x + m - 1) // m * m


# ----------------------------------------------------------------------------
# Fused kernel: all LSTM layers + FC head + softmax in one invocation.
# PyTorch gate order (i, f, g, o):
#   i = sigmoid(.), f = sigmoid(.), g = tanh(.), o = sigmoid(.)
#   c' = f*c + i*g ; h' = o*tanh(c')
# ----------------------------------------------------------------------------
def _fused_lstm_kernel(x_ref, wcat_ref, b_ref, wfc_ref, bfc_ref, out_ref,
                       seq_scr, h_scr, c_scr,
                       *, num_layers, seq_len, p, num_classes):
    # Stage the padded embedded inputs in f32 VMEM scratch; each layer reads
    # its input sequence from / writes its output sequence to seq_scr in place.
    seq_scr[...] = x_ref[...].astype(jnp.float32)

    for layer in range(num_layers):                 # static unroll over layers
        h_scr[...] = jnp.zeros_like(h_scr)
        c_scr[...] = jnp.zeros_like(c_scr)

        def step(t, carry, layer=layer):
            x_t = seq_scr[t]                        # (Bp, P) f32
            h = h_scr[...]                          # (Bp, P) f32
            c = c_scr[...]                          # (Bp, P) f32
            # Single fused gate matmul: [x_t, h] @ Wcat  (bf16 in, f32 acc).
            xc = jnp.concatenate([x_t, h], axis=-1).astype(jnp.bfloat16)
            gates = jnp.dot(xc, wcat_ref[layer],
                            preferred_element_type=jnp.float32) + b_ref[layer]
            # Gate slices land on 128-lane tile boundaries (P = 128*k).
            i_g = jax.nn.sigmoid(gates[:, 0 * p:1 * p])
            f_g = jax.nn.sigmoid(gates[:, 1 * p:2 * p])
            g_g = jnp.tanh(gates[:, 2 * p:3 * p])
            o_g = jax.nn.sigmoid(gates[:, 3 * p:4 * p])
            c_new = f_g * c + i_g * g_g
            h_new = o_g * jnp.tanh(c_new)
            c_scr[...] = c_new
            h_scr[...] = h_new
            seq_scr[t] = h_new                      # input for the next layer
            return carry

        jax.lax.fori_loop(0, seq_len, step, 0, unroll=True)

    # FC head + softmax on the last hidden state of the top layer.
    logits = jnp.dot(h_scr[...].astype(jnp.bfloat16), wfc_ref[...],
                     preferred_element_type=jnp.float32) + bfc_ref[...]
    valid = jax.lax.broadcasted_iota(jnp.int32, logits.shape, 1) < num_classes
    logits = jnp.where(valid, logits, -1e30)        # mask padded classes
    m = jnp.max(logits, axis=1, keepdims=True)
    e = jnp.exp(logits - m)
    denom = jnp.sum(e, axis=1, keepdims=True)
    out_ref[...] = e * pl.reciprocal(denom, approx=True)


# ----------------------------------------------------------------------------
# Wrapper: embedding gather stays in JAX glue; everything else in the kernel.
# ----------------------------------------------------------------------------
@functools.partial(jax.jit, static_argnames=("num_classes",))
def lstm_classifier_forward(tokens, kparams, *, num_classes):
    emb_p = kparams["embedding"]          # (V, P)        bf16 (feature-padded)
    wcat = kparams["w_cat"]               # (L, 2P, 4P)   bf16
    b = kparams["b"]                      # (L, 1, 4P)    f32
    wfc = kparams["w_fc"]                 # (P, Cp)       bf16
    bfc = kparams["b_fc"]                 # (1, Cp)       f32

    num_layers = wcat.shape[0]
    p = wcat.shape[1] // 2
    cp = wfc.shape[1]
    B, T = tokens.shape
    bp = _round_up(max(B, SUBLANE), SUBLANE)

    # Embedding lookup (XLA gather) + time-major + batch/sublane padding.
    # TODO(synk): the gather could be moved in-kernel via scalar-prefetched
    # token ids; at these sizes it is negligible glue.
    x = jnp.take(emb_p, tokens, axis=0)              # (B, T, P) bf16
    x = jnp.transpose(x, (1, 0, 2))                  # (T, B, P)
    x = jnp.pad(x, ((0, 0), (0, bp - B), (0, 0)))    # (T, Bp, P)

    kernel = functools.partial(
        _fused_lstm_kernel, num_layers=num_layers, seq_len=T, p=p,
        num_classes=num_classes)

    probs_p = pl.pallas_call(
        kernel,
        out_shape=jax.ShapeDtypeStruct((bp, cp), jnp.float32),
        in_specs=[pl.BlockSpec(memory_space=pltpu.MemorySpace.VMEM)] * 5,
        out_specs=pl.BlockSpec(memory_space=pltpu.MemorySpace.VMEM),
        scratch_shapes=[
            pltpu.VMEM((T, bp, p), jnp.float32),   # inter-layer sequence buffer
            pltpu.VMEM((bp, p), jnp.float32),      # h
            pltpu.VMEM((bp, p), jnp.float32),      # c
        ],
    )(x, wcat, b, wfc, bfc)

    return probs_p[:B, :num_classes]


# ----------------------------------------------------------------------------
# Parameter construction (raw PyTorch-layout params -> padded/fused kernel
# params) and a pure-JAX reference for correctness checking.
# ----------------------------------------------------------------------------
def init_params(key, vocab_size, embedding_dim, hidden_size, num_layers,
                out_classes):
    """Raw parameters in PyTorch layout: w_ih (4H,in), w_hh (4H,H), biases (4H,),
    fc weight (C,H), fc bias (C,)."""
    keys = jax.random.split(key, 1 + 4 * num_layers + 2)
    k = 1.0 / jnp.sqrt(hidden_size)
    raw = {"embedding": jax.random.normal(
        keys[0], (vocab_size, embedding_dim), jnp.float32)}
    layers = []
    idx = 1
    for l in range(num_layers):
        in_dim = embedding_dim if l == 0 else hidden_size
        layers.append({
            "w_ih": jax.random.uniform(keys[idx], (4 * hidden_size, in_dim),
                                       jnp.float32, -k, k),
            "w_hh": jax.random.uniform(keys[idx + 1],
                                       (4 * hidden_size, hidden_size),
                                       jnp.float32, -k, k),
            "b_ih": jax.random.uniform(keys[idx + 2], (4 * hidden_size,),
                                       jnp.float32, -k, k),
            "b_hh": jax.random.uniform(keys[idx + 3], (4 * hidden_size,),
                                       jnp.float32, -k, k),
        })
        idx += 4
    raw["layers"] = layers
    raw["w_fc"] = jax.random.uniform(keys[idx], (out_classes, hidden_size),
                                     jnp.float32, -k, k)
    raw["b_fc"] = jax.random.uniform(keys[idx + 1], (out_classes,),
                                     jnp.float32, -k, k)
    return raw


def prepare_params(raw, embedding_dim, hidden_size, num_classes):
    """Pad to TPU tiles and fuse [W_ih; W_hh] into one (2P, 4P) matrix/layer."""
    H = hidden_size
    p = _round_up(max(embedding_dim, hidden_size, LANE), LANE)   # padded width
    cp = _round_up(max(num_classes, LANE), LANE)

    emb_p = jnp.pad(raw["embedding"],
                    ((0, 0), (0, p - embedding_dim))).astype(jnp.bfloat16)

    def pad_gate_cols(w_t):          # (rows, 4H) -> (rows, 4P), per-gate padded
        parts = [jnp.pad(w_t[:, g * H:(g + 1) * H], ((0, 0), (0, p - H)))
                 for g in range(4)]
        return jnp.concatenate(parts, axis=1)

    wcats, biases = [], []
    for layer in raw["layers"]:
        in_dim = layer["w_ih"].shape[1]
        w_ih_t = pad_gate_cols(layer["w_ih"].T)                  # (in, 4P)
        w_hh_t = pad_gate_cols(layer["w_hh"].T)                  # (H, 4P)
        w_ih_t = jnp.pad(w_ih_t, ((0, p - in_dim), (0, 0)))      # (P, 4P)
        w_hh_t = jnp.pad(w_hh_t, ((0, p - H), (0, 0)))           # (P, 4P)
        wcats.append(jnp.concatenate([w_ih_t, w_hh_t], axis=0))  # (2P, 4P)

        bias = layer["b_ih"] + layer["b_hh"]                     # (4H,)
        b_parts = [jnp.pad(bias[g * H:(g + 1) * H], (0, p - H))
                   for g in range(4)]
        biases.append(jnp.concatenate(b_parts)[None, :])          # (1, 4P)

    w_fc = jnp.pad(raw["w_fc"].T,
                   ((0, p - H), (0, cp - num_classes))).astype(jnp.bfloat16)
    b_fc = jnp.pad(raw["b_fc"], (0, cp - num_classes))[None, :].astype(
        jnp.float32)

    return {
        "embedding": emb_p,
        "w_cat": jnp.stack(wcats).astype(jnp.bfloat16),           # (L, 2P, 4P)
        "b": jnp.stack(biases).astype(jnp.float32),               # (L, 1, 4P)
        "w_fc": w_fc,                                             # (P, Cp)
        "b_fc": b_fc,                                             # (1, Cp)
    }


def lstm_classifier_reference(tokens, raw):
    """Pure-JAX f32 reference matching PyTorch LSTMClassifier.forward."""
    x = raw["embedding"][tokens]                                  # (B, T, E)
    B, T, _ = x.shape
    for layer in raw["layers"]:
        H = layer["w_hh"].shape[1]
        h = jnp.zeros((B, H), jnp.float32)
        c = jnp.zeros((B, H), jnp.float32)
        outs = []
        for t in range(T):
            gates = (x[:, t, :] @ layer["w_ih"].T + h @ layer["w_hh"].T
                     + layer["b_ih"] + layer["b_hh"])
            i_g, f_g, g_g, o_g = jnp.split(gates, 4, axis=1)
            i_g, f_g, o_g = (jax.nn.sigmoid(i_g), jax.nn.sigmoid(f_g),
                             jax.nn.sigmoid(o_g))
            g_g = jnp.tanh(g_g)
            c = f_g * c + i_g * g_g
            h = o_g * jnp.tanh(c)
            outs.append(h)
        x = jnp.stack(outs, axis=1)
        # TODO(synk): inter-layer dropout omitted (inference/eval semantics).
    logits = x[:, -1, :] @ raw["w_fc"].T + raw["b_fc"]
    return jax.nn.softmax(logits, axis=1)


if __name__ == "__main__":
    # Small shapes consistent with the module.
    VOCAB, EMB, HID, LAYERS, CLASSES = 50, 16, 32, 2, 4
    B, T = 2, 8

    key = jax.random.PRNGKey(0)
    pkey, tkey = jax.random.split(key)
    raw = init_params(pkey, VOCAB, EMB, HID, LAYERS, CLASSES)
    kparams = prepare_params(raw, EMB, HID, CLASSES)
    tokens = jax.random.randint(tkey, (B, T), 0, VOCAB, dtype=jnp.int32)

    probs = lstm_classifier_forward(tokens, kparams, num_classes=CLASSES)
    probs = jax.block_until_ready(probs)

    ref = lstm_classifier_reference(tokens, raw)

    assert probs.shape == (B, CLASSES)
    assert bool(jnp.all(jnp.isfinite(probs)))
    assert bool(jnp.allclose(jnp.sum(probs, axis=1), 1.0, atol=1e-2))
    assert bool(jnp.allclose(probs, ref, atol=2e-2, rtol=2e-2))
    print("KERNEL_OK")
</pallas_src>

<mosaic_0001>
module attributes {stable_mosaic.version = 11 : i64} {
  func.func @_fused_lstm_kernel(%arg0: memref<8x8x128xbf16, #tpu.memory_space<vmem>>, %arg1: memref<2x256x512xbf16, #tpu.memory_space<vmem>>, %arg2: memref<2x1x512xf32, #tpu.memory_space<vmem>>, %arg3: memref<128x128xbf16, #tpu.memory_space<vmem>>, %arg4: memref<1x128xf32, #tpu.memory_space<vmem>>, %arg5: memref<8x128xf32, #tpu.memory_space<vmem>>, %arg6: memref<8x8x128xf32, #tpu.memory_space<vmem>>, %arg7: memref<8x128xf32, #tpu.memory_space<vmem>>, %arg8: memref<8x128xf32, #tpu.memory_space<vmem>>) attributes {dimension_semantics = [], scalar_prefetch = 0 : i64, scratch_operands = 3 : i64, tpu.core_type = #tpu.core_type<tc>} {
    %c0 = arith.constant 0 : index
    %c0_0 = arith.constant 0 : index
    %c0_1 = arith.constant 0 : index
    %0 = vector.load %arg0[%c0, %c0_0, %c0_1] : memref<8x8x128xbf16, #tpu.memory_space<vmem>>, vector<8x8x128xbf16>
    %1 = arith.extf %0 : vector<8x8x128xbf16> to vector<8x8x128xf32>
    %c0_2 = arith.constant 0 : index
    %c0_3 = arith.constant 0 : index
    %c0_4 = arith.constant 0 : index
    %2 = vector.load %arg6[%c0_2, %c0_3, %c0_4] : memref<8x8x128xf32, #tpu.memory_space<vmem>>, vector<8x8x128xf32>
    tpu.vector_store %arg6[%c0_2, %c0_3, %c0_4], %1 {strides = array<i32>} : memref<8x8x128xf32, #tpu.memory_space<vmem>>, vector<8x8x128xf32>,
    %cst = arith.constant 0.000000e+00 : f32
    %3 = vector.broadcast %cst : f32 to vector<8x128xf32>
    %c0_5 = arith.constant 0 : index
    %c0_6 = arith.constant 0 : index
    %4 = vector.load %arg7[%c0_5, %c0_6] : memref<8x128xf32, #tpu.memory_space<vmem>>, vector<8x128xf32>
    tpu.vector_store %arg7[%c0_5, %c0_6], %3 {strides = array<i32>} : memref<8x128xf32, #tpu.memory_space<vmem>>, vector<8x128xf32>,
    %cst_7 = arith.constant 0.000000e+00 : f32
    %5 = vector.broadcast %cst_7 : f32 to vector<8x128xf32>
    %c0_8 = arith.constant 0 : index
    %c0_9 = arith.constant 0 : index
    %6 = vector.load %arg8[%c0_8, %c0_9] : memref<8x128xf32, #tpu.memory_space<vmem>>, vector<8x128xf32>
    tpu.vector_store %arg8[%c0_8, %c0_9], %5 {strides = array<i32>} : memref<8x128xf32, #tpu.memory_space<vmem>>, vector<8x128xf32>,
    %c0_i32 = arith.constant 0 : i32
    %7 = arith.index_cast %c0_i32 : i32 to index
    %c0_10 = arith.constant 0 : index
    %c0_11 = arith.constant 0 : index
    %8 = vector.load %arg6[%7, %c0_10, %c0_11] : memref<8x8x128xf32, #tpu.memory_space<vmem>>, vector<1x8x128xf32>
    %9 = vector.shape_cast %8 : vector<1x8x128xf32> to vector<8x128xf32>
    %c0_12 = arith.constant 0 : index
    %c0_13 = arith.constant 0 : index
    %10 = vector.load %arg7[%c0_12, %c0_13] : memref<8x128xf32, #tpu.memory_space<vmem>>, vector<8x128xf32>
    %c0_14 = arith.constant 0 : index
    %c0_15 = arith.constant 0 : index
    %11 = vector.load %arg8[%c0_14, %c0_15] : memref<8x128xf32, #tpu.memory_space<vmem>>, vector<8x128xf32>
    %12 = tpu.concatenate %9, %10 in 1 : vector<8x128xf32>, vector<8x128xf32> -> vector<8x256xf32>
    %13 = arith.truncf %12 : vector<8x256xf32> to vector<8x256xbf16>
    %c0_16 = arith.constant 0 : index
    %c0_17 = arith.constant 0 : index
    %c0_18 = arith.constant 0 : index
    %14 = vector.load %arg1[%c0_16, %c0_17, %c0_18] : memref<2x256x512xbf16, #tpu.memory_space<vmem>>, vector<1x256x512xbf16>
    %15 = vector.shape_cast %14 : vector<1x256x512xbf16> to vector<256x512xbf16>
    %cst_19 = arith.constant dense<0.000000e+00> : vector<8x512xf32>
    %16 = tpu.matmul %13, %15, %cst_19 {dimension_numbers = #tpu.dot_dimension_numbers<[1], [0], [0], [1], [0, 0, 1, 1], [], []>} : vector<8x256xbf16>, vector<256x512xbf16>, vector<8x512xf32> -> vector<8x512xf32>
    %c0_20 = arith.constant 0 : index
    %c0_21 = arith.constant 0 : index
    %c0_22 = arith.constant 0 : index
    %17 = vector.load %arg2[%c0_20, %c0_21, %c0_22] : memref<2x1x512xf32, #tpu.memory_space<vmem>>, vector<1x1x512xf32>
    %18 = vector.shape_cast %17 : vector<1x1x512xf32> to vector<1x512xf32>
    %19 = vector.broadcast %18 : vector<1x512xf32> to vector<8x512xf32>
    %20 = arith.addf %16, %19 : vector<8x512xf32>
    %21 = vector.extract_strided_slice %20 {offsets = [0, 0], sizes = [8, 128], strides = [1, 1]} : vector<8x512xf32> to vector<8x128xf32>
    %22 = arith.negf %21 : vector<8x128xf32>
    %23 = math.exp %22 : vector<8x128xf32>
    %cst_23 = arith.constant 1.000000e+00 : f32
    %24 = vector.broadcast %cst_23 : f32 to vector<8x128xf32>
    %25 = arith.addf %24, %23 : vector<8x128xf32>
    %26 = arith.divf %24, %25 : vector<8x128xf32>
    %27 = vector.extract_strided_slice %20 {offsets = [0, 128], sizes = [8, 128], strides = [1, 1]} : vector<8x512xf32> to vector<8x128xf32>
    %28 = arith.negf %27 : vector<8x128xf32>
    %29 = math.exp %28 : vector<8x128xf32>
    %cst_24 = arith.constant 1.000000e+00 : f32
    %30 = vector.broadcast %cst_24 : f32 to vector<8x128xf32>
    %31 = arith.addf %30, %29 : vector<8x128xf32>
    %32 = arith.divf %30, %31 : vector<8x128xf32>
    %33 = vector.extract_strided_slice %20 {offsets = [0, 256], sizes = [8, 128], strides = [1, 1]} : vector<8x512xf32> to vector<8x128xf32>
    %34 = math.tanh %33 : vector<8x128xf32>
    %35 = vector.extract_strided_slice %20 {offsets = [0, 384], sizes = [8, 128], strides = [1, 1]} : vector<8x512xf32> to vector<8x128xf32>
    %36 = arith.negf %35 : vector<8x128xf32>
    %37 = math.exp %36 : vector<8x128xf32>
    %cst_25 = arith.constant 1.000000e+00 : f32
    %38 = vector.broadcast %cst_25 : f32 to vector<8x128xf32>
    %39 = arith.addf %38, %37 : vector<8x128xf32>
    %40 = arith.divf %38, %39 : vector<8x128xf32>
    %41 = arith.mulf %32, %11 : vector<8x128xf32>
    %42 = arith.mulf %26, %34 : vector<8x128xf32>
    %43 = arith.addf %41, %42 : vector<8x128xf32>
    %44 = math.tanh %43 : vector<8x128xf32>
    %45 = arith.mulf %40, %44 : vector<8x128xf32>
    %c0_26 = arith.constant 0 : index
    %c0_27 = arith.constant 0 : index
    %46 = vector.load %arg8[%c0_26, %c0_27] : memref<8x128xf32, #tpu.memory_space<vmem>>, vector<8x128xf32>
    tpu.vector_store %arg8[%c0_26, %c0_27], %43 {strides = array<i32>} : memref<8x128xf32, #tpu.memory_space<vmem>>, vector<8x128xf32>,
    %c0_28 = arith.constant 0 : index
    %c0_29 = arith.constant 0 : index
    %47 = vector.load %arg7[%c0_28, %c0_29] : memref<8x128xf32, #tpu.memory_space<vmem>>, vector<8x128xf32>
    tpu.vector_store %arg7[%c0_28, %c0_29], %45 {strides = array<i32>} : memref<8x128xf32, #tpu.memory_space<vmem>>, vector<8x128xf32>,
    %48 = arith.index_cast %c0_i32 : i32 to index
    %c0_30 = arith.constant 0 : index
    %c0_31 = arith.constant 0 : index
    %49 = vector.load %arg6[%48, %c0_30, %c0_31] : memref<8x8x128xf32, #tpu.memory_space<vmem>>, vector<1x8x128xf32>
    %50 = vector.shape_cast %49 : vector<1x8x128xf32> to vector<8x128xf32>
    %51 = vector.shape_cast %45 : vector<8x128xf32> to vector<1x8x128xf32>
    tpu.vector_store %arg6[%48, %c0_30, %c0_31], %51 {strides = array<i32>} : memref<8x8x128xf32, #tpu.memory_space<vmem>>, vector<1x8x128xf32>,
    %c1_i32 = arith.constant 1 : i32
    %52 = arith.index_cast %c1_i32 : i32 to index
    %c0_32 = arith.constant 0 : index
    %c0_33 = arith.constant 0 : index
    %53 = vector.load %arg6[%52, %c0_32, %c0_33] : memref<8x8x128xf32, #tpu.memory_space<vmem>>, vector<1x8x128xf32>
    %54 = vector.shape_cast %53 : vector<1x8x128xf32> to vector<8x128xf32>
    %c0_34 = arith.constant 0 : index
    %c0_35 = arith.constant 0 : index
    %55 = vector.load %arg7[%c0_34, %c0_35] : memref<8x128xf32, #tpu.memory_space<vmem>>, vector<8x128xf32>
    %c0_36 = arith.constant 0 : index
    %c0_37 = arith.constant 0 : index
    %56 = vector.load %arg8[%c0_36, %c0_37] : memref<8x128xf32, #tpu.memory_space<vmem>>, vector<8x128xf32>
    %57 = tpu.concatenate %54, %55 in 1 : vector<8x128xf32>, vector<8x128xf32> -> vector<8x256xf32>
    %58 = arith.truncf %57 : vector<8x256xf32> to vector<8x256xbf16>
    %c0_38 = arith.constant 0 : index
    %c0_39 = arith.constant 0 : index
    %c0_40 = arith.constant 0 : index
    %59 = vector.load %arg1[%c0_38, %c0_39, %c0_40] : memref<2x256x512xbf16, #tpu.memory_space<vmem>>, vector<1x256x512xbf16>
    %60 = vector.shape_cast %59 : vector<1x256x512xbf16> to vector<256x512xbf16>
    %cst_41 = arith.constant dense<0.000000e+00> : vector<8x512xf32>
    %61 = tpu.matmul %58, %60, %cst_41 {dimension_numbers = #tpu.dot_dimension_numbers<[1], [0], [0], [1], [0, 0, 1, 1], [], []>} : vector<8x256xbf16>, vector<256x512xbf16>, vector<8x512xf32> -> vector<8x512xf32>
    %c0_42 = arith.constant 0 : index
    %c0_43 = arith.constant 0 : index
    %c0_44 = arith.constant 0 : index
    %62 = vector.load %arg2[%c0_42, %c0_43, %c0_44] : memref<2x1x512xf32, #tpu.memory_space<vmem>>, vector<1x1x512xf32>
    %63 = vector.shape_cast %62 : vector<1x1x512xf32> to vector<1x512xf32>
    %64 = vector.broadcast %63 : vector<1x512xf32> to vector<8x512xf32>
    %65 = arith.addf %61, %64 : vector<8x512xf32>
    %66 = vector.extract_strided_slice %65 {offsets = [0, 0], sizes = [8, 128], strides = [1, 1]} : vector<8x512xf32> to vector<8x128xf32>
    %67 = arith.negf %66 : vector<8x128xf32>
    %68 = math.exp %67 : vector<8x128xf32>
    %cst_45 = arith.constant 1.000000e+00 : f32
    %69 = vector.broadcast %cst_45 : f32 to vector<8x128xf32>
    %70 = arith.addf %69, %68 : vector<8x128xf32>
    %71 = arith.divf %69, %70 : vector<8x128xf32>
    %72 = vector.extract_strided_slice %65 {offsets = [0, 128], sizes = [8, 128], strides = [1, 1]} : vector<8x512xf32> to vector<8x128xf32>
    %73 = arith.negf %72 : vector<8x128xf32>
    %74 = math.exp %73 : vector<8x128xf32>
    %cst_46 = arith.constant 1.000000e+00 : f32
    %75 = vector.broadcast %cst_46 : f32 to vector<8x128xf32>
    %76 = arith.addf %75, %74 : vector<8x128xf32>
    %77 = arith.divf %75, %76 : vector<8x128xf32>
    %78 = vector.extract_strided_slice %65 {offsets = [0, 256], sizes = [8, 128], strides = [1, 1]} : vector<8x512xf32> to vector<8x128xf32>
    %79 = math.tanh %78 : vector<8x128xf32>
    %80 = vector.extract_strided_slice %65 {offsets = [0, 384], sizes = [8, 128], strides = [1, 1]} : vector<8x512xf32> to vector<8x128xf32>
    %81 = arith.negf %80 : vector<8x128xf32>
    %82 = math.exp %81 : vector<8x128xf32>
    %cst_47 = arith.constant 1.000000e+00 : f32
    %83 = vector.broadcast %cst_47 : f32 to vector<8x128xf32>
    %84 = arith.addf %83, %82 : vector<8x128xf32>
    %85 = arith.divf %83, %84 : vector<8x128xf32>
    %86 = arith.mulf %77, %56 : vector<8x128xf32>
    %87 = arith.mulf %71, %79 : vector<8x128xf32>
    %88 = arith.addf %86, %87 : vector<8x128xf32>
    %89 = math.tanh %88 : vector<8x128xf32>
    %90 = arith.mulf %85, %89 : vector<8x128xf32>
    %c0_48 = arith.constant 0 : index
    %c0_49 = arith.constant 0 : index
    %91 = vector.load %arg8[%c0_48, %c0_49] : memref<8x128xf32, #tpu.memory_space<vmem>>, vector<8x128xf32>
    tpu.vector_store %arg8[%c0_48, %c0_49], %88 {strides = array<i32>} : memref<8x128xf32, #tpu.memory_space<vmem>>, vector<8x128xf32>,
    %c0_50 = arith.constant 0 : index
    %c0_51 = arith.constant 0 : index
    %92 = vector.load %arg7[%c0_50, %c0_51] : memref<8x128xf32, #tpu.memory_space<vmem>>, vector<8x128xf32>
    tpu.vector_store %arg7[%c0_50, %c0_51], %90 {strides = array<i32>} : memref<8x128xf32, #tpu.memory_space<vmem>>, vector<8x128xf32>,
    %93 = arith.index_cast %c1_i32 : i32 to index
    %c0_52 = arith.constant 0 : index
    %c0_53 = arith.constant 0 : index
    %94 = vector.load %arg6[%93, %c0_52, %c0_53] : memref<8x8x128xf32, #tpu.memory_space<vmem>>, vector<1x8x128xf32>
    %95 = vector.shape_cast %94 : vector<1x8x128xf32> to vector<8x128xf32>
    %96 = vector.shape_cast %90 : vector<8x128xf32> to vector<1x8x128xf32>
    tpu.vector_store %arg6[%93, %c0_52, %c0_53], %96 {strides = array<i32>} : memref<8x8x128xf32, #tpu.memory_space<vmem>>, vector<1x8x128xf32>,
    %c2_i32 = arith.constant 2 : i32
    %97 = arith.index_cast %c2_i32 : i32 to index
    %c0_54 = arith.constant 0 : index
    %c0_55 = arith.constant 0 : index
    %98 = vector.load %arg6[%97, %c0_54, %c0_55] : memref<8x8x128xf32, #tpu.memory_space<vmem>>, vector<1x8x128xf32>
    %99 = vector.shape_cast %98 : vector<1x8x128xf32> to vector<8x128xf32>
    %c0_56 = arith.constant 0 : index
    %c0_57 = arith.constant 0 : index
    %100 = vector.load %arg7[%c0_56, %c0_57] : memref<8x128xf32, #tpu.memory_space<vmem>>, vector<8x128xf32>
    %c0_58 = arith.constant 0 : index
    %c0_59 = arith.constant 0 : index
    %101 = vector.load %arg8[%c0_58, %c0_59] : memref<8x128xf32, #tpu.memory_space<vmem>>, vector<8x128xf32>
    %102 = tpu.concatenate %99, %100 in 1 : vector<8x128xf32>, vector<8x128xf32> -> vector<8x256xf32>
    %103 = arith.truncf %102 : vector<8x256xf32> to vector<8x256xbf16>
    %c0_60 = arith.constant 0 : index
    %c0_61 = arith.constant 0 : index
    %c0_62 = arith.constant 0 : index
    %104 = vector.load %arg1[%c0_60, %c0_61, %c0_62] : memref<2x256x512xbf16, #tpu.memory_space<vmem>>, vector<1x256x512xbf16>
    %105 = vector.shape_cast %104 : vector<1x256x512xbf16> to vector<256x512xbf16>
    %cst_63 = arith.constant dense<0.000000e+00> : vector<8x512xf32>
    %106 = tpu.matmul %103, %105, %cst_63 {dimension_numbers = #tpu.dot_dimension_numbers<[1], [0], [0], [1], [0, 0, 1, 1], [], []>} : vector<8x256xbf16>, vector<256x512xbf16>, vector<8x512xf32> -> vector<8x512xf32>
    %c0_64 = arith.constant 0 : index
    %c0_65 = arith.constant 0 : index
    %c0_66 = arith.constant 0 : index
    %107 = vector.load %arg2[%c0_64, %c0_65, %c0_66] : memref<2x1x512xf32, #tpu.memory_space<vmem>>, vector<1x1x512xf32>
    %108 = vector.shape_cast %107 : vector<1x1x512xf32> to vector<1x512xf32>
    %109 = vector.broadcast %108 : vector<1x512xf32> to vector<8x512xf32>
    %110 = arith.addf %106, %109 : vector<8x512xf32>
    %111 = vector.extract_strided_slice %110 {offsets = [0, 0], sizes = [8, 128], strides = [1, 1]} : vector<8x512xf32> to vector<8x128xf32>
    %112 = arith.negf %111 : vector<8x128xf32>
    %113 = math.exp %112 : vector<8x128xf32>
    %cst_67 = arith.constant 1.000000e+00 : f32
    %114 = vector.broadcast %cst_67 : f32 to vector<8x128xf32>
    %115 = arith.addf %114, %113 : vector<8x128xf32>
    %116 = arith.divf %114, %115 : vector<8x128xf32>
    %117 = vector.extract_strided_slice %110 {offsets = [0, 128], sizes = [8, 128], strides = [1, 1]} : vector<8x512xf32> to vector<8x128xf32>
    %118 = arith.negf %117 : vector<8x128xf32>
    %119 = math.exp %118 : vector<8x128xf32>
    %cst_68 = arith.constant 1.000000e+00 : f32
    %120 = vector.broadcast %cst_68 : f32 to vector<8x128xf32>
    %121 = arith.addf %120, %119 : vector<8x128xf32>
    %122 = arith.divf %120, %121 : vector<8x128xf32>
    %123 = vector.extract_strided_slice %110 {offsets = [0, 256], sizes = [8, 128], strides = [1, 1]} : vector<8x512xf32> to vector<8x128xf32>
    %124 = math.tanh %123 : vector<8x128xf32>
    %125 = vector.extract_strided_slice %110 {offsets = [0, 384], sizes = [8, 128], strides = [1, 1]} : vector<8x512xf32> to vector<8x128xf32>
    %126 = arith.negf %125 : vector<8x128xf32>
    %127 = math.exp %126 : vector<8x128xf32>
    %cst_69 = arith.constant 1.000000e+00 : f32
    %128 = vector.broadcast %cst_69 : f32 to vector<8x128xf32>
    %129 = arith.addf %128, %127 : vector<8x128xf32>
    %130 = arith.divf %128, %129 : vector<8x128xf32>
    %131 = arith.mulf %122, %101 : vector<8x128xf32>
    %132 = arith.mulf %116, %124 : vector<8x128xf32>
    %133 = arith.addf %131, %132 : vector<8x128xf32>
    %134 = math.tanh %133 : vector<8x128xf32>
    %135 = arith.mulf %130, %134 : vector<8x128xf32>
    %c0_70 = arith.constant 0 : index
    %c0_71 = arith.constant 0 : index
    %136 = vector.load %arg8[%c0_70, %c0_71] : memref<8x128xf32, #tpu.memory_space<vmem>>, vector<8x128xf32>
    tpu.vector_store %arg8[%c0_70, %c0_71], %133 {strides = array<i32>} : memref<8x128xf32, #tpu.memory_space<vmem>>, vector<8x128xf32>,
    %c0_72 = arith.constant 0 : index
    %c0_73 = arith.constant 0 : index
    %137 = vector.load %arg7[%c0_72, %c0_73] : memref<8x128xf32, #tpu.memory_space<vmem>>, vector<8x128xf32>
    tpu.vector_store %arg7[%c0_72, %c0_73], %135 {strides = array<i32>} : memref<8x128xf32, #tpu.memory_space<vmem>>, vector<8x128xf32>,
    %138 = arith.index_cast %c2_i32 : i32 to index
    %c0_74 = arith.constant 0 : index
    %c0_75 = arith.constant 0 : index
    %139 = vector.load %arg6[%138, %c0_74, %c0_75] : memref<8x8x128xf32, #tpu.memory_space<vmem>>, vector<1x8x128xf32>
    %140 = vector.shape_cast %139 : vector<1x8x128xf32> to vector<8x128xf32>
    %141 = vector.shape_cast %135 : vector<8x128xf32> to vector<1x8x128xf32>
    tpu.vector_store %arg6[%138, %c0_74, %c0_75], %141 {strides = array<i32>} : memref<8x8x128xf32, #tpu.memory_space<vmem>>, vector<1x8x128xf32>,
    %c3_i32 = arith.constant 3 : i32
    %142 = arith.index_cast %c3_i32 : i32 to index
    %c0_76 = arith.constant 0 : index
    %c0_77 = arith.constant 0 : index
    %143 = vector.load %arg6[%142, %c0_76, %c0_77] : memref<8x8x128xf32, #tpu.memory_space<vmem>>, vector<1x8x128xf32>
    %144 = vector.shape_cast %143 : vector<1x8x128xf32> to vector<8x128xf32>
    %c0_78 = arith.constant 0 : index
    %c0_79 = arith.constant 0 : index
    %145 = vector.load %arg7[%c0_78, %c0_79] : memref<8x128xf32, #tpu.memory_space<vmem>>, vector<8x128xf32>
    %c0_80 = arith.constant 0 : index
    %c0_81 = arith.constant 0 : index
    %146 = vector.load %arg8[%c0_80, %c0_81] : memref<8x128xf32, #tpu.memory_space<vmem>>, vector<8x128xf32>
    %147 = tpu.concatenate %144, %145 in 1 : vector<8x128xf32>, vector<8x128xf32> -> vector<8x256xf32>
    %148 = arith.truncf %147 : vector<8x256xf32> to vector<8x256xbf16>
    %c0_82 = arith.constant 0 : index
    %c0_83 = arith.constant 0 : index
    %c0_84 = arith.constant 0 : index
    %149 = vector.load %arg1[%c0_82, %c0_83, %c0_84] : memref<2x256x512xbf16, #tpu.memory_space<vmem>>, vector<1x256x512xbf16>
    %150 = vector.shape_cast %149 : vector<1x256x512xbf16> to vector<256x512xbf16>
    %cst_85 = arith.constant dense<0.000000e+00> : vector<8x512xf32>
    %151 = tpu.matmul %148, %150, %cst_85 {dimension_numbers = #tpu.dot_dimension_numbers<[1], [0], [0], [1], [0, 0, 1, 1], [], []>} : vector<8x256xbf16>, vector<256x512xbf16>, vector<8x512xf32> -> vector<8x512xf32>
    %c0_86 = arith.constant 0 : index
    %c0_87 = arith.constant 0 : index
    %c0_88 = arith.constant 0 : index
    %152 = vector.load %arg2[%c0_86, %c0_87, %c0_88] : memref<2x1x512xf32, #tpu.memory_space<vmem>>, vector<1x1x512xf32>
    %153 = vector.shape_cast %152 : vector<1x1x512xf32> to vector<1x512xf32>
    %154 = vector.broadcast %153 : vector<1x512xf32> to vector<8x512xf32>
    %155 = arith.addf %151, %154 : vector<8x512xf32>
    %156 = vector.extract_strided_slice %155 {offsets = [0, 0], sizes = [8, 128], strides = [1, 1]} : vector<8x512xf32> to vector<8x128xf32>
    %157 = arith.negf %156 : vector<8x128xf32>
    %158 = math.exp %157 : vector<8x128xf32>
    %cst_89 = arith.constant 1.000000e+00 : f32
    %159 = vector.broadcast %cst_89 : f32 to vector<8x128xf32>
    %160 = arith.addf %159, %158 : vector<8x128xf32>
    %161 = arith.divf %159, %160 : vector<8x128xf32>
    %162 = vector.extract_strided_slice %155 {offsets = [0, 128], sizes = [8, 128], strides = [1, 1]} : vector<8x512xf32> to vector<8x128xf32>
    %163 = arith.negf %162 : vector<8x128xf32>
    %164 = math.exp %163 : vector<8x128xf32>
    %cst_90 = arith.constant 1.000000e+00 : f32
    %165 = vector.broadcast %cst_90 : f32 to vector<8x128xf32>
    %166 = arith.addf %165, %164 : vector<8x128xf32>
    %167 = arith.divf %165, %166 : vector<8x128xf32>
    %168 = vector.extract_strided_slice %155 {offsets = [0, 256], sizes = [8, 128], strides = [1, 1]} : vector<8x512xf32> to vector<8x128xf32>
    %169 = math.tanh %168 : vector<8x128xf32>
    %170 = vector.extract_strided_slice %155 {offsets = [0, 384], sizes = [8, 128], strides = [1, 1]} : vector<8x512xf32> to vector<8x128xf32>
    %171 = arith.negf %170 : vector<8x128xf32>
    %172 = math.exp %171 : vector<8x128xf32>
    %cst_91 = arith.constant 1.000000e+00 : f32
    %173 = vector.broadcast %cst_91 : f32 to vector<8x128xf32>
    %174 = arith.addf %173, %172 : vector<8x128xf32>
    %175 = arith.divf %173, %174 : vector<8x128xf32>
    %176 = arith.mulf %167, %146 : vector<8x128xf32>
    %177 = arith.mulf %161, %169 : vector<8x128xf32>
    %178 = arith.addf %176, %177 : vector<8x128xf32>
    %179 = math.tanh %178 : vector<8x128xf32>
    %180 = arith.mulf %175, %179 : vector<8x128xf32>
    %c0_92 = arith.constant 0 : index
    %c0_93 = arith.constant 0 : index
    %181 = vector.load %arg8[%c0_92, %c0_93] : memref<8x128xf32, #tpu.memory_space<vmem>>, vector<8x128xf32>
    tpu.vector_store %arg8[%c0_92, %c0_93], %178 {strides = array<i32>} : memref<8x128xf32, #tpu.memory_space<vmem>>, vector<8x128xf32>,
    %c0_94 = arith.constant 0 : index
    %c0_95 = arith.constant 0 : index
    %182 = vector.load %arg7[%c0_94, %c0_95] : memref<8x128xf32, #tpu.memory_space<vmem>>, vector<8x128xf32>
    tpu.vector_store %arg7[%c0_94, %c0_95], %180 {strides = array<i32>} : memref<8x128xf32, #tpu.memory_space<vmem>>, vector<8x128xf32>,
    %183 = arith.index_cast %c3_i32 : i32 to index
    %c0_96 = arith.constant 0 : index
    %c0_97 = arith.constant 0 : index
    %184 = vector.load %arg6[%183, %c0_96, %c0_97] : memref<8x8x128xf32, #tpu.memory_space<vmem>>, vector<1x8x128xf32>
    %185 = vector.shape_cast %184 : vector<1x8x128xf32> to vector<8x128xf32>
    %186 = vector.shape_cast %180 : vector<8x128xf32> to vector<1x8x128xf32>
    tpu.vector_store %arg6[%183, %c0_96, %c0_97], %186 {strides = array<i32>} : memref<8x8x128xf32, #tpu.memory_space<vmem>>, vector<1x8x128xf32>,
    %c4_i32 = arith.constant 4 : i32
    %187 = arith.index_cast %c4_i32 : i32 to index
    %c0_98 = arith.constant 0 : index
    %c0_99 = arith.constant 0 : index
    %188 = vector.load %arg6[%187, %c0_98, %c0_99] : memref<8x8x128xf32, #tpu.memory_space<vmem>>, vector<1x8x128xf32>
    %189 = vector.shape_cast %188 : vector<1x8x128xf32> to vector<8x128xf32>
    %c0_100 = arith.constant 0 : index
    %c0_101 = arith.constant 0 : index
    %190 = vector.load %arg7[%c0_100, %c0_101] : memref<8x128xf32, #tpu.memory_space<vmem>>, vector<8x128xf32>
    %c0_102 = arith.constant 0 : index
    %c0_103 = arith.constant 0 : index
    %191 = vector.load %arg8[%c0_102, %c0_103] : memref<8x128xf32, #tpu.memory_space<vmem>>, vector<8x128xf32>
    %192 = tpu.concatenate %189, %190 in 1 : vector<8x128xf32>, vector<8x128xf32> -> vector<8x256xf32>
    %193 = arith.truncf %192 : vector<8x256xf32> to vector<8x256xbf16>
    %c0_104 = arith.constant 0 : index
    %c0_105 = arith.constant 0 : index
    %c0_106 = arith.constant 0 : index
    %194 = vector.load %arg1[%c0_104, %c0_105, %c0_106] : memref<2x256x512xbf16, #tpu.memory_space<vmem>>, vector<1x256x512xbf16>
    %195 = vector.shape_cast %194 : vector<1x256x512xbf16> to vector<256x512xbf16>
    %cst_107 = arith.constant dense<0.000000e+00> : vector<8x512xf32>
    %196 = tpu.matmul %193, %195, %cst_107 {dimension_numbers = #tpu.dot_dimension_numbers<[1], [0], [0], [1], [0, 0, 1, 1], [], []>} : vector<8x256xbf16>, vector<256x512xbf16>, vector<8x512xf32> -> vector<8x512xf32>
    %c0_108 = arith.constant 0 : index
    %c0_109 = arith.constant 0 : index
    %c0_110 = arith.constant 0 : index
    %197 = vector.load %arg2[%c0_108, %c0_109, %c0_110] : memref<2x1x512xf32, #tpu.memory_space<vmem>>, vector<1x1x512xf32>
    %198 = vector.shape_cast %197 : vector<1x1x512xf32> to vector<1x512xf32>
    %199 = vector.broadcast %198 : vector<1x512xf32> to vector<8x512xf32>
    %200 = arith.addf %196, %199 : vector<8x512xf32>
    %201 = vector.extract_strided_slice %200 {offsets = [0, 0], sizes = [8, 128], strides = [1, 1]} : vector<8x512xf32> to vector<8x128xf32>
    %202 = arith.negf %201 : vector<8x128xf32>
    %203 = math.exp %202 : vector<8x128xf32>
    %cst_111 = arith.constant 1.000000e+00 : f32
    %204 = vector.broadcast %cst_111 : f32 to vector<8x128xf32>
    %205 = arith.addf %204, %203 : vector<8x128xf32>
    %206 = arith.divf %204, %205 : vector<8x128xf32>
    %207 = vector.extract_strided_slice %200 {offsets = [0, 128], sizes = [8, 128], strides = [1, 1]} : vector<8x512xf32> to vector<8x128xf32>
    %208 = arith.negf %207 : vector<8x128xf32>
    %209 = math.exp %208 : vector<8x128xf32>
    %cst_112 = arith.constant 1.000000e+00 : f32
    %210 = vector.broadcast %cst_112 : f32 to vector<8x128xf32>
    %211 = arith.addf %210, %209 : vector<8x128xf32>
    %212 = arith.divf %210, %211 : vector<8x128xf32>
    %213 = vector.extract_strided_slice %200 {offsets = [0, 256], sizes = [8, 128], strides = [1, 1]} : vector<8x512xf32> to vector<8x128xf32>
    %214 = math.tanh %213 : vector<8x128xf32>
    %215 = vector.extract_strided_slice %200 {offsets = [0, 384], sizes = [8, 128], strides = [1, 1]} : vector<8x512xf32> to vector<8x128xf32>
    %216 = arith.negf %215 : vector<8x128xf32>
    %217 = math.exp %216 : vector<8x128xf32>
    %cst_113 = arith.constant 1.000000e+00 : f32
    %218 = vector.broadcast %cst_113 : f32 to vector<8x128xf32>
    %219 = arith.addf %218, %217 : vector<8x128xf32>
    %220 = arith.divf %218, %219 : vector<8x128xf32>
    %221 = arith.mulf %212, %191 : vector<8x128xf32>
    %222 = arith.mulf %206, %214 : vector<8x128xf32>
    %223 = arith.addf %221, %222 : vector<8x128xf32>
    %224 = math.tanh %223 : vector<8x128xf32>
    %225 = arith.mulf %220, %224 : vector<8x128xf32>
    %c0_114 = arith.constant 0 : index
    %c0_115 = arith.constant 0 : index
    %226 = vector.load %arg8[%c0_114, %c0_115] : memref<8x128xf32, #tpu.memory_space<vmem>>, vector<8x128xf32>
    tpu.vector_store %arg8[%c0_114, %c0_115], %223 {strides = array<i32>} : memref<8x128xf32, #tpu.memory_space<vmem>>, vector<8x128xf32>,
    %c0_116 = arith.constant 0 : index
    %c0_117 = arith.constant 0 : index
    %227 = vector.load %arg7[%c0_116, %c0_117] : memref<8x128xf32, #tpu.memory_space<vmem>>, vector<8x128xf32>
    tpu.vector_store %arg7[%c0_116, %c0_117], %225 {strides = array<i32>} : memref<8x128xf32, #tpu.memory_space<vmem>>, vector<8x128xf32>,
    %228 = arith.index_cast %c4_i32 : i32 to index
    %c0_118 = arith.constant 0 : index
    %c0_119 = arith.constant 0 : index
    %229 = vector.load %arg6[%228, %c0_118, %c0_119] : memref<8x8x128xf32, #tpu.memory_space<vmem>>, vector<1x8x128xf32>
    %230 = vector.shape_cast %229 : vector<1x8x128xf32> to vector<8x128xf32>
    %231 = vector.shape_cast %225 : vector<8x128xf32> to vector<1x8x128xf32>
    tpu.vector_store %arg6[%228, %c0_118, %c0_119], %231 {strides = array<i32>} : memref<8x8x128xf32, #tpu.memory_space<vmem>>, vector<1x8x128xf32>,
    %c5_i32 = arith.constant 5 : i32
    %232 = arith.index_cast %c5_i32 : i32 to index
    %c0_120 = arith.constant 0 : index
    %c0_121 = arith.constant 0 : index
    %233 = vector.load %arg6[%232, %c0_120, %c0_121] : memref<8x8x128xf32, #tpu.memory_space<vmem>>, vector<1x8x128xf32>
    %234 = vector.shape_cast %233 : vector<1x8x128xf32> to vector<8x128xf32>
    %c0_122 = arith.constant 0 : index
    %c0_123 = arith.constant 0 : index
    %235 = vector.load %arg7[%c0_122, %c0_123] : memref<8x128xf32, #tpu.memory_space<vmem>>, vector<8x128xf32>
    %c0_124 = arith.constant 0 : index
    %c0_125 = arith.constant 0 : index
    %236 = vector.load %arg8[%c0_124, %c0_125] : memref<8x128xf32, #tpu.memory_space<vmem>>, vector<8x128xf32>
    %237 = tpu.concatenate %234, %235 in 1 : vector<8x128xf32>, vector<8x128xf32> -> vector<8x256xf32>
    %238 = arith.truncf %237 : vector<8x256xf32> to vector<8x256xbf16>
    %c0_126 = arith.constant 0 : index
    %c0_127 = arith.constant 0 : index
    %c0_128 = arith.constant 0 : index
    %239 = vector.load %arg1[%c0_126, %c0_127, %c0_128] : memref<2x256x512xbf16, #tpu.memory_space<vmem>>, vector<1x256x512xbf16>
    %240 = vector.shape_cast %239 : vector<1x256x512xbf16> to vector<256x512xbf16>
    %cst_129 = arith.constant dense<0.000000e+00> : vector<8x512xf32>
    %241 = tpu.matmul %238, %240, %cst_129 {dimension_numbers = #tpu.dot_dimension_numbers<[1], [0], [0], [1], [0, 0, 1, 1], [], []>} : vector<8x256xbf16>, vector<256x512xbf16>, vector<8x512xf32> -> vector<8x512xf32>
    %c0_130 = arith.constant 0 : index
    %c0_131 = arith.constant 0 : index
    %c0_132 = arith.constant 0 : index
    %242 = vector.load %arg2[%c0_130, %c0_131, %c0_132] : memref<2x1x512xf32, #tpu.memory_space<vmem>>, vector<1x1x512xf32>
    %243 = vector.shape_cast %242 : vector<1x1x512xf32> to vector<1x512xf32>
    %244 = vector.broadcast %243 : vector<1x512xf32> to vector<8x512xf32>
    %245 = arith.addf %241, %244 : vector<8x512xf32>
    %246 = vector.extract_strided_slice %245 {offsets = [0, 0], sizes = [8, 128], strides = [1, 1]} : vector<8x512xf32> to vector<8x128xf32>
    %247 = arith.negf %246 : vector<8x128xf32>
    %248 = math.exp %247 : vector<8x128xf32>
    %cst_133 = arith.constant 1.000000e+00 : f32
    %249 = vector.broadcast %cst_133 : f32 to vector<8x128xf32>
    %250 = arith.addf %249, %248 : vector<8x128xf32>
    %251 = arith.divf %249, %250 : vector<8x128xf32>
    %252 = vector.extract_strided_slice %245 {offsets = [0, 128], sizes = [8, 128], strides = [1, 1]} : vector<8x512xf32> to vector<8x128xf32>
    %253 = arith.negf %252 : vector<8x128xf32>
    %254 = math.exp %253 : vector<8x128xf32>
    %cst_134 = arith.constant 1.000000e+00 : f32
    %255 = vector.broadcast %cst_134 : f32 to vector<8x128xf32>
    %256 = arith.addf %255, %254 : vector<8x128xf32>
    %257 = arith.divf %255, %256 : vector<8x128xf32>
    %258 = vector.extract_strided_slice %245 {offsets = [0, 256], sizes = [8, 128], strides = [1, 1]} : vector<8x512xf32> to vector<8x128xf32>
    %259 = math.tanh %258 : vector<8x128xf32>
    %260 = vector.extract_strided_slice %245 {offsets = [0, 384], sizes = [8, 128], strides = [1, 1]} : vector<8x512xf32> to vector<8x128xf32>
    %261 = arith.negf %260 : vector<8x128xf32>
    %262 = math.exp %261 : vector<8x128xf32>
    %cst_135 = arith.constant 1.000000e+00 : f32
    %263 = vector.broadcast %cst_135 : f32 to vector<8x128xf32>
    %264 = arith.addf %263, %262 : vector<8x128xf32>
    %265 = arith.divf %263, %264 : vector<8x128xf32>
    %266 = arith.mulf %257, %236 : vector<8x128xf32>
    %267 = arith.mulf %251, %259 : vector<8x128xf32>
    %268 = arith.addf %266, %267 : vector<8x128xf32>
    %269 = math.tanh %268 : vector<8x128xf32>
    %270 = arith.mulf %265, %269 : vector<8x128xf32>
    %c0_136 = arith.constant 0 : index
    %c0_137 = arith.constant 0 : index
    %271 = vector.load %arg8[%c0_136, %c0_137] : memref<8x128xf32, #tpu.memory_space<vmem>>, vector<8x128xf32>
    tpu.vector_store %arg8[%c0_136, %c0_137], %268 {strides = array<i32>} : memref<8x128xf32, #tpu.memory_space<vmem>>, vector<8x128xf32>,
    %c0_138 = arith.constant 0 : index
    %c0_139 = arith.constant 0 : index
    %272 = vector.load %arg7[%c0_138, %c0_139] : memref<8x128xf32, #tpu.memory_space<vmem>>, vector<8x128xf32>
    tpu.vector_store %arg7[%c0_138, %c0_139], %270 {strides = array<i32>} : memref<8x128xf32, #tpu.memory_space<vmem>>, vector<8x128xf32>,
    %273 = arith.index_cast %c5_i32 : i32 to index
    %c0_140 = arith.constant 0 : index
    %c0_141 = arith.constant 0 : index
    %274 = vector.load %arg6[%273, %c0_140, %c0_141] : memref<8x8x128xf32, #tpu.memory_space<vmem>>, vector<1x8x128xf32>
    %275 = vector.shape_cast %274 : vector<1x8x128xf32> to vector<8x128xf32>
    %276 = vector.shape_cast %270 : vector<8x128xf32> to vector<1x8x128xf32>
    tpu.vector_store %arg6[%273, %c0_140, %c0_141], %276 {strides = array<i32>} : memref<8x8x128xf32, #tpu.memory_space<vmem>>, vector<1x8x128xf32>,
    %c6_i32 = arith.constant 6 : i32
    %277 = arith.index_cast %c6_i32 : i32 to index
    %c0_142 = arith.constant 0 : index
    %c0_143 = arith.constant 0 : index
    %278 = vector.load %arg6[%277, %c0_142, %c0_143] : memref<8x8x128xf32, #tpu.memory_space<vmem>>, vector<1x8x128xf32>
    %279 = vector.shape_cast %278 : vector<1x8x128xf32> to vector<8x128xf32>
    %c0_144 = arith.constant 0 : index
    %c0_145 = arith.constant 0 : index
    %280 = vector.load %arg7[%c0_144, %c0_145] : memref<8x128xf32, #tpu.memory_space<vmem>>, vector<8x128xf32>
    %c0_146 = arith.constant 0 : index
    %c0_147 = arith.constant 0 : index
    %281 = vector.load %arg8[%c0_146, %c0_147] : memref<8x128xf32, #tpu.memory_space<vmem>>, vector<8x128xf32>
    %282 = tpu.concatenate %279, %280 in 1 : vector<8x128xf32>, vector<8x128xf32> -> vector<8x256xf32>
    %283 = arith.truncf %282 : vector<8x256xf32> to vector<8x256xbf16>
    %c0_148 = arith.constant 0 : index
    %c0_149 = arith.constant 0 : index
    %c0_150 = arith.constant 0 : index
    %284 = vector.load %arg1[%c0_148, %c0_149, %c0_150] : memref<2x256x512xbf16, #tpu.memory_space<vmem>>, vector<1x256x512xbf16>
    %285 = vector.shape_cast %284 : vector<1x256x512xbf16> to vector<256x512xbf16>
    %cst_151 = arith.constant dense<0.000000e+00> : vector<8x512xf32>
    %286 = tpu.matmul %283, %285, %cst_151 {dimension_numbers = #tpu.dot_dimension_numbers<[1], [0], [0], [1], [0, 0, 1, 1], [], []>} : vector<8x256xbf16>, vector<256x512xbf16>, vector<8x512xf32> -> vector<8x512xf32>
    %c0_152 = arith.constant 0 : index
    %c0_153 = arith.constant 0 : index
    %c0_154 = arith.constant 0 : index
    %287 = vector.load %arg2[%c0_152, %c0_153, %c0_154] : memref<2x1x512xf32, #tpu.memory_space<vmem>>, vector<1x1x512xf32>
    %288 = vector.shape_cast %287 : vector<1x1x512xf32> to vector<1x512xf32>
    %289 = vector.broadcast %288 : vector<1x512xf32> to vector<8x512xf32>
    %290 = arith.addf %286, %289 : vector<8x512xf32>
    %291 = vector.extract_strided_slice %290 {offsets = [0, 0], sizes = [8, 128], strides = [1, 1]} : vector<8x512xf32> to vector<8x128xf32>
    %292 = arith.negf %291 : vector<8x128xf32>
    %293 = math.exp %292 : vector<8x128xf32>
    %cst_155 = arith.constant 1.000000e+00 : f32
    %294 = vector.broadcast %cst_155 : f32 to vector<8x128xf32>
    %295 = arith.addf %294, %293 : vector<8x128xf32>
    %296 = arith.divf %294, %295 : vector<8x128xf32>
    %297 = vector.extract_strided_slice %290 {offsets = [0, 128], sizes = [8, 128], strides = [1, 1]} : vector<8x512xf32> to vector<8x128xf32>
    %298 = arith.negf %297 : vector<8x128xf32>
    %299 = math.exp %298 : vector<8x128xf32>
    %cst_156 = arith.constant 1.000000e+00 : f32
    %300 = vector.broadcast %cst_156 : f32 to vector<8x128xf32>
    %301 = arith.addf %300, %299 : vector<8x128xf32>
    %302 = arith.divf %300, %301 : vector<8x128xf32>
    %303 = vector.extract_strided_slice %290 {offsets = [0, 256], sizes = [8, 128], strides = [1, 1]} : vector<8x512xf32> to vector<8x128xf32>
    %304 = math.tanh %303 : vector<8x128xf32>
    %305 = vector.extract_strided_slice %290 {offsets = [0, 384], sizes = [8, 128], strides = [1, 1]} : vector<8x512xf32> to vector<8x128xf32>
    %306 = arith.negf %305 : vector<8x128xf32>
    %307 = math.exp %306 : vector<8x128xf32>
    %cst_157 = arith.constant 1.000000e+00 : f32
    %308 = vector.broadcast %cst_157 : f32 to vector<8x128xf32>
    %309 = arith.addf %308, %307 : vector<8x128xf32>
    %310 = arith.divf %308, %309 : vector<8x128xf32>
    %311 = arith.mulf %302, %281 : vector<8x128xf32>
    %312 = arith.mulf %296, %304 : vector<8x128xf32>
    %313 = arith.addf %311, %312 : vector<8x128xf32>
    %314 = math.tanh %313 : vector<8x128xf32>
    %315 = arith.mulf %310, %314 : vector<8x128xf32>
    %c0_158 = arith.constant 0 : index
    %c0_159 = arith.constant 0 : index
    %316 = vector.load %arg8[%c0_158, %c0_159] : memref<8x128xf32, #tpu.memory_space<vmem>>, vector<8x128xf32>
    tpu.vector_store %arg8[%c0_158, %c0_159], %313 {strides = array<i32>} : memref<8x128xf32, #tpu.memory_space<vmem>>, vector<8x128xf32>,
    %c0_160 = arith.constant 0 : index
    %c0_161 = arith.constant 0 : index
    %317 = vector.load %arg7[%c0_160, %c0_161] : memref<8x128xf32, #tpu.memory_space<vmem>>, vector<8x128xf32>
    tpu.vector_store %arg7[%c0_160, %c0_161], %315 {strides = array<i32>} : memref<8x128xf32, #tpu.memory_space<vmem>>, vector<8x128xf32>,
    %318 = arith.index_cast %c6_i32 : i32 to index
    %c0_162 = arith.constant 0 : index
    %c0_163 = arith.constant 0 : index
    %319 = vector.load %arg6[%318, %c0_162, %c0_163] : memref<8x8x128xf32, #tpu.memory_space<vmem>>, vector<1x8x128xf32>
    %320 = vector.shape_cast %319 : vector<1x8x128xf32> to vector<8x128xf32>
    %321 = vector.shape_cast %315 : vector<8x128xf32> to vector<1x8x128xf32>
    tpu.vector_store %arg6[%318, %c0_162, %c0_163], %321 {strides = array<i32>} : memref<8x8x128xf32, #tpu.memory_space<vmem>>, vector<1x8x128xf32>,
    %c7_i32 = arith.constant 7 : i32
    %322 = arith.index_cast %c7_i32 : i32 to index
    %c0_164 = arith.constant 0 : index
    %c0_165 = arith.constant 0 : index
    %323 = vector.load %arg6[%322, %c0_164, %c0_165] : memref<8x8x128xf32, #tpu.memory_space<vmem>>, vector<1x8x128xf32>
    %324 = vector.shape_cast %323 : vector<1x8x128xf32> to vector<8x128xf32>
    %c0_166 = arith.constant 0 : index
    %c0_167 = arith.constant 0 : index
    %325 = vector.load %arg7[%c0_166, %c0_167] : memref<8x128xf32, #tpu.memory_space<vmem>>, vector<8x128xf32>
    %c0_168 = arith.constant 0 : index
    %c0_169 = arith.constant 0 : index
    %326 = vector.load %arg8[%c0_168, %c0_169] : memref<8x128xf32, #tpu.memory_space<vmem>>, vector<8x128xf32>
    %327 = tpu.concatenate %324, %325 in 1 : vector<8x128xf32>, vector<8x128xf32> -> vector<8x256xf32>
    %328 = arith.truncf %327 : vector<8x256xf32> to vector<8x256xbf16>
    %c0_170 = arith.constant 0 : index
    %c0_171 = arith.constant 0 : index
    %c0_172 = arith.constant 0 : index
    %329 = vector.load %arg1[%c0_170, %c0_171, %c0_172] : memref<2x256x512xbf16, #tpu.memory_space<vmem>>, vector<1x256x512xbf16>
    %330 = vector.shape_cast %329 : vector<1x256x512xbf16> to vector<256x512xbf16>
    %cst_173 = arith.constant dense<0.000000e+00> : vector<8x512xf32>
    %331 = tpu.matmul %328, %330, %cst_173 {dimension_numbers = #tpu.dot_dimension_numbers<[1], [0], [0], [1], [0, 0, 1, 1], [], []>} : vector<8x256xbf16>, vector<256x512xbf16>, vector<8x512xf32> -> vector<8x512xf32>
    %c0_174 = arith.constant 0 : index
    %c0_175 = arith.constant 0 : index
    %c0_176 = arith.constant 0 : index
    %332 = vector.load %arg2[%c0_174, %c0_175, %c0_176] : memref<2x1x512xf32, #tpu.memory_space<vmem>>, vector<1x1x512xf32>
    %333 = vector.shape_cast %332 : vector<1x1x512xf32> to vector<1x512xf32>
    %334 = vector.broadcast %333 : vector<1x512xf32> to vector<8x512xf32>
    %335 = arith.addf %331, %334 : vector<8x512xf32>
    %336 = vector.extract_strided_slice %335 {offsets = [0, 0], sizes = [8, 128], strides = [1, 1]} : vector<8x512xf32> to vector<8x128xf32>
    %337 = arith.negf %336 : vector<8x128xf32>
    %338 = math.exp %337 : vector<8x128xf32>
    %cst_177 = arith.constant 1.000000e+00 : f32
    %339 = vector.broadcast %cst_177 : f32 to vector<8x128xf32>
    %340 = arith.addf %339, %338 : vector<8x128xf32>
    %341 = arith.divf %339, %340 : vector<8x128xf32>
    %342 = vector.extract_strided_slice %335 {offsets = [0, 128], sizes = [8, 128], strides = [1, 1]} : vector<8x512xf32> to vector<8x128xf32>
    %343 = arith.negf %342 : vector<8x128xf32>
    %344 = math.exp %343 : vector<8x128xf32>
    %cst_178 = arith.constant 1.000000e+00 : f32
    %345 = vector.broadcast %cst_178 : f32 to vector<8x128xf32>
    %346 = arith.addf %345, %344 : vector<8x128xf32>
    %347 = arith.divf %345, %346 : vector<8x128xf32>
    %348 = vector.extract_strided_slice %335 {offsets = [0, 256], sizes = [8, 128], strides = [1, 1]} : vector<8x512xf32> to vector<8x128xf32>
    %349 = math.tanh %348 : vector<8x128xf32>
    %350 = vector.extract_strided_slice %335 {offsets = [0, 384], sizes = [8, 128], strides = [1, 1]} : vector<8x512xf32> to vector<8x128xf32>
    %351 = arith.negf %350 : vector<8x128xf32>
    %352 = math.exp %351 : vector<8x128xf32>
    %cst_179 = arith.constant 1.000000e+00 : f32
    %353 = vector.broadcast %cst_179 : f32 to vector<8x128xf32>
    %354 = arith.addf %353, %352 : vector<8x128xf32>
    %355 = arith.divf %353, %354 : vector<8x128xf32>
    %356 = arith.mulf %347, %326 : vector<8x128xf32>
    %357 = arith.mulf %341, %349 : vector<8x128xf32>
    %358 = arith.addf %356, %357 : vector<8x128xf32>
    %359 = math.tanh %358 : vector<8x128xf32>
    %360 = arith.mulf %355, %359 : vector<8x128xf32>
    %c0_180 = arith.constant 0 : index
    %c0_181 = arith.constant 0 : index
    %361 = vector.load %arg8[%c0_180, %c0_181] : memref<8x128xf32, #tpu.memory_space<vmem>>, vector<8x128xf32>
    tpu.vector_store %arg8[%c0_180, %c0_181], %358 {strides = array<i32>} : memref<8x128xf32, #tpu.memory_space<vmem>>, vector<8x128xf32>,
    %c0_182 = arith.constant 0 : index
    %c0_183 = arith.constant 0 : index
    %362 = vector.load %arg7[%c0_182, %c0_183] : memref<8x128xf32, #tpu.memory_space<vmem>>, vector<8x128xf32>
    tpu.vector_store %arg7[%c0_182, %c0_183], %360 {strides = array<i32>} : memref<8x128xf32, #tpu.memory_space<vmem>>, vector<8x128xf32>,
    %363 = arith.index_cast %c7_i32 : i32 to index
    %c0_184 = arith.constant 0 : index
    %c0_185 = arith.constant 0 : index
    %364 = vector.load %arg6[%363, %c0_184, %c0_185] : memref<8x8x128xf32, #tpu.memory_space<vmem>>, vector<1x8x128xf32>
    %365 = vector.shape_cast %364 : vector<1x8x128xf32> to vector<8x128xf32>
    %366 = vector.shape_cast %360 : vector<8x128xf32> to vector<1x8x128xf32>
    tpu.vector_store %arg6[%363, %c0_184, %c0_185], %366 {strides = array<i32>} : memref<8x8x128xf32, #tpu.memory_space<vmem>>, vector<1x8x128xf32>,
    %c8_i32 = arith.constant 8 : i32
    %cst_186 = arith.constant 0.000000e+00 : f32
    %367 = vector.broadcast %cst_186 : f32 to vector<8x128xf32>
    %c0_187 = arith.constant 0 : index
    %c0_188 = arith.constant 0 : index
    %368 = vector.load %arg7[%c0_187, %c0_188] : memref<8x128xf32, #tpu.memory_space<vmem>>, vector<8x128xf32>
    tpu.vector_store %arg7[%c0_187, %c0_188], %367 {strides = array<i32>} : memref<8x128xf32, #tpu.memory_space<vmem>>, vector<8x128xf32>,
    %cst_189 = arith.constant 0.000000e+00 : f32
    %369 = vector.broadcast %cst_189 : f32 to vector<8x128xf32>
    %c0_190 = arith.constant 0 : index
    %c0_191 = arith.constant 0 : index
    %370 = vector.load %arg8[%c0_190, %c0_191] : memref<8x128xf32, #tpu.memory_space<vmem>>, vector<8x128xf32>
    tpu.vector_store %arg8[%c0_190, %c0_191], %369 {strides = array<i32>} : memref<8x128xf32, #tpu.memory_space<vmem>>, vector<8x128xf32>,
    %c0_i32_192 = arith.constant 0 : i32
    %371 = arith.index_cast %c0_i32_192 : i32 to index
    %c0_193 = arith.constant 0 : index
    %c0_194 = arith.constant 0 : index
    %372 = vector.load %arg6[%371, %c0_193, %c0_194] : memref<8x8x128xf32, #tpu.memory_space<vmem>>, vector<1x8x128xf32>
    %373 = vector.shape_cast %372 : vector<1x8x128xf32> to vector<8x128xf32>
    %c0_195 = arith.constant 0 : index
    %c0_196 = arith.constant 0 : index
    %374 = vector.load %arg7[%c0_195, %c0_196] : memref<8x128xf32, #tpu.memory_space<vmem>>, vector<8x128xf32>
    %c0_197 = arith.constant 0 : index
    %c0_198 = arith.constant 0 : index
    %375 = vector.load %arg8[%c0_197, %c0_198] : memref<8x128xf32, #tpu.memory_space<vmem>>, vector<8x128xf32>
    %376 = tpu.concatenate %373, %374 in 1 : vector<8x128xf32>, vector<8x128xf32> -> vector<8x256xf32>
    %377 = arith.truncf %376 : vector<8x256xf32> to vector<8x256xbf16>
    %c1 = arith.constant 1 : index
    %c0_199 = arith.constant 0 : index
    %c0_200 = arith.constant 0 : index
    %378 = vector.load %arg1[%c1, %c0_199, %c0_200] : memref<2x256x512xbf16, #tpu.memory_space<vmem>>, vector<1x256x512xbf16>
    %379 = vector.shape_cast %378 : vector<1x256x512xbf16> to vector<256x512xbf16>
    %cst_201 = arith.constant dense<0.000000e+00> : vector<8x512xf32>
    %380 = tpu.matmul %377, %379, %cst_201 {dimension_numbers = #tpu.dot_dimension_numbers<[1], [0], [0], [1], [0, 0, 1, 1], [], []>} : vector<8x256xbf16>, vector<256x512xbf16>, vector<8x512xf32> -> vector<8x512xf32>
    %c1_202 = arith.constant 1 : index
    %c0_203 = arith.constant 0 : index
    %c0_204 = arith.constant 0 : index
    %381 = vector.load %arg2[%c1_202, %c0_203, %c0_204] : memref<2x1x512xf32, #tpu.memory_space<vmem>>, vector<1x1x512xf32>
    %382 = vector.shape_cast %381 : vector<1x1x512xf32> to vector<1x512xf32>
    %383 = vector.broadcast %382 : vector<1x512xf32> to vector<8x512xf32>
    %384 = arith.addf %380, %383 : vector<8x512xf32>
    %385 = vector.extract_strided_slice %384 {offsets = [0, 0], sizes = [8, 128], strides = [1, 1]} : vector<8x512xf32> to vector<8x128xf32>
    %386 = arith.negf %385 : vector<8x128xf32>
    %387 = math.exp %386 : vector<8x128xf32>
    %cst_205 = arith.constant 1.000000e+00 : f32
    %388 = vector.broadcast %cst_205 : f32 to vector<8x128xf32>
    %389 = arith.addf %388, %387 : vector<8x128xf32>
    %390 = arith.divf %388, %389 : vector<8x128xf32>
    %391 = vector.extract_strided_slice %384 {offsets = [0, 128], sizes = [8, 128], strides = [1, 1]} : vector<8x512xf32> to vector<8x128xf32>
    %392 = arith.negf %391 : vector<8x128xf32>
    %393 = math.exp %392 : vector<8x128xf32>
    %cst_206 = arith.constant 1.000000e+00 : f32
    %394 = vector.broadcast %cst_206 : f32 to vector<8x128xf32>
    %395 = arith.addf %394, %393 : vector<8x128xf32>
    %396 = arith.divf %394, %395 : vector<8x128xf32>
    %397 = vector.extract_strided_slice %384 {offsets = [0, 256], sizes = [8, 128], strides = [1, 1]} : vector<8x512xf32> to vector<8x128xf32>
    %398 = math.tanh %397 : vector<8x128xf32>
    %399 = vector.extract_strided_slice %384 {offsets = [0, 384], sizes = [8, 128], strides = [1, 1]} : vector<8x512xf32> to vector<8x128xf32>
    %400 = arith.negf %399 : vector<8x128xf32>
    %401 = math.exp %400 : vector<8x128xf32>
    %cst_207 = arith.constant 1.000000e+00 : f32
    %402 = vector.broadcast %cst_207 : f32 to vector<8x128xf32>
    %403 = arith.addf %402, %401 : vector<8x128xf32>
    %404 = arith.divf %402, %403 : vector<8x128xf32>
    %405 = arith.mulf %396, %375 : vector<8x128xf32>
    %406 = arith.mulf %390, %398 : vector<8x128xf32>
    %407 = arith.addf %405, %406 : vector<8x128xf32>
    %408 = math.tanh %407 : vector<8x128xf32>
    %409 = arith.mulf %404, %408 : vector<8x128xf32>
    %c0_208 = arith.constant 0 : index
    %c0_209 = arith.constant 0 : index
    %410 = vector.load %arg8[%c0_208, %c0_209] : memref<8x128xf32, #tpu.memory_space<vmem>>, vector<8x128xf32>
    tpu.vector_store %arg8[%c0_208, %c0_209], %407 {strides = array<i32>} : memref<8x128xf32, #tpu.memory_space<vmem>>, vector<8x128xf32>,
    %c0_210 = arith.constant 0 : index
    %c0_211 = arith.constant 0 : index
    %411 = vector.load %arg7[%c0_210, %c0_211] : memref<8x128xf32, #tpu.memory_space<vmem>>, vector<8x128xf32>
    tpu.vector_store %arg7[%c0_210, %c0_211], %409 {strides = array<i32>} : memref<8x128xf32, #tpu.memory_space<vmem>>, vector<8x128xf32>,
    %412 = arith.index_cast %c0_i32_192 : i32 to index
    %c0_212 = arith.constant 0 : index
    %c0_213 = arith.constant 0 : index
    %413 = vector.load %arg6[%412, %c0_212, %c0_213] : memref<8x8x128xf32, #tpu.memory_space<vmem>>, vector<1x8x128xf32>
    %414 = vector.shape_cast %413 : vector<1x8x128xf32> to vector<8x128xf32>
    %415 = vector.shape_cast %409 : vector<8x128xf32> to vector<1x8x128xf32>
    tpu.vector_store %arg6[%412, %c0_212, %c0_213], %415 {strides = array<i32>} : memref<8x8x128xf32, #tpu.memory_space<vmem>>, vector<1x8x128xf32>,
    %c1_i32_214 = arith.constant 1 : i32
    %416 = arith.index_cast %c1_i32_214 : i32 to index
    %c0_215 = arith.constant 0 : index
    %c0_216 = arith.constant 0 : index
    %417 = vector.load %arg6[%416, %c0_215, %c0_216] : memref<8x8x128xf32, #tpu.memory_space<vmem>>, vector<1x8x128xf32>
    %418 = vector.shape_cast %417 : vector<1x8x128xf32> to vector<8x128xf32>
    %c0_217 = arith.constant 0 : index
    %c0_218 = arith.constant 0 : index
    %419 = vector.load %arg7[%c0_217, %c0_218] : memref<8x128xf32, #tpu.memory_space<vmem>>, vector<8x128xf32>
    %c0_219 = arith.constant 0 : index
    %c0_220 = arith.constant 0 : index
    %420 = vector.load %arg8[%c0_219, %c0_220] : memref<8x128xf32, #tpu.memory_space<vmem>>, vector<8x128xf32>
    %421 = tpu.concatenate %418, %419 in 1 : vector<8x128xf32>, vector<8x128xf32> -> vector<8x256xf32>
    %422 = arith.truncf %421 : vector<8x256xf32> to vector<8x256xbf16>
    %c1_221 = arith.constant 1 : index
    %c0_222 = arith.constant 0 : index
    %c0_223 = arith.constant 0 : index
    %423 = vector.load %arg1[%c1_221, %c0_222, %c0_223] : memref<2x256x512xbf16, #tpu.memory_space<vmem>>, vector<1x256x512xbf16>
    %424 = vector.shape_cast %423 : vector<1x256x512xbf16> to vector<256x512xbf16>
    %cst_224 = arith.constant dense<0.000000e+00> : vector<8x512xf32>
    %425 = tpu.matmul %422, %424, %cst_224 {dimension_numbers = #tpu.dot_dimension_numbers<[1], [0], [0], [1], [0, 0, 1, 1], [], []>} : vector<8x256xbf16>, vector<256x512xbf16>, vector<8x512xf32> -> vector<8x512xf32>
    %c1_225 = arith.constant 1 : index
    %c0_226 = arith.constant 0 : index
    %c0_227 = arith.constant 0 : index
    %426 = vector.load %arg2[%c1_225, %c0_226, %c0_227] : memref<2x1x512xf32, #tpu.memory_space<vmem>>, vector<1x1x512xf32>
    %427 = vector.shape_cast %426 : vector<1x1x512xf32> to vector<1x512xf32>
    %428 = vector.broadcast %427 : vector<1x512xf32> to vector<8x512xf32>
    %429 = arith.addf %425, %428 : vector<8x512xf32>
    %430 = vector.extract_strided_slice %429 {offsets = [0, 0], sizes = [8, 128], strides = [1, 1]} : vector<8x512xf32> to vector<8x128xf32>
    %431 = arith.negf %430 : vector<8x128xf32>
    %432 = math.exp %431 : vector<8x128xf32>
    %cst_228 = arith.constant 1.000000e+00 : f32
    %433 = vector.broadcast %cst_228 : f32 to vector<8x128xf32>
    %434 = arith.addf %433, %432 : vector<8x128xf32>
    %435 = arith.divf %433, %434 : vector<8x128xf32>
    %436 = vector.extract_strided_slice %429 {offsets = [0, 128], sizes = [8, 128], strides = [1, 1]} : vector<8x512xf32> to vector<8x128xf32>
    %437 = arith.negf %436 : vector<8x128xf32>
    %438 = math.exp %437 : vector<8x128xf32>
    %cst_229 = arith.constant 1.000000e+00 : f32
    %439 = vector.broadcast %cst_229 : f32 to vector<8x128xf32>
    %440 = arith.addf %439, %438 : vector<8x128xf32>
    %441 = arith.divf %439, %440 : vector<8x128xf32>
    %442 = vector.extract_strided_slice %429 {offsets = [0, 256], sizes = [8, 128], strides = [1, 1]} : vector<8x512xf32> to vector<8x128xf32>
    %443 = math.tanh %442 : vector<8x128xf32>
    %444 = vector.extract_strided_slice %429 {offsets = [0, 384], sizes = [8, 128], strides = [1, 1]} : vector<8x512xf32> to vector<8x128xf32>
    %445 = arith.negf %444 : vector<8x128xf32>
    %446 = math.exp %445 : vector<8x128xf32>
    %cst_230 = arith.constant 1.000000e+00 : f32
    %447 = vector.broadcast %cst_230 : f32 to vector<8x128xf32>
    %448 = arith.addf %447, %446 : vector<8x128xf32>
    %449 = arith.divf %447, %448 : vector<8x128xf32>
    %450 = arith.mulf %441, %420 : vector<8x128xf32>
    %451 = arith.mulf %435, %443 : vector<8x128xf32>
    %452 = arith.addf %450, %451 : vector<8x128xf32>
    %453 = math.tanh %452 : vector<8x128xf32>
    %454 = arith.mulf %449, %453 : vector<8x128xf32>
    %c0_231 = arith.constant 0 : index
    %c0_232 = arith.constant 0 : index
    %455 = vector.load %arg8[%c0_231, %c0_232] : memref<8x128xf32, #tpu.memory_space<vmem>>, vector<8x128xf32>
    tpu.vector_store %arg8[%c0_231, %c0_232], %452 {strides = array<i32>} : memref<8x128xf32, #tpu.memory_space<vmem>>, vector<8x128xf32>,
    %c0_233 = arith.constant 0 : index
    %c0_234 = arith.constant 0 : index
    %456 = vector.load %arg7[%c0_233, %c0_234] : memref<8x128xf32, #tpu.memory_space<vmem>>, vector<8x128xf32>
    tpu.vector_store %arg7[%c0_233, %c0_234], %454 {strides = array<i32>} : memref<8x128xf32, #tpu.memory_space<vmem>>, vector<8x128xf32>,
    %457 = arith.index_cast %c1_i32_214 : i32 to index
    %c0_235 = arith.constant 0 : index
    %c0_236 = arith.constant 0 : index
    %458 = vector.load %arg6[%457, %c0_235, %c0_236] : memref<8x8x128xf32, #tpu.memory_space<vmem>>, vector<1x8x128xf32>
    %459 = vector.shape_cast %458 : vector<1x8x128xf32> to vector<8x128xf32>
    %460 = vector.shape_cast %454 : vector<8x128xf32> to vector<1x8x128xf32>
    tpu.vector_store %arg6[%457, %c0_235, %c0_236], %460 {strides = array<i32>} : memref<8x8x128xf32, #tpu.memory_space<vmem>>, vector<1x8x128xf32>,
    %c2_i32_237 = arith.constant 2 : i32
    %461 = arith.index_cast %c2_i32_237 : i32 to index
    %c0_238 = arith.constant 0 : index
    %c0_239 = arith.constant 0 : index
    %462 = vector.load %arg6[%461, %c0_238, %c0_239] : memref<8x8x128xf32, #tpu.memory_space<vmem>>, vector<1x8x128xf32>
    %463 = vector.shape_cast %462 : vector<1x8x128xf32> to vector<8x128xf32>
    %c0_240 = arith.constant 0 : index
    %c0_241 = arith.constant 0 : index
    %464 = vector.load %arg7[%c0_240, %c0_241] : memref<8x128xf32, #tpu.memory_space<vmem>>, vector<8x128xf32>
    %c0_242 = arith.constant 0 : index
    %c0_243 = arith.constant 0 : index
    %465 = vector.load %arg8[%c0_242, %c0_243] : memref<8x128xf32, #tpu.memory_space<vmem>>, vector<8x128xf32>
    %466 = tpu.concatenate %463, %464 in 1 : vector<8x128xf32>, vector<8x128xf32> -> vector<8x256xf32>
    %467 = arith.truncf %466 : vector<8x256xf32> to vector<8x256xbf16>
    %c1_244 = arith.constant 1 : index
    %c0_245 = arith.constant 0 : index
    %c0_246 = arith.constant 0 : index
    %468 = vector.load %arg1[%c1_244, %c0_245, %c0_246] : memref<2x256x512xbf16, #tpu.memory_space<vmem>>, vector<1x256x512xbf16>
    %469 = vector.shape_cast %468 : vector<1x256x512xbf16> to vector<256x512xbf16>
    %cst_247 = arith.constant dense<0.000000e+00> : vector<8x512xf32>
    %470 = tpu.matmul %467, %469, %cst_247 {dimension_numbers = #tpu.dot_dimension_numbers<[1], [0], [0], [1], [0, 0, 1, 1], [], []>} : vector<8x256xbf16>, vector<256x512xbf16>, vector<8x512xf32> -> vector<8x512xf32>
    %c1_248 = arith.constant 1 : index
    %c0_249 = arith.constant 0 : index
    %c0_250 = arith.constant 0 : index
    %471 = vector.load %arg2[%c1_248, %c0_249, %c0_250] : memref<2x1x512xf32, #tpu.memory_space<vmem>>, vector<1x1x512xf32>
    %472 = vector.shape_cast %471 : vector<1x1x512xf32> to vector<1x512xf32>
    %473 = vector.broadcast %472 : vector<1x512xf32> to vector<8x512xf32>
    %474 = arith.addf %470, %473 : vector<8x512xf32>
    %475 = vector.extract_strided_slice %474 {offsets = [0, 0], sizes = [8, 128], strides = [1, 1]} : vector<8x512xf32> to vector<8x128xf32>
    %476 = arith.negf %475 : vector<8x128xf32>
    %477 = math.exp %476 : vector<8x128xf32>
    %cst_251 = arith.constant 1.000000e+00 : f32
    %478 = vector.broadcast %cst_251 : f32 to vector<8x128xf32>
    %479 = arith.addf %478, %477 : vector<8x128xf32>
    %480 = arith.divf %478, %479 : vector<8x128xf32>
    %481 = vector.extract_strided_slice %474 {offsets = [0, 128], sizes = [8, 128], strides = [1, 1]} : vector<8x512xf32> to vector<8x128xf32>
    %482 = arith.negf %481 : vector<8x128xf32>
    %483 = math.exp %482 : vector<8x128xf32>
    %cst_252 = arith.constant 1.000000e+00 : f32
    %484 = vector.broadcast %cst_252 : f32 to vector<8x128xf32>
    %485 = arith.addf %484, %483 : vector<8x128xf32>
    %486 = arith.divf %484, %485 : vector<8x128xf32>
    %487 = vector.extract_strided_slice %474 {offsets = [0, 256], sizes = [8, 128], strides = [1, 1]} : vector<8x512xf32> to vector<8x128xf32>
    %488 = math.tanh %487 : vector<8x128xf32>
    %489 = vector.extract_strided_slice %474 {offsets = [0, 384], sizes = [8, 128], strides = [1, 1]} : vector<8x512xf32> to vector<8x128xf32>
    %490 = arith.negf %489 : vector<8x128xf32>
    %491 = math.exp %490 : vector<8x128xf32>
    %cst_253 = arith.constant 1.000000e+00 : f32
    %492 = vector.broadcast %cst_253 : f32 to vector<8x128xf32>
    %493 = arith.addf %492, %491 : vector<8x128xf32>
    %494 = arith.divf %492, %493 : vector<8x128xf32>
    %495 = arith.mulf %486, %465 : vector<8x128xf32>
    %496 = arith.mulf %480, %488 : vector<8x128xf32>
    %497 = arith.addf %495, %496 : vector<8x128xf32>
    %498 = math.tanh %497 : vector<8x128xf32>
    %499 = arith.mulf %494, %498 : vector<8x128xf32>
    %c0_254 = arith.constant 0 : index
    %c0_255 = arith.constant 0 : index
    %500 = vector.load %arg8[%c0_254, %c0_255] : memref<8x128xf32, #tpu.memory_space<vmem>>, vector<8x128xf32>
    tpu.vector_store %arg8[%c0_254, %c0_255], %497 {strides = array<i32>} : memref<8x128xf32, #tpu.memory_space<vmem>>, vector<8x128xf32>,
    %c0_256 = arith.constant 0 : index
    %c0_257 = arith.constant 0 : index
    %501 = vector.load %arg7[%c0_256, %c0_257] : memref<8x128xf32, #tpu.memory_space<vmem>>, vector<8x128xf32>
    tpu.vector_store %arg7[%c0_256, %c0_257], %499 {strides = array<i32>} : memref<8x128xf32, #tpu.memory_space<vmem>>, vector<8x128xf32>,
    %502 = arith.index_cast %c2_i32_237 : i32 to index
    %c0_258 = arith.constant 0 : index
    %c0_259 = arith.constant 0 : index
    %503 = vector.load %arg6[%502, %c0_258, %c0_259] : memref<8x8x128xf32, #tpu.memory_space<vmem>>, vector<1x8x128xf32>
    %504 = vector.shape_cast %503 : vector<1x8x128xf32> to vector<8x128xf32>
    %505 = vector.shape_cast %499 : vector<8x128xf32> to vector<1x8x128xf32>
    tpu.vector_store %arg6[%502, %c0_258, %c0_259], %505 {strides = array<i32>} : memref<8x8x128xf32, #tpu.memory_space<vmem>>, vector<1x8x128xf32>,
    %c3_i32_260 = arith.constant 3 : i32
    %506 = arith.index_cast %c3_i32_260 : i32 to index
    %c0_261 = arith.constant 0 : index
    %c0_262 = arith.constant 0 : index
    %507 = vector.load %arg6[%506, %c0_261, %c0_262] : memref<8x8x128xf32, #tpu.memory_space<vmem>>, vector<1x8x128xf32>
    %508 = vector.shape_cast %507 : vector<1x8x128xf32> to vector<8x128xf32>
    %c0_263 = arith.constant 0 : index
    %c0_264 = arith.constant 0 : index
    %509 = vector.load %arg7[%c0_263, %c0_264] : memref<8x128xf32, #tpu.memory_space<vmem>>, vector<8x128xf32>
    %c0_265 = arith.constant 0 : index
    %c0_266 = arith.constant 0 : index
    %510 = vector.load %arg8[%c0_265, %c0_266] : memref<8x128xf32, #tpu.memory_space<vmem>>, vector<8x128xf32>
    %511 = tpu.concatenate %508, %509 in 1 : vector<8x128xf32>, vector<8x128xf32> -> vector<8x256xf32>
    %512 = arith.truncf %511 : vector<8x256xf32> to vector<8x256xbf16>
    %c1_267 = arith.constant 1 : index
    %c0_268 = arith.constant 0 : index
    %c0_269 = arith.constant 0 : index
    %513 = vector.load %arg1[%c1_267, %c0_268, %c0_269] : memref<2x256x512xbf16, #tpu.memory_space<vmem>>, vector<1x256x512xbf16>
    %514 = vector.shape_cast %513 : vector<1x256x512xbf16> to vector<256x512xbf16>
    %cst_270 = arith.constant dense<0.000000e+00> : vector<8x512xf32>
    %515 = tpu.matmul %512, %514, %cst_270 {dimension_numbers = #tpu.dot_dimension_numbers<[1], [0], [0], [1], [0, 0, 1, 1], [], []>} : vector<8x256xbf16>, vector<256x512xbf16>, vector<8x512xf32> -> vector<8x512xf32>
    %c1_271 = arith.constant 1 : index
    %c0_272 = arith.constant 0 : index
    %c0_273 = arith.constant 0 : index
    %516 = vector.load %arg2[%c1_271, %c0_272, %c0_273] : memref<2x1x512xf32, #tpu.memory_space<vmem>>, vector<1x1x512xf32>
    %517 = vector.shape_cast %516 : vector<1x1x512xf32> to vector<1x512xf32>
    %518 = vector.broadcast %517 : vector<1x512xf32> to vector<8x512xf32>
    %519 = arith.addf %515, %518 : vector<8x512xf32>
    %520 = vector.extract_strided_slice %519 {offsets = [0, 0], sizes = [8, 128], strides = [1, 1]} : vector<8x512xf32> to vector<8x128xf32>
    %521 = arith.negf %520 : vector<8x128xf32>
    %522 = math.exp %521 : vector<8x128xf32>
    %cst_274 = arith.constant 1.000000e+00 : f32
    %523 = vector.broadcast %cst_274 : f32 to vector<8x128xf32>
    %524 = arith.addf %523, %522 : vector<8x128xf32>
    %525 = arith.divf %523, %524 : vector<8x128xf32>
    %526 = vector.extract_strided_slice %519 {offsets = [0, 128], sizes = [8, 128], strides = [1, 1]} : vector<8x512xf32> to vector<8x128xf32>
    %527 = arith.negf %526 : vector<8x128xf32>
    %528 = math.exp %527 : vector<8x128xf32>
    %cst_275 = arith.constant 1.000000e+00 : f32
    %529 = vector.broadcast %cst_275 : f32 to vector<8x128xf32>
    %530 = arith.addf %529, %528 : vector<8x128xf32>
    %531 = arith.divf %529, %530 : vector<8x128xf32>
    %532 = vector.extract_strided_slice %519 {offsets = [0, 256], sizes = [8, 128], strides = [1, 1]} : vector<8x512xf32> to vector<8x128xf32>
    %533 = math.tanh %532 : vector<8x128xf32>
    %534 = vector.extract_strided_slice %519 {offsets = [0, 384], sizes = [8, 128], strides = [1, 1]} : vector<8x512xf32> to vector<8x128xf32>
    %535 = arith.negf %534 : vector<8x128xf32>
    %536 = math.exp %535 : vector<8x128xf32>
    %cst_276 = arith.constant 1.000000e+00 : f32
    %537 = vector.broadcast %cst_276 : f32 to vector<8x128xf32>
    %538 = arith.addf %537, %536 : vector<8x128xf32>
    %539 = arith.divf %537, %538 : vector<8x128xf32>
    %540 = arith.mulf %531, %510 : vector<8x128xf32>
    %541 = arith.mulf %525, %533 : vector<8x128xf32>
    %542 = arith.addf %540, %541 : vector<8x128xf32>
    %543 = math.tanh %542 : vector<8x128xf32>
    %544 = arith.mulf %539, %543 : vector<8x128xf32>
    %c0_277 = arith.constant 0 : index
    %c0_278 = arith.constant 0 : index
    %545 = vector.load %arg8[%c0_277, %c0_278] : memref<8x128xf32, #tpu.memory_space<vmem>>, vector<8x128xf32>
    tpu.vector_store %arg8[%c0_277, %c0_278], %542 {strides = array<i32>} : memref<8x128xf32, #tpu.memory_space<vmem>>, vector<8x128xf32>,
    %c0_279 = arith.constant 0 : index
    %c0_280 = arith.constant 0 : index
    %546 = vector.load %arg7[%c0_279, %c0_280] : memref<8x128xf32, #tpu.memory_space<vmem>>, vector<8x128xf32>
    tpu.vector_store %arg7[%c0_279, %c0_280], %544 {strides = array<i32>} : memref<8x128xf32, #tpu.memory_space<vmem>>, vector<8x128xf32>,
    %547 = arith.index_cast %c3_i32_260 : i32 to index
    %c0_281 = arith.constant 0 : index
    %c0_282 = arith.constant 0 : index
    %548 = vector.load %arg6[%547, %c0_281, %c0_282] : memref<8x8x128xf32, #tpu.memory_space<vmem>>, vector<1x8x128xf32>
    %549 = vector.shape_cast %548 : vector<1x8x128xf32> to vector<8x128xf32>
    %550 = vector.shape_cast %544 : vector<8x128xf32> to vector<1x8x128xf32>
    tpu.vector_store %arg6[%547, %c0_281, %c0_282], %550 {strides = array<i32>} : memref<8x8x128xf32, #tpu.memory_space<vmem>>, vector<1x8x128xf32>,
    %c4_i32_283 = arith.constant 4 : i32
    %551 = arith.index_cast %c4_i32_283 : i32 to index
    %c0_284 = arith.constant 0 : index
    %c0_285 = arith.constant 0 : index
    %552 = vector.load %arg6[%551, %c0_284, %c0_285] : memref<8x8x128xf32, #tpu.memory_space<vmem>>, vector<1x8x128xf32>
    %553 = vector.shape_cast %552 : vector<1x8x128xf32> to vector<8x128xf32>
    %c0_286 = arith.constant 0 : index
    %c0_287 = arith.constant 0 : index
    %554 = vector.load %arg7[%c0_286, %c0_287] : memref<8x128xf32, #tpu.memory_space<vmem>>, vector<8x128xf32>
    %c0_288 = arith.constant 0 : index
    %c0_289 = arith.constant 0 : index
    %555 = vector.load %arg8[%c0_288, %c0_289] : memref<8x128xf32, #tpu.memory_space<vmem>>, vector<8x128xf32>
    %556 = tpu.concatenate %553, %554 in 1 : vector<8x128xf32>, vector<8x128xf32> -> vector<8x256xf32>
    %557 = arith.truncf %556 : vector<8x256xf32> to vector<8x256xbf16>
    %c1_290 = arith.constant 1 : index
    %c0_291 = arith.constant 0 : index
    %c0_292 = arith.constant 0 : index
    %558 = vector.load %arg1[%c1_290, %c0_291, %c0_292] : memref<2x256x512xbf16, #tpu.memory_space<vmem>>, vector<1x256x512xbf16>
    %559 = vector.shape_cast %558 : vector<1x256x512xbf16> to vector<256x512xbf16>
    %cst_293 = arith.constant dense<0.000000e+00> : vector<8x512xf32>
    %560 = tpu.matmul %557, %559, %cst_293 {dimension_numbers = #tpu.dot_dimension_numbers<[1], [0], [0], [1], [0, 0, 1, 1], [], []>} : vector<8x256xbf16>, vector<256x512xbf16>, vector<8x512xf32> -> vector<8x512xf32>
    %c1_294 = arith.constant 1 : index
    %c0_295 = arith.constant 0 : index
    %c0_296 = arith.constant 0 : index
    %561 = vector.load %arg2[%c1_294, %c0_295, %c0_296] : memref<2x1x512xf32, #tpu.memory_space<vmem>>, vector<1x1x512xf32>
    %562 = vector.shape_cast %561 : vector<1x1x512xf32> to vector<1x512xf32>
    %563 = vector.broadcast %562 : vector<1x512xf32> to vector<8x512xf32>
    %564 = arith.addf %560, %563 : vector<8x512xf32>
    %565 = vector.extract_strided_slice %564 {offsets = [0, 0], sizes = [8, 128], strides = [1, 1]} : vector<8x512xf32> to vector<8x128xf32>
    %566 = arith.negf %565 : vector<8x128xf32>
    %567 = math.exp %566 : vector<8x128xf32>
    %cst_297 = arith.constant 1.000000e+00 : f32
    %568 = vector.broadcast %cst_297 : f32 to vector<8x128xf32>
    %569 = arith.addf %568, %567 : vector<8x128xf32>
    %570 = arith.divf %568, %569 : vector<8x128xf32>
    %571 = vector.extract_strided_slice %564 {offsets = [0, 128], sizes = [8, 128], strides = [1, 1]} : vector<8x512xf32> to vector<8x128xf32>
    %572 = arith.negf %571 : vector<8x128xf32>
    %573 = math.exp %572 : vector<8x128xf32>
    %cst_298 = arith.constant 1.000000e+00 : f32
    %574 = vector.broadcast %cst_298 : f32 to vector<8x128xf32>
    %575 = arith.addf %574, %573 : vector<8x128xf32>
    %576 = arith.divf %574, %575 : vector<8x128xf32>
    %577 = vector.extract_strided_slice %564 {offsets = [0, 256], sizes = [8, 128], strides = [1, 1]} : vector<8x512xf32> to vector<8x128xf32>
    %578 = math.tanh %577 : vector<8x128xf32>
    %579 = vector.extract_strided_slice %564 {offsets = [0, 384], sizes = [8, 128], strides = [1, 1]} : vector<8x512xf32> to vector<8x128xf32>
    %580 = arith.negf %579 : vector<8x128xf32>
    %581 = math.exp %580 : vector<8x128xf32>
    %cst_299 = arith.constant 1.000000e+00 : f32
    %582 = vector.broadcast %cst_299 : f32 to vector<8x128xf32>
    %583 = arith.addf %582, %581 : vector<8x128xf32>
    %584 = arith.divf %582, %583 : vector<8x128xf32>
    %585 = arith.mulf %576, %555 : vector<8x128xf32>
    %586 = arith.mulf %570, %578 : vector<8x128xf32>
    %587 = arith.addf %585, %586 : vector<8x128xf32>
    %588 = math.tanh %587 : vector<8x128xf32>
    %589 = arith.mulf %584, %588 : vector<8x128xf32>
    %c0_300 = arith.constant 0 : index
    %c0_301 = arith.constant 0 : index
    %590 = vector.load %arg8[%c0_300, %c0_301] : memref<8x128xf32, #tpu.memory_space<vmem>>, vector<8x128xf32>
    tpu.vector_store %arg8[%c0_300, %c0_301], %587 {strides = array<i32>} : memref<8x128xf32, #tpu.memory_space<vmem>>, vector<8x128xf32>,
    %c0_302 = arith.constant 0 : index
    %c0_303 = arith.constant 0 : index
    %591 = vector.load %arg7[%c0_302, %c0_303] : memref<8x128xf32, #tpu.memory_space<vmem>>, vector<8x128xf32>
    tpu.vector_store %arg7[%c0_302, %c0_303], %589 {strides = array<i32>} : memref<8x128xf32, #tpu.memory_space<vmem>>, vector<8x128xf32>,
    %592 = arith.index_cast %c4_i32_283 : i32 to index
    %c0_304 = arith.constant 0 : index
    %c0_305 = arith.constant 0 : index
    %593 = vector.load %arg6[%592, %c0_304, %c0_305] : memref<8x8x128xf32, #tpu.memory_space<vmem>>, vector<1x8x128xf32>
    %594 = vector.shape_cast %593 : vector<1x8x128xf32> to vector<8x128xf32>
    %595 = vector.shape_cast %589 : vector<8x128xf32> to vector<1x8x128xf32>
    tpu.vector_store %arg6[%592, %c0_304, %c0_305], %595 {strides = array<i32>} : memref<8x8x128xf32, #tpu.memory_space<vmem>>, vector<1x8x128xf32>,
    %c5_i32_306 = arith.constant 5 : i32
    %596 = arith.index_cast %c5_i32_306 : i32 to index
    %c0_307 = arith.constant 0 : index
    %c0_308 = arith.constant 0 : index
    %597 = vector.load %arg6[%596, %c0_307, %c0_308] : memref<8x8x128xf32, #tpu.memory_space<vmem>>, vector<1x8x128xf32>
    %598 = vector.shape_cast %597 : vector<1x8x128xf32> to vector<8x128xf32>
    %c0_309 = arith.constant 0 : index
    %c0_310 = arith.constant 0 : index
    %599 = vector.load %arg7[%c0_309, %c0_310] : memref<8x128xf32, #tpu.memory_space<vmem>>, vector<8x128xf32>
    %c0_311 = arith.constant 0 : index
    %c0_312 = arith.constant 0 : index
    %600 = vector.load %arg8[%c0_311, %c0_312] : memref<8x128xf32, #tpu.memory_space<vmem>>, vector<8x128xf32>
    %601 = tpu.concatenate %598, %599 in 1 : vector<8x128xf32>, vector<8x128xf32> -> vector<8x256xf32>
    %602 = arith.truncf %601 : vector<8x256xf32> to vector<8x256xbf16>
    %c1_313 = arith.constant 1 : index
    %c0_314 = arith.constant 0 : index
    %c0_315 = arith.constant 0 : index
    %603 = vector.load %arg1[%c1_313, %c0_314, %c0_315] : memref<2x256x512xbf16, #tpu.memory_space<vmem>>, vector<1x256x512xbf16>
    %604 = vector.shape_cast %603 : vector<1x256x512xbf16> to vector<256x512xbf16>
    %cst_316 = arith.constant dense<0.000000e+00> : vector<8x512xf32>
    %605 = tpu.matmul %602, %604, %cst_316 {dimension_numbers = #tpu.dot_dimension_numbers<[1], [0], [0], [1], [0, 0, 1, 1], [], []>} : vector<8x256xbf16>, vector<256x512xbf16>, vector<8x512xf32> -> vector<8x512xf32>
    %c1_317 = arith.constant 1 : index
    %c0_318 = arith.constant 0 : index
    %c0_319 = arith.constant 0 : index
    %606 = vector.load %arg2[%c1_317, %c0_318, %c0_319] : memref<2x1x512xf32, #tpu.memory_space<vmem>>, vector<1x1x512xf32>
    %607 = vector.shape_cast %606 : vector<1x1x512xf32> to vector<1x512xf32>
    %608 = vector.broadcast %607 : vector<1x512xf32> to vector<8x512xf32>
    %609 = arith.addf %605, %608 : vector<8x512xf32>
    %610 = vector.extract_strided_slice %609 {offsets = [0, 0], sizes = [8, 128], strides = [1, 1]} : vector<8x512xf32> to vector<8x128xf32>
    %611 = arith.negf %610 : vector<8x128xf32>
    %612 = math.exp %611 : vector<8x128xf32>
    %cst_320 = arith.constant 1.000000e+00 : f32
    %613 = vector.broadcast %cst_320 : f32 to vector<8x128xf32>
    %614 = arith.addf %613, %612 : vector<8x128xf32>
    %615 = arith.divf %613, %614 : vector<8x128xf32>
    %616 = vector.extract_strided_slice %609 {offsets = [0, 128], sizes = [8, 128], strides = [1, 1]} : vector<8x512xf32> to vector<8x128xf32>
    %617 = arith.negf %616 : vector<8x128xf32>
    %618 = math.exp %617 : vector<8x128xf32>
    %cst_321 = arith.constant 1.000000e+00 : f32
    %619 = vector.broadcast %cst_321 : f32 to vector<8x128xf32>
    %620 = arith.addf %619, %618 : vector<8x128xf32>
    %621 = arith.divf %619, %620 : vector<8x128xf32>
    %622 = vector.extract_strided_slice %609 {offsets = [0, 256], sizes = [8, 128], strides = [1, 1]} : vector<8x512xf32> to vector<8x128xf32>
    %623 = math.tanh %622 : vector<8x128xf32>
    %624 = vector.extract_strided_slice %609 {offsets = [0, 384], sizes = [8, 128], strides = [1, 1]} : vector<8x512xf32> to vector<8x128xf32>
    %625 = arith.negf %624 : vector<8x128xf32>
    %626 = math.exp %625 : vector<8x128xf32>
    %cst_322 = arith.constant 1.000000e+00 : f32
    %627 = vector.broadcast %cst_322 : f32 to vector<8x128xf32>
    %628 = arith.addf %627, %626 : vector<8x128xf32>
    %629 = arith.divf %627, %628 : vector<8x128xf32>
    %630 = arith.mulf %621, %600 : vector<8x128xf32>
    %631 = arith.mulf %615, %623 : vector<8x128xf32>
    %632 = arith.addf %630, %631 : vector<8x128xf32>
    %633 = math.tanh %632 : vector<8x128xf32>
    %634 = arith.mulf %629, %633 : vector<8x128xf32>
    %c0_323 = arith.constant 0 : index
    %c0_324 = arith.constant 0 : index
    %635 = vector.load %arg8[%c0_323, %c0_324] : memref<8x128xf32, #tpu.memory_space<vmem>>, vector<8x128xf32>
    tpu.vector_store %arg8[%c0_323, %c0_324], %632 {strides = array<i32>} : memref<8x128xf32, #tpu.memory_space<vmem>>, vector<8x128xf32>,
    %c0_325 = arith.constant 0 : index
    %c0_326 = arith.constant 0 : index
    %636 = vector.load %arg7[%c0_325, %c0_326] : memref<8x128xf32, #tpu.memory_space<vmem>>, vector<8x128xf32>
    tpu.vector_store %arg7[%c0_325, %c0_326], %634 {strides = array<i32>} : memref<8x128xf32, #tpu.memory_space<vmem>>, vector<8x128xf32>,
    %637 = arith.index_cast %c5_i32_306 : i32 to index
    %c0_327 = arith.constant 0 : index
    %c0_328 = arith.constant 0 : index
    %638 = vector.load %arg6[%637, %c0_327, %c0_328] : memref<8x8x128xf32, #tpu.memory_space<vmem>>, vector<1x8x128xf32>
    %639 = vector.shape_cast %638 : vector<1x8x128xf32> to vector<8x128xf32>
    %640 = vector.shape_cast %634 : vector<8x128xf32> to vector<1x8x128xf32>
    tpu.vector_store %arg6[%637, %c0_327, %c0_328], %640 {strides = array<i32>} : memref<8x8x128xf32, #tpu.memory_space<vmem>>, vector<1x8x128xf32>,
    %c6_i32_329 = arith.constant 6 : i32
    %641 = arith.index_cast %c6_i32_329 : i32 to index
    %c0_330 = arith.constant 0 : index
    %c0_331 = arith.constant 0 : index
    %642 = vector.load %arg6[%641, %c0_330, %c0_331] : memref<8x8x128xf32, #tpu.memory_space<vmem>>, vector<1x8x128xf32>
    %643 = vector.shape_cast %642 : vector<1x8x128xf32> to vector<8x128xf32>
    %c0_332 = arith.constant 0 : index
    %c0_333 = arith.constant 0 : index
    %644 = vector.load %arg7[%c0_332, %c0_333] : memref<8x128xf32, #tpu.memory_space<vmem>>, vector<8x128xf32>
    %c0_334 = arith.constant 0 : index
    %c0_335 = arith.constant 0 : index
    %645 = vector.load %arg8[%c0_334, %c0_335] : memref<8x128xf32, #tpu.memory_space<vmem>>, vector<8x128xf32>
    %646 = tpu.concatenate %643, %644 in 1 : vector<8x128xf32>, vector<8x128xf32> -> vector<8x256xf32>
    %647 = arith.truncf %646 : vector<8x256xf32> to vector<8x256xbf16>
    %c1_336 = arith.constant 1 : index
    %c0_337 = arith.constant 0 : index
    %c0_338 = arith.constant 0 : index
    %648 = vector.load %arg1[%c1_336, %c0_337, %c0_338] : memref<2x256x512xbf16, #tpu.memory_space<vmem>>, vector<1x256x512xbf16>
    %649 = vector.shape_cast %648 : vector<1x256x512xbf16> to vector<256x512xbf16>
    %cst_339 = arith.constant dense<0.000000e+00> : vector<8x512xf32>
    %650 = tpu.matmul %647, %649, %cst_339 {dimension_numbers = #tpu.dot_dimension_numbers<[1], [0], [0], [1], [0, 0, 1, 1], [], []>} : vector<8x256xbf16>, vector<256x512xbf16>, vector<8x512xf32> -> vector<8x512xf32>
    %c1_340 = arith.constant 1 : index
    %c0_341 = arith.constant 0 : index
    %c0_342 = arith.constant 0 : index
    %651 = vector.load %arg2[%c1_340, %c0_341, %c0_342] : memref<2x1x512xf32, #tpu.memory_space<vmem>>, vector<1x1x512xf32>
    %652 = vector.shape_cast %651 : vector<1x1x512xf32> to vector<1x512xf32>
    %653 = vector.broadcast %652 : vector<1x512xf32> to vector<8x512xf32>
    %654 = arith.addf %650, %653 : vector<8x512xf32>
    %655 = vector.extract_strided_slice %654 {offsets = [0, 0], sizes = [8, 128], strides = [1, 1]} : vector<8x512xf32> to vector<8x128xf32>
    %656 = arith.negf %655 : vector<8x128xf32>
    %657 = math.exp %656 : vector<8x128xf32>
    %cst_343 = arith.constant 1.000000e+00 : f32
    %658 = vector.broadcast %cst_343 : f32 to vector<8x128xf32>
    %659 = arith.addf %658, %657 : vector<8x128xf32>
    %660 = arith.divf %658, %659 : vector<8x128xf32>
    %661 = vector.extract_strided_slice %654 {offsets = [0, 128], sizes = [8, 128], strides = [1, 1]} : vector<8x512xf32> to vector<8x128xf32>
    %662 = arith.negf %661 : vector<8x128xf32>
    %663 = math.exp %662 : vector<8x128xf32>
    %cst_344 = arith.constant 1.000000e+00 : f32
    %664 = vector.broadcast %cst_344 : f32 to vector<8x128xf32>
    %665 = arith.addf %664, %663 : vector<8x128xf32>
    %666 = arith.divf %664, %665 : vector<8x128xf32>
    %667 = vector.extract_strided_slice %654 {offsets = [0, 256], sizes = [8, 128], strides = [1, 1]} : vector<8x512xf32> to vector<8x128xf32>
    %668 = math.tanh %667 : vector<8x128xf32>
    %669 = vector.extract_strided_slice %654 {offsets = [0, 384], sizes = [8, 128], strides = [1, 1]} : vector<8x512xf32> to vector<8x128xf32>
    %670 = arith.negf %669 : vector<8x128xf32>
    %671 = math.exp %670 : vector<8x128xf32>
    %cst_345 = arith.constant 1.000000e+00 : f32
    %672 = vector.broadcast %cst_345 : f32 to vector<8x128xf32>
    %673 = arith.addf %672, %671 : vector<8x128xf32>
    %674 = arith.divf %672, %673 : vector<8x128xf32>
    %675 = arith.mulf %666, %645 : vector<8x128xf32>
    %676 = arith.mulf %660, %668 : vector<8x128xf32>
    %677 = arith.addf %675, %676 : vector<8x128xf32>
    %678 = math.tanh %677 : vector<8x128xf32>
    %679 = arith.mulf %674, %678 : vector<8x128xf32>
    %c0_346 = arith.constant 0 : index
    %c0_347 = arith.constant 0 : index
    %680 = vector.load %arg8[%c0_346, %c0_347] : memref<8x128xf32, #tpu.memory_space<vmem>>, vector<8x128xf32>
    tpu.vector_store %arg8[%c0_346, %c0_347], %677 {strides = array<i32>} : memref<8x128xf32, #tpu.memory_space<vmem>>, vector<8x128xf32>,
    %c0_348 = arith.constant 0 : index
    %c0_349 = arith.constant 0 : index
    %681 = vector.load %arg7[%c0_348, %c0_349] : memref<8x128xf32, #tpu.memory_space<vmem>>, vector<8x128xf32>
    tpu.vector_store %arg7[%c0_348, %c0_349], %679 {strides = array<i32>} : memref<8x128xf32, #tpu.memory_space<vmem>>, vector<8x128xf32>,
    %682 = arith.index_cast %c6_i32_329 : i32 to index
    %c0_350 = arith.constant 0 : index
    %c0_351 = arith.constant 0 : index
    %683 = vector.load %arg6[%682, %c0_350, %c0_351] : memref<8x8x128xf32, #tpu.memory_space<vmem>>, vector<1x8x128xf32>
    %684 = vector.shape_cast %683 : vector<1x8x128xf32> to vector<8x128xf32>
    %685 = vector.shape_cast %679 : vector<8x128xf32> to vector<1x8x128xf32>
    tpu.vector_store %arg6[%682, %c0_350, %c0_351], %685 {strides = array<i32>} : memref<8x8x128xf32, #tpu.memory_space<vmem>>, vector<1x8x128xf32>,
    %c7_i32_352 = arith.constant 7 : i32
    %686 = arith.index_cast %c7_i32_352 : i32 to index
    %c0_353 = arith.constant 0 : index
    %c0_354 = arith.constant 0 : index
    %687 = vector.load %arg6[%686, %c0_353, %c0_354] : memref<8x8x128xf32, #tpu.memory_space<vmem>>, vector<1x8x128xf32>
    %688 = vector.shape_cast %687 : vector<1x8x128xf32> to vector<8x128xf32>
    %c0_355 = arith.constant 0 : index
    %c0_356 = arith.constant 0 : index
    %689 = vector.load %arg7[%c0_355, %c0_356] : memref<8x128xf32, #tpu.memory_space<vmem>>, vector<8x128xf32>
    %c0_357 = arith.constant 0 : index
    %c0_358 = arith.constant 0 : index
    %690 = vector.load %arg8[%c0_357, %c0_358] : memref<8x128xf32, #tpu.memory_space<vmem>>, vector<8x128xf32>
    %691 = tpu.concatenate %688, %689 in 1 : vector<8x128xf32>, vector<8x128xf32> -> vector<8x256xf32>
    %692 = arith.truncf %691 : vector<8x256xf32> to vector<8x256xbf16>
    %c1_359 = arith.constant 1 : index
    %c0_360 = arith.constant 0 : index
    %c0_361 = arith.constant 0 : index
    %693 = vector.load %arg1[%c1_359, %c0_360, %c0_361] : memref<2x256x512xbf16, #tpu.memory_space<vmem>>, vector<1x256x512xbf16>
    %694 = vector.shape_cast %693 : vector<1x256x512xbf16> to vector<256x512xbf16>
    %cst_362 = arith.constant dense<0.000000e+00> : vector<8x512xf32>
    %695 = tpu.matmul %692, %694, %cst_362 {dimension_numbers = #tpu.dot_dimension_numbers<[1], [0], [0], [1], [0, 0, 1, 1], [], []>} : vector<8x256xbf16>, vector<256x512xbf16>, vector<8x512xf32> -> vector<8x512xf32>
    %c1_363 = arith.constant 1 : index
    %c0_364 = arith.constant 0 : index
    %c0_365 = arith.constant 0 : index
    %696 = vector.load %arg2[%c1_363, %c0_364, %c0_365] : memref<2x1x512xf32, #tpu.memory_space<vmem>>, vector<1x1x512xf32>
    %697 = vector.shape_cast %696 : vector<1x1x512xf32> to vector<1x512xf32>
    %698 = vector.broadcast %697 : vector<1x512xf32> to vector<8x512xf32>
    %699 = arith.addf %695, %698 : vector<8x512xf32>
    %700 = vector.extract_strided_slice %699 {offsets = [0, 0], sizes = [8, 128], strides = [1, 1]} : vector<8x512xf32> to vector<8x128xf32>
    %701 = arith.negf %700 : vector<8x128xf32>
    %702 = math.exp %701 : vector<8x128xf32>
    %cst_366 = arith.constant 1.000000e+00 : f32
    %703 = vector.broadcast %cst_366 : f32 to vector<8x128xf32>
    %704 = arith.addf %703, %702 : vector<8x128xf32>
    %705 = arith.divf %703, %704 : vector<8x128xf32>
    %706 = vector.extract_strided_slice %699 {offsets = [0, 128], sizes = [8, 128], strides = [1, 1]} : vector<8x512xf32> to vector<8x128xf32>
    %707 = arith.negf %706 : vector<8x128xf32>
    %708 = math.exp %707 : vector<8x128xf32>
    %cst_367 = arith.constant 1.000000e+00 : f32
    %709 = vector.broadcast %cst_367 : f32 to vector<8x128xf32>
    %710 = arith.addf %709, %708 : vector<8x128xf32>
    %711 = arith.divf %709, %710 : vector<8x128xf32>
    %712 = vector.extract_strided_slice %699 {offsets = [0, 256], sizes = [8, 128], strides = [1, 1]} : vector<8x512xf32> to vector<8x128xf32>
    %713 = math.tanh %712 : vector<8x128xf32>
    %714 = vector.extract_strided_slice %699 {offsets = [0, 384], sizes = [8, 128], strides = [1, 1]} : vector<8x512xf32> to vector<8x128xf32>
    %715 = arith.negf %714 : vector<8x128xf32>
    %716 = math.exp %715 : vector<8x128xf32>
    %cst_368 = arith.constant 1.000000e+00 : f32
    %717 = vector.broadcast %cst_368 : f32 to vector<8x128xf32>
    %718 = arith.addf %717, %716 : vector<8x128xf32>
    %719 = arith.divf %717, %718 : vector<8x128xf32>
    %720 = arith.mulf %711, %690 : vector<8x128xf32>
    %721 = arith.mulf %705, %713 : vector<8x128xf32>
    %722 = arith.addf %720, %721 : vector<8x128xf32>
    %723 = math.tanh %722 : vector<8x128xf32>
    %724 = arith.mulf %719, %723 : vector<8x128xf32>
    %c0_369 = arith.constant 0 : index
    %c0_370 = arith.constant 0 : index
    %725 = vector.load %arg8[%c0_369, %c0_370] : memref<8x128xf32, #tpu.memory_space<vmem>>, vector<8x128xf32>
    tpu.vector_store %arg8[%c0_369, %c0_370], %722 {strides = array<i32>} : memref<8x128xf32, #tpu.memory_space<vmem>>, vector<8x128xf32>,
    %c0_371 = arith.constant 0 : index
    %c0_372 = arith.constant 0 : index
    %726 = vector.load %arg7[%c0_371, %c0_372] : memref<8x128xf32, #tpu.memory_space<vmem>>, vector<8x128xf32>
    tpu.vector_store %arg7[%c0_371, %c0_372], %724 {strides = array<i32>} : memref<8x128xf32, #tpu.memory_space<vmem>>, vector<8x128xf32>,
    %727 = arith.index_cast %c7_i32_352 : i32 to index
    %c0_373 = arith.constant 0 : index
    %c0_374 = arith.constant 0 : index
    %728 = vector.load %arg6[%727, %c0_373, %c0_374] : memref<8x8x128xf32, #tpu.memory_space<vmem>>, vector<1x8x128xf32>
    %729 = vector.shape_cast %728 : vector<1x8x128xf32> to vector<8x128xf32>
    %730 = vector.shape_cast %724 : vector<8x128xf32> to vector<1x8x128xf32>
    tpu.vector_store %arg6[%727, %c0_373, %c0_374], %730 {strides = array<i32>} : memref<8x8x128xf32, #tpu.memory_space<vmem>>, vector<1x8x128xf32>,
    %c8_i32_375 = arith.constant 8 : i32
    %c0_376 = arith.constant 0 : index
    %c0_377 = arith.constant 0 : index
    %731 = vector.load %arg7[%c0_376, %c0_377] : memref<8x128xf32, #tpu.memory_space<vmem>>, vector<8x128xf32>
    %732 = arith.truncf %731 : vector<8x128xf32> to vector<8x128xbf16>
    %c0_378 = arith.constant 0 : index
    %c0_379 = arith.constant 0 : index
    %733 = vector.load %arg3[%c0_378, %c0_379] : memref<128x128xbf16, #tpu.memory_space<vmem>>, vector<128x128xbf16>
    %cst_380 = arith.constant dense<0.000000e+00> : vector<8x128xf32>
    %734 = tpu.matmul %732, %733, %cst_380 {dimension_numbers = #tpu.dot_dimension_numbers<[1], [0], [0], [1], [0, 0, 1, 1], [], []>} : vector<8x128xbf16>, vector<128x128xbf16>, vector<8x128xf32> -> vector<8x128xf32>
    %c0_381 = arith.constant 0 : index
    %c0_382 = arith.constant 0 : index
    %735 = vector.load %arg4[%c0_381, %c0_382] : memref<1x128xf32, #tpu.memory_space<vmem>>, vector<1x128xf32>
    %736 = vector.broadcast %735 : vector<1x128xf32> to vector<8x128xf32>
    %737 = arith.addf %734, %736 : vector<8x128xf32>
    %738 = tpu.iota {dimensions = array<i32: 1>} : vector<8x128xi32>
    %c4_i32_383 = arith.constant 4 : i32
    %739 = vector.broadcast %c4_i32_383 : i32 to vector<8x128xi32>
    %740 = arith.cmpi slt, %738, %739 : vector<8x128xi32>
    %cst_384 = arith.constant -1.000000e+30 : f32
    %741 = vector.broadcast %cst_384 : f32 to vector<8x128xf32>
    %742 = arith.select %740, %737, %741 : vector<8x128xi1>, vector<8x128xf32>
    %cst_385 = arith.constant dense<0xFF800000> : vector<8xf32>
    %743 = vector.multi_reduction <maximumf>, %742, %cst_385 [1] : vector<8x128xf32> to vector<8xf32>
    %744 = vector.shape_cast %743 : vector<8xf32> to vector<8x1xf32>
    %745 = vector.broadcast %744 : vector<8x1xf32> to vector<8x128xf32>
    %746 = arith.subf %742, %745 : vector<8x128xf32>
    %747 = math.exp %746 : vector<8x128xf32>
    %cst_386 = arith.constant dense<0.000000e+00> : vector<8xf32>
    %748 = vector.multi_reduction <add>, %747, %cst_386 [1] : vector<8x128xf32> to vector<8xf32>
    %749 = vector.shape_cast %748 : vector<8xf32> to vector<8x1xf32>
    %750 = tpu.reciprocal %749 {approx = true} : vector<8x1xf32> -> vector<8x1xf32>
    %751 = vector.broadcast %750 : vector<8x1xf32> to vector<8x128xf32>
    %752 = arith.mulf %747, %751 : vector<8x128xf32>
    %c0_387 = arith.constant 0 : index
    %c0_388 = arith.constant 0 : index
    %753 = vector.load %arg5[%c0_387, %c0_388] : memref<8x128xf32, #tpu.memory_space<vmem>>, vector<8x128xf32>
    tpu.vector_store %arg5[%c0_387, %c0_388], %752 {strides = array<i32>} : memref<8x128xf32, #tpu.memory_space<vmem>>, vector<8x128xf32>,
    return
  }
}

</mosaic_0001>

<bundles_post_ra>
// kernel: lstm_classifier_forward.1
= control target key start
LH: loop header
LB: loop body
LE: loop exit
PB: predicated region body
PF: predicated region fallthrough
CT: control target
= control target key end

     0   :  { %10 = vsyncpa [#allocation6], 0  ;;  %s10606_s18 = smov [#allocation5]   ;;  %s12685_s0 = inlined_call_operand.vmem [shape: bf16[8,8,128], index: 0, kind: input, shape index: {}]   ;;  %s12686_s1 = inlined_call_operand.hbm [shape: bf16[2,256,512], index: 1, kind: input, shape index: {}]   ;;  %s12687_s2 = inlined_call_operand.vmem [shape: f32[2,1,512], index: 2, kind: input, shape index: {}]   ;;  %s12688_s3 = inlined_call_operand.vmem [shape: bf16[128,128], index: 3, kind: input, shape index: {}]   ;;  %s12689_s4 = inlined_call_operand.vmem [shape: f32[1,128], index: 4, kind: input, shape index: {}]   ;;  %s12690_s5 = inlined_call_operand.vmem [shape: f32[8,128], index: 5, kind: output, shape index: {}]  }
   0x1   :  { %s18_s19 = sshll.u32 %s10606_s18, 4  ;;  %s10582_s22 = scalar_lea.hbm %s12686_s1, 16384  ;;  %s19_s19 = int_to_ptr.vmem [resolvable:$true] %s18_s19 }
   0x2   :  { %p10583_p0 = scmp.ne.s32.totalorder %s12686_s1, %s10582_s22  ;;  %p10586_p1 = scmp.lt.u32.totalorder %s10582_s22, %s12686_s1 }
   0x4   :  { %p10588_p2 = pnand %p10586_p1, %p10583_p0 }
   0x6   :  { %10591 = shalt.err (!%p10588_p2)
}
   0x7   :  { %s10592_s27 = scalar_lea.vmem %s19_s19, 16384  ;;  %p10597_p4 = scmp.lt.s32.totalorder %s19_s19, %s19_s19 }
   0x8   :  { %p10593_p3 = scmp.ne.s32.totalorder %s19_s19, %s10592_s27  ;;  %p10598_p5 = scmp.lt.s32.totalorder %s10592_s27, %s10592_s27 }
   0xa   :  { %p10599_p6 = por %p10598_p5, %p10597_p4 }
   0xc   :  { %p10600_p7 = pnand %p10599_p6, %p10593_p3 }
   0xe   :  { %10603 = shalt.err (!%p10600_p7)
}
   0xf   :  { %s10607_s28 = smov 256   ;;  %s10608_s29 = smov 16  }
  0x10   :  { %24 = dma.hbm_to_vmem [thread:$0]  %s12686_s1, 16384, %s19_s19, [#allocation6], %s10607_s28, %s10607_s28, %s10608_s29  }
  0x11   :  { %10604 = dma.done.wait [#allocation6], 16384  }
  0x12   :  { %10605 = vsyncadd [#allocation6], 4294950912  ;;  %v12691_v0 = vmov 0.0|0.0   ;;  %v10656_v1 = vld [vmem:[#allocation5 + $0x4] ss:$16 sps:$4 sm:$0xff]   ;;  %vm10611_vm0 = vmmov 0  }
  0x13   :  { %504 = vmatprep.mubr.bf16.mxu0 %v12691_v0  ;;  %545 = vmatprep.mubr.bf16.mxu1 %v12691_v0  ;;  %v10658_v2 = vld [vmem:[#allocation5] ss:$16 sps:$4 sm:$0xff]   ;;  %v10661_v3 = vld [vmem:[#allocation5 + $0x24] ss:$16 sps:$4 sm:$0xff]   ;;  %v10669_v6 = vld [vmem:[#allocation5 + $0xc] ss:$16 sps:$4 sm:$0xff]  }
  0x14   :  { %472 = vmatprep.subr.bf16.mxu0 %v10656_v1  ;;  %v10664_v4 = vld [vmem:[#allocation5 + $0x20] ss:$16 sps:$4 sm:$0xff]   ;;  %v10667_v5 = vld [vmem:[#allocation5 + $0x44] ss:$16 sps:$4 sm:$0xff]   ;;  %v10671_v7 = vld [vmem:[#allocation5 + $0x8] ss:$16 sps:$4 sm:$0xff]   ;;  %513 = vmatprep.subr.bf16.mxu1 %v10669_v6 }
  0x15   :  { %473 = vmatpush1.bf16.msra.mxu0 %v10658_v2  ;;  %v10674_v8 = vld [vmem:[#allocation5 + $0x40] ss:$16 sps:$4 sm:$0xff]   ;;  %v10678_v9 = vld [vmem:[#allocation5 + $0x64] ss:$16 sps:$4 sm:$0xff]   ;;  %514 = vmatpush1.bf16.msra.mxu1 %v10671_v7  ;;  %v10681_v10 = vld [vmem:[#allocation5 + $0x2c] ss:$16 sps:$4 sm:$0xff]  }
  0x16   :  { %474 = vmatprep.subr.bf16.mxu0 %v10661_v3  ;;  %v10683_v11 = vld [vmem:[#allocation5 + $0x28] ss:$16 sps:$4 sm:$0xff]   ;;  %515 = vmatprep.subr.bf16.mxu1 %v10681_v10  ;;  %v10687_v12 = vld [vmem:[#allocation5 + $0x60] ss:$16 sps:$4 sm:$0xff]   ;;  %v10689_v13 = vld [vmem:[#allocation5 + $0x84] ss:$16 sps:$4 sm:$0xff]  }
  0x17   :  { %v10691_v14 = vld [vmem:[#allocation5 + $0x4c] ss:$16 sps:$4 sm:$0xff]   ;;  %v10695_v15 = vld [vmem:[#allocation5 + $0x48] ss:$16 sps:$4 sm:$0xff]   ;;  %v10701_v17 = vld [vmem:[#allocation5 + $0x80] ss:$16 sps:$4 sm:$0xff]  }
  0x18   :  { %v10698_v16 = vld [vmem:[#allocation5 + $0x6c] ss:$16 sps:$4 sm:$0xff]   ;;  %v10704_v18 = vld [vmem:[#allocation5 + $0xa4] ss:$16 sps:$4 sm:$0xff]   ;;  %v10707_v19 = vld [vmem:[#allocation5 + $0x68] ss:$16 sps:$4 sm:$0xff]  }
  0x19   :  { %475 = vmatpush1.bf16.msra.mxu0 %v10664_v4  ;;  %516 = vmatpush1.bf16.msra.mxu1 %v10683_v11  ;;  %v10710_v20 = vld [vmem:[#allocation5 + $0x8c] ss:$16 sps:$4 sm:$0xff]   ;;  %v10713_v21 = vld [vmem:[#allocation5 + $0xa0] ss:$16 sps:$4 sm:$0xff]   ;;  %v10715_v22 = vld [vmem:[#allocation5 + $0xc4] ss:$16 sps:$4 sm:$0xff]  }
  0x1a   :  { %476 = vmatprep.subr.bf16.mxu0 %v10667_v5  ;;  %517 = vmatprep.subr.bf16.mxu1 %v10691_v14  ;;  %v10719_v23 = vld [vmem:[#allocation5 + $0x88] ss:$16 sps:$4 sm:$0xff]   ;;  %v10722_v24 = vld [vmem:[#allocation5 + $0xac] ss:$16 sps:$4 sm:$0xff]   ;;  %v10725_v25 = vld [vmem:[#allocation5 + $0xc0] ss:$16 sps:$4 sm:$0xff]  }
  0x1b   :  { %v10728_v26 = vld [vmem:[#allocation5 + $0xe4] ss:$16 sps:$4 sm:$0xff]   ;;  %v10731_v27 = vld [vmem:[#allocation5 + $0xa8] ss:$16 sps:$4 sm:$0xff]   ;;  %v10734_v28 = vld [vmem:[#allocation5 + $0xcc] ss:$16 sps:$4 sm:$0xff]  }
  0x1c   :  { %v10737_v29 = vld [vmem:[#allocation5 + $0xe0] ss:$16 sps:$4 sm:$0xff]   ;;  %v10739_v30 = vld [vmem:[#allocation5 + $0x104] ss:$16 sps:$4 sm:$0xff]   ;;  %v10743_v31 = vld [vmem:[#allocation5 + $0xc8] ss:$16 sps:$4 sm:$0xff]  }
  0x1d   :  { %477 = vmatpush1.bf16.msra.mxu0 %v10674_v8  ;;  %518 = vmatpush1.bf16.msra.mxu1 %v10695_v15  ;;  %v10746_v32 = vld [vmem:[#allocation5 + $0xec] ss:$16 sps:$4 sm:$0xff]   ;;  %v10749_v33 = vld [vmem:[#allocation5 + $0x100] ss:$16 sps:$4 sm:$0xff]   ;;  %v10752_v34 = vld [vmem:[#allocation5 + $0x124] ss:$16 sps:$4 sm:$0xff]  }
  0x1e   :  { %478 = vmatprep.subr.bf16.mxu0 %v10678_v9  ;;  %519 = vmatprep.subr.bf16.mxu1 %v10698_v16  ;;  %v10755_v35 = vld [vmem:[#allocation5 + $0xe8] ss:$16 sps:$4 sm:$0xff]   ;;  %v10758_v36 = vld [vmem:[#allocation5 + $0x10c] ss:$16 sps:$4 sm:$0xff]   ;;  %v10761_v37 = vld [vmem:[#allocation5 + $0x120] ss:$16 sps:$4 sm:$0xff]  }
  0x1f   :  { %v10763_v38 = vld [vmem:[#allocation5 + $0x144] ss:$16 sps:$4 sm:$0xff]   ;;  %v10767_v39 = vld [vmem:[#allocation5 + $0x108] ss:$16 sps:$4 sm:$0xff]   ;;  %v10770_v40 = vld [vmem:[#allocation5 + $0x12c] ss:$16 sps:$4 sm:$0xff]  }
  0x20   :  { %v10772_v41 = vld [vmem:[#allocation5 + $0x140] ss:$16 sps:$4 sm:$0xff]   ;;  %v10775_v42 = vld [vmem:[#allocation5 + $0x164] ss:$16 sps:$4 sm:$0xff]   ;;  %v10779_v43 = vld [vmem:[#allocation5 + $0x128] ss:$16 sps:$4 sm:$0xff]  }
  0x21   :  { %479 = vmatpush1.bf16.msra.mxu0 %v10687_v12  ;;  %520 = vmatpush1.bf16.msra.mxu1 %v10707_v19  ;;  %v10781_v44 = vld [vmem:[#allocation5 + $0x160] ss:$16 sps:$4 sm:$0xff]   ;;  %v10784_v45 = vld [vmem:[#allocation5 + $0x14c] ss:$16 sps:$4 sm:$0xff]   ;;  %v10786_v46 = vld [vmem:[#allocation5 + $0x184] ss:$16 sps:$4 sm:$0xff]  }
  0x22   :  { %480 = vmatprep.subr.bf16.mxu0 %v10689_v13  ;;  %521 = vmatprep.subr.bf16.mxu1 %v10710_v20  ;;  %v10788_v47 = vld [vmem:[#allocation5 + $0x148] ss:$16 sps:$4 sm:$0xff]   ;;  %v10791_v48 = vld [vmem:[#allocation5 + $0x16c] ss:$16 sps:$4 sm:$0xff]   ;;  %v10795_v49 = vld [vmem:[#allocation5 + $0x180] ss:$16 sps:$4 sm:$0xff]  }
  0x23   :  { %v10798_v50 = vld [vmem:[#allocation5 + $0x1a4] ss:$16 sps:$4 sm:$0xff]   ;;  %v10800_v51 = vld [vmem:[#allocation5 + $0x168] ss:$16 sps:$4 sm:$0xff]   ;;  %v10803_v52 = vld [vmem:[#allocation5 + $0x18c] ss:$16 sps:$4 sm:$0xff]  }
  0x24   :  { %v10807_v53 = vld [vmem:[#allocation5 + $0x1a0] ss:$16 sps:$4 sm:$0xff]   ;;  %v10810_v54 = vld [vmem:[#allocation5 + $0x1c4] ss:$16 sps:$4 sm:$0xff]   ;;  %v10812_v55 = vld [vmem:[#allocation5 + $0x188] ss:$16 sps:$4 sm:$0xff]  }
  0x25   :  { %481 = vmatpush1.bf16.msra.mxu0 %v10701_v17  ;;  %522 = vmatpush1.bf16.msra.mxu1 %v10719_v23  ;;  %12887 = vst [vmem:[#allocation8_spill] sm:$0xff] %v10810_v54  ;;  %12888 = vst [vmem:[#allocation9_spill] sm:$0xff] %v10812_v55  ;;  %v10815_v56 = vld [vmem:[#allocation5 + $0x1ac] ss:$16 sps:$4 sm:$0xff]   ;;  %v10819_v57 = vld [vmem:[#allocation5 + $0x1c0] ss:$16 sps:$4 sm:$0xff]  }
  0x26   :  { %482 = vmatprep.subr.bf16.mxu0 %v10704_v18  ;;  %523 = vmatprep.subr.bf16.mxu1 %v10722_v24  ;;  %v10822_v58 = vld [vmem:[#allocation5 + $0x1e4] ss:$16 sps:$4 sm:$0xff]   ;;  %v10824_v59 = vld [vmem:[#allocation5 + $0x1a8] ss:$16 sps:$4 sm:$0xff]   ;;  %v10827_v60 = vld [vmem:[#allocation5 + $0x1cc] ss:$16 sps:$4 sm:$0xff]  }
  0x27   :  { %v10831_v61 = vld [vmem:[#allocation5 + $0x1e0] ss:$16 sps:$4 sm:$0xff]   ;;  %v10839_v63 = vld [vmem:[#allocation5 + $0x1c8] ss:$16 sps:$4 sm:$0xff]   ;;  %v10842_v0 = vld [vmem:[#allocation5 + $0x1ec] ss:$16 sps:$4 sm:$0xff]  }
  0x28   :  { %v10836_v62 = vld [vmem:[%s12685_s0] sm:$0xff]  }
  0x29   :  { %483 = vmatpush1.bf16.msra.mxu0 %v10713_v21  ;;  %524 = vmatpush1.bf16.msra.mxu1 %v10731_v27 }
  0x2a   :  { %484 = vmatprep.subr.bf16.mxu0 %v10715_v22  ;;  %525 = vmatprep.subr.bf16.mxu1 %v10734_v28 }
  0x2d   :  { %485 = vmatpush1.bf16.msra.mxu0 %v10725_v25  ;;  %526 = vmatpush1.bf16.msra.mxu1 %v10743_v31 }
  0x2e   :  { %486 = vmatprep.subr.bf16.mxu0 %v10728_v26  ;;  %527 = vmatprep.subr.bf16.mxu1 %v10746_v32 }
  0x31   :  { %487 = vmatpush1.bf16.msra.mxu0 %v10737_v29  ;;  %528 = vmatpush1.bf16.msra.mxu1 %v10755_v35 }
  0x32   :  { %488 = vmatprep.subr.bf16.mxu0 %v10739_v30  ;;  %529 = vmatprep.subr.bf16.mxu1 %v10758_v36 }
  0x35   :  { %489 = vmatpush1.bf16.msra.mxu0 %v10749_v33  ;;  %530 = vmatpush1.bf16.msra.mxu1 %v10767_v39 }
  0x36   :  { %490 = vmatprep.subr.bf16.mxu0 %v10752_v34  ;;  %531 = vmatprep.subr.bf16.mxu1 %v10770_v40 }
  0x39   :  { %491 = vmatpush1.bf16.msra.mxu0 %v10761_v37  ;;  %532 = vmatpush1.bf16.msra.mxu1 %v10779_v43 }
  0x3a   :  { %492 = vmatprep.subr.bf16.mxu0 %v10763_v38  ;;  %533 = vmatprep.subr.bf16.mxu1 %v10784_v45 }
  0x3d   :  { %493 = vmatpush1.bf16.msra.mxu0 %v10772_v41  ;;  %534 = vmatpush1.bf16.msra.mxu1 %v10788_v47 }
  0x3e   :  { %494 = vmatprep.subr.bf16.mxu0 %v10775_v42  ;;  %535 = vmatprep.subr.bf16.mxu1 %v10791_v48 }
  0x41   :  { %495 = vmatpush1.bf16.msra.mxu0 %v10781_v44  ;;  %536 = vmatpush1.bf16.msra.mxu1 %v10800_v51 }
  0x42   :  { %496 = vmatprep.subr.bf16.mxu0 %v10786_v46  ;;  %537 = vmatprep.subr.bf16.mxu1 %v10803_v52 }
  0x45   :  { %497 = vmatpush1.bf16.msra.mxu0 %v10795_v49  ;;  %538 = vmatpush1.bf16.msra.mxu1 %v10812_v55  ;;  %v9632_v55 = vcombine.low %v10836_v62, %v10836_v62 }
  0x46   :  { %498 = vmatprep.subr.bf16.mxu0 %v10798_v50  ;;  %539 = vmatprep.subr.bf16.mxu1 %v10815_v56 }
  0x49   :  { %499 = vmatpush1.bf16.msra.mxu0 %v10807_v53  ;;  %540 = vmatpush1.bf16.msra.mxu1 %v10824_v59 }
  0x4a   :  { %500 = vmatprep.subr.bf16.mxu0 %v10810_v54  ;;  %541 = vmatprep.subr.bf16.mxu1 %v10827_v60  ;;  %v10849_v54 = vld [vmem:[#allocation5 + $0x1e8] ss:$16 sps:$4 sm:$0xff]  }
  0x4d   :  { %501 = vmatpush1.bf16.msra.mxu0 %v10819_v57  ;;  %542 = vmatpush1.bf16.msra.mxu1 %v10839_v63 }
  0x4e   :  { %502 = vmatprep.subr.bf16.mxu0 %v10822_v58  ;;  %543 = vmatprep.subr.bf16.mxu1 %v10842_v0 }
  0x51   :  { %503 = vmatpush1.bf16.msra.mxu0 %v10831_v61  ;;  %544 = vmatpush1.bf16.msra.mxu1 %v10849_v54 }
  0x52   :  { %993 = vmatprep.subr.bf16.mxu0 %v10656_v1  ;;  %1034 = vmatprep.subr.bf16.mxu1 %v10669_v6 }
  0x54   :  { %505 = vmatmul.mubr.bf16.vlgmr.msra.gmra.mrb[0].mxu0 %v9632_v55  ;;  %546 = vmatmul.mubr.bf16.vlgmr.msra.gmra.mrb[0].mxu1 %v9632_v55  ;;  %v10535_v55 = vld [vmem:[#allocation5 + $0x4c] ss:$16 sps:$4 sm:$0xff]  }
  0x55   :  { %994 = vmatpush1.bf16.msra.mxu0 %v10658_v2  ;;  %1035 = vmatpush1.bf16.msra.mxu1 %v10671_v7  ;;  %v12889_v2 = vld [vmem:[#allocation8_spill] sm:$0xff] }
  0x56   :  { %995 = vmatprep.subr.bf16.mxu0 %v10661_v3  ;;  %1036 = vmatprep.subr.bf16.mxu1 %v10681_v10  ;;  %v12890_v3 = vld [vmem:[#allocation9_spill] sm:$0xff] }
  0x59   :  { %996 = vmatpush1.bf16.msra.mxu0 %v10664_v4  ;;  %1037 = vmatpush1.bf16.msra.mxu1 %v10683_v11  ;;  %v10527_v4 = vld [vmem:[#allocation5 + $0xc] ss:$16 sps:$4 sm:$0xff]  }
  0x5a   :  { %997 = vmatprep.subr.bf16.mxu0 %v10667_v5  ;;  %1038 = vmatprep.subr.bf16.mxu1 %v10691_v14  ;;  %v12695_v5 = vlaneseq }
  0x5c   :  { %v133_v6 = vshrl.u32 %v12695_v5, 7  ;;  %v11137_v5 = vld [vmem:[#allocation5 + $0x18c] ss:$16 sps:$4 sm:$0xff]  }
  0x5d   :  { %998 = vmatpush1.bf16.msra.mxu0 %v10674_v8  ;;  %1039 = vmatpush1.bf16.msra.mxu1 %v10695_v15  ;;  %v130_v8 = vld [vmem:[%s12687_s2] sm:$0xf]  ;;  %12913 = vst [vmem:[#allocation30_spill] sm:$0xff] %v11137_v5 }
  0x5e   :  { %999 = vmatprep.subr.bf16.mxu0 %v10678_v9  ;;  %1040 = vmatprep.subr.bf16.mxu1 %v10698_v16  ;;  %v10921_v7 = vsub.s32 0, %v133_v6  ;;  %v10926_v9 = vsub.s32 1, %v133_v6  ;;  %v10930_v11 = vsub.s32 3, %v133_v6 }
  0x60   :  { %12891 = vst [vmem:[#allocation8_spill] sm:$0xff] %v10921_v7  ;;  %12892 = vst [vmem:[#allocation9_spill] sm:$0xff] %v10926_v9  ;;  %v135_v10 = vrot.slane %v130_v8, %v10921_v7 }
  0x61   :  { %1000 = vmatpush1.bf16.msra.mxu0 %v10687_v12  ;;  %1041 = vmatpush1.bf16.msra.mxu1 %v10707_v19  ;;  %12893 = vst [vmem:[#allocation10_spill] sm:$0xff] %v10930_v11  ;;  %v147_v19 = vrot.slane %v130_v8, %v10930_v11 }
  0x62   :  { %1001 = vmatprep.subr.bf16.mxu0 %v10689_v13  ;;  %1042 = vmatprep.subr.bf16.mxu1 %v10710_v20 }
  0x65   :  { %1002 = vmatpush1.bf16.msra.mxu0 %v10701_v17  ;;  %1043 = vmatpush1.bf16.msra.mxu1 %v10719_v23 }
  0x66   :  { %1003 = vmatprep.subr.bf16.mxu0 %v10704_v18  ;;  %1044 = vmatprep.subr.bf16.mxu1 %v10722_v24 }
  0x69   :  { %1004 = vmatpush1.bf16.msra.mxu0 %v10713_v21  ;;  %1045 = vmatpush1.bf16.msra.mxu1 %v10731_v27  ;;  %v10933_v21 = vsub.s32 2, %v133_v6  ;;  %v10541_v6 = vld [vmem:[#allocation5 + $0x68] ss:$16 sps:$4 sm:$0xff]  }
  0x6a   :  { %1005 = vmatprep.subr.bf16.mxu0 %v10715_v22  ;;  %1046 = vmatprep.subr.bf16.mxu1 %v10734_v28 }
  0x6b   :  { %12894 = vst [vmem:[#allocation11_spill] sm:$0xff] %v10933_v21 }
  0x6d   :  { %1006 = vmatpush1.bf16.msra.mxu0 %v10725_v25  ;;  %1047 = vmatpush1.bf16.msra.mxu1 %v10743_v31 }
  0x6e   :  { %1007 = vmatprep.subr.bf16.mxu0 %v10728_v26  ;;  %1048 = vmatprep.subr.bf16.mxu1 %v10746_v32  ;;  %v143_v26 = vrot.slane %v130_v8, %v10933_v21 }
  0x71   :  { %1008 = vmatpush1.bf16.msra.mxu0 %v10737_v29  ;;  %1049 = vmatpush1.bf16.msra.mxu1 %v10755_v35 }
  0x72   :  { %1009 = vmatprep.subr.bf16.mxu0 %v10739_v30  ;;  %1050 = vmatprep.subr.bf16.mxu1 %v10758_v36 }
  0x75   :  { %1010 = vmatpush1.bf16.msra.mxu0 %v10749_v33  ;;  %1051 = vmatpush1.bf16.msra.mxu1 %v10767_v39 }
  0x76   :  { %1011 = vmatprep.subr.bf16.mxu0 %v10752_v34  ;;  %1052 = vmatprep.subr.bf16.mxu1 %v10770_v40 }
  0x79   :  { %1012 = vmatpush1.bf16.msra.mxu0 %v10761_v37  ;;  %1053 = vmatpush1.bf16.msra.mxu1 %v10779_v43 }
  0x7a   :  { %1013 = vmatprep.subr.bf16.mxu0 %v10763_v38  ;;  %1054 = vmatprep.subr.bf16.mxu1 %v10784_v45  ;;  %v9633_v45 = vcombine.high %v10836_v62, %v10836_v62  ;;  %v10537_v62 = vld [vmem:[#allocation5 + $0x48] ss:$16 sps:$4 sm:$0xff]  }
  0x7d   :  { %1014 = vmatpush1.bf16.msra.mxu0 %v10772_v41  ;;  %1055 = vmatpush1.bf16.msra.mxu1 %v10788_v47  ;;  %v10528_v47 = vld [vmem:[#allocation5] ss:$16 sps:$4 sm:$0xff]  }
  0x7e   :  { %1015 = vmatprep.subr.bf16.mxu0 %v10775_v42  ;;  %1056 = vmatprep.subr.bf16.mxu1 %v10791_v48  ;;  %v10529_v48 = vld [vmem:[#allocation5 + $0x8] ss:$16 sps:$4 sm:$0xff]  }
  0x81   :  { %1016 = vmatpush1.bf16.msra.mxu0 %v10781_v44  ;;  %1057 = vmatpush1.bf16.msra.mxu1 %v10800_v51  ;;  %v10532_v51 = vld [vmem:[#allocation5 + $0x20] ss:$16 sps:$4 sm:$0xff]  }
  0x82   :  { %1017 = vmatprep.subr.bf16.mxu0 %v10786_v46  ;;  %1058 = vmatprep.subr.bf16.mxu1 %v10803_v52  ;;  %v10533_v52 = vld [vmem:[#allocation5 + $0x28] ss:$16 sps:$4 sm:$0xff]  }
  0x85   :  { %1018 = vmatpush1.bf16.msra.mxu0 %v10795_v49  ;;  %1059 = vmatpush1.bf16.msra.mxu1 %v12890_v3  ;;  %v10530_v49 = vld [vmem:[#allocation5 + $0x24] ss:$16 sps:$4 sm:$0xff]   ;;  %v10539_v3 = vld [vmem:[#allocation5 + $0x6c] ss:$16 sps:$4 sm:$0xff]  }
  0x86   :  { %1019 = vmatprep.subr.bf16.mxu0 %v10798_v50  ;;  %1060 = vmatprep.subr.bf16.mxu1 %v10815_v56  ;;  %v10531_v50 = vld [vmem:[#allocation5 + $0x2c] ss:$16 sps:$4 sm:$0xff]   ;;  %v10536_v56 = vld [vmem:[#allocation5 + $0x40] ss:$16 sps:$4 sm:$0xff]  }
  0x89   :  { %1020 = vmatpush1.bf16.msra.mxu0 %v10807_v53  ;;  %1061 = vmatpush1.bf16.msra.mxu1 %v10824_v59  ;;  %v10534_v53 = vld [vmem:[#allocation5 + $0x44] ss:$16 sps:$4 sm:$0xff]  }
  0x8a   :  { %1021 = vmatprep.subr.bf16.mxu0 %v12889_v2  ;;  %1062 = vmatprep.subr.bf16.mxu1 %v10827_v60  ;;  %v10538_v2 = vld [vmem:[#allocation5 + $0x64] ss:$16 sps:$4 sm:$0xff]  }
  0x8d   :  { %1022 = vmatpush1.bf16.msra.mxu0 %v10819_v57  ;;  %1063 = vmatpush1.bf16.msra.mxu1 %v10839_v63 }
  0x8e   :  { %1023 = vmatprep.subr.bf16.mxu0 %v10822_v58  ;;  %1064 = vmatprep.subr.bf16.mxu1 %v10842_v0 }
  0x91   :  { %1024 = vmatpush1.bf16.msra.mxu0 %v10831_v61  ;;  %1065 = vmatpush1.bf16.msra.mxu1 %v10849_v54 }
  0x92   :  { %1514 = vmatprep.subr.bf16.mxu0 %v10656_v1  ;;  %1555 = vmatprep.subr.bf16.mxu1 %v10527_v4  ;;  %v139_v1 = vrot.slane %v130_v8, %v10926_v9  ;;  %v10540_v4 = vld [vmem:[#allocation5 + $0x60] ss:$16 sps:$4 sm:$0xff]   ;;  %v10542_v8 = vld [vmem:[#allocation5 + $0x84] ss:$16 sps:$4 sm:$0xff]  }
 0x127   :  { %v506_v12 = vpop.f32.mrb[0].mxu0  ;;  %v547_v22 = vpop.f32.mrb[0].mxu1 }
 0x128   :  { %v507_v13 = vadd.f32 %v506_v12, %v135_v10  ;;  %v508_v14 = vpop.f32.mrb[1].mxu0  ;;  %v549_v23 = vpop.f32.mrb[1].mxu1  ;;  %v548_v29 = vadd.f32 %v547_v22, %v143_v26  ;;  %v10543_v10 = vld [vmem:[#allocation5 + $0x8c] ss:$16 sps:$4 sm:$0xff]   ;;  %v10545_v12 = vld [vmem:[#allocation5 + $0x88] ss:$16 sps:$4 sm:$0xff]  }
 0x129   :  { %v509_v15 = vadd.f32 %v508_v14, %v139_v1  ;;  %v510_v16 = vpop.f32.mrb[2].mxu0  ;;  %v550_v24 = vadd.f32 %v549_v23, %v147_v19  ;;  %v551_v25 = vpop.f32.mrb[2].mxu1  ;;  %v10544_v1 = vld [vmem:[#allocation5 + $0x80] ss:$16 sps:$4 sm:$0xff]   ;;  %v10547_v14 = vld [vmem:[#allocation5 + $0xac] ss:$16 sps:$4 sm:$0xff]  }
 0x12a   :  { %v8588_v17 = vmul.f32 -1.442695, %v507_v13  ;;  %v511_v18 = vpop.f32.mrb[3].mxu0  ;;  %v552_v27 = vpop.f32.mrb[3].mxu1  ;;  %v10546_v13 = vld [vmem:[#allocation5 + $0xa4] ss:$16 sps:$4 sm:$0xff]  }
 0x12b   :  { %v8589_v20 = vmul.f32 -1.442695, %v509_v15  ;;  %v8590_v28 = vmul.f32 -1.442695, %v550_v24  ;;  %v10548_v15 = vld [vmem:[#allocation5 + $0xa0] ss:$16 sps:$4 sm:$0xff]  }
 0x12c   :  { %10267 = vpow2.f32 %v8588_v17  ;;  %v10549_v16 = vld [vmem:[#allocation5 + $0xa8] ss:$16 sps:$4 sm:$0xff]   ;;  %v10550_v17 = vld [vmem:[#allocation5 + $0xc4] ss:$16 sps:$4 sm:$0xff]   ;;  %v10551_v18 = vld [vmem:[#allocation5 + $0xcc] ss:$16 sps:$4 sm:$0xff]  }
 0x12d   :  { %10269 = vpow2.f32 %v8589_v20  ;;  %v10552_v19 = vld [vmem:[#allocation5 + $0xc0] ss:$16 sps:$4 sm:$0xff]   ;;  %v10553_v20 = vld [vmem:[#allocation5 + $0xc8] ss:$16 sps:$4 sm:$0xff]   ;;  %v10554_v22 = vld [vmem:[#allocation5 + $0xe4] ss:$16 sps:$4 sm:$0xff]  }
 0x12e   :  { %10271 = vpow2.f32 %v8590_v28  ;;  %v10555_v23 = vld [vmem:[#allocation5 + $0xec] ss:$16 sps:$4 sm:$0xff]   ;;  %v10556_v24 = vld [vmem:[#allocation5 + $0xe0] ss:$16 sps:$4 sm:$0xff]   ;;  %v10557_v25 = vld [vmem:[#allocation5 + $0xe8] ss:$16 sps:$4 sm:$0xff]  }
 0x12f   :  { %10273 = vtanh.f32 %v548_v29  ;;  %v10558_v26 = vld [vmem:[#allocation5 + $0x104] ss:$16 sps:$4 sm:$0xff]   ;;  %v10559_v27 = vld [vmem:[#allocation5 + $0x10c] ss:$16 sps:$4 sm:$0xff]   ;;  %v10560_v28 = vld [vmem:[#allocation5 + $0x100] ss:$16 sps:$4 sm:$0xff]  }
 0x130   :  { %v10561_v29 = vld [vmem:[#allocation5 + $0x108] ss:$16 sps:$4 sm:$0xff]  }
 0x136   :  { %v10268_v30 = vpop.eup %10267 }
 0x137   :  { %v10270_v31 = vpop.eup %10269  ;;  %v557_v32 = vadd.f32 1.0, %v10268_v30  ;;  %v10562_v30 = vld [vmem:[#allocation5 + $0x124] ss:$16 sps:$4 sm:$0xff]  }
 0x138   :  { %v563_v33 = vadd.f32 1.0, %v10270_v31  ;;  %v10272_v34 = vpop.eup %10271  ;;  %v10563_v31 = vld [vmem:[#allocation5 + $0x12c] ss:$16 sps:$4 sm:$0xff]  }
 0x139   :  { %10275 = vrcp.f32 %v557_v32  ;;  %v10274_v35 = vpop.eup %10273  ;;  %v570_v37 = vadd.f32 1.0, %v10272_v34  ;;  %v10564_v32 = vld [vmem:[#allocation5 + $0x120] ss:$16 sps:$4 sm:$0xff]   ;;  %v10566_v34 = vld [vmem:[#allocation5 + $0x144] ss:$16 sps:$4 sm:$0xff]  }
 0x13a   :  { %10277 = vrcp.f32 %v563_v33  ;;  %v10565_v33 = vld [vmem:[#allocation5 + $0x128] ss:$16 sps:$4 sm:$0xff]  }
 0x13b   :  { %10279 = vrcp.f32 %v570_v37  ;;  %v10569_v37 = vld [vmem:[#allocation5 + $0x148] ss:$16 sps:$4 sm:$0xff]  }
 0x143   :  { %v10276_v36 = vpop.eup %10275 }
 0x144   :  { %v10278_v38 = vpop.eup %10277  ;;  %v574_v39 = vmul.f32 %v10276_v36, %v10274_v35  ;;  %v10567_v35 = vld [vmem:[#allocation5 + $0x14c] ss:$16 sps:$4 sm:$0xff]   ;;  %v10568_v36 = vld [vmem:[#allocation5 + $0x140] ss:$16 sps:$4 sm:$0xff]  }
 0x145   :  { %v573_v40 = vmul.f32 0.0, %v10278_v38  ;;  %v10280_v42 = vpop.eup %10279  ;;  %v10570_v38 = vld [vmem:[#allocation5 + $0x164] ss:$16 sps:$4 sm:$0xff]  }
 0x147   :  { %v10936_v41 = vadd.f32 %v574_v39, %v573_v40  ;;  %v10571_v39 = vld [vmem:[#allocation5 + $0x16c] ss:$16 sps:$4 sm:$0xff]   ;;  %v10572_v40 = vld [vmem:[#allocation5 + $0x160] ss:$16 sps:$4 sm:$0xff]  }
 0x149   :  { %10281 = vtanh.f32 %v10936_v41 }
 0x153   :  { %v10282_v43 = vpop.eup %10281 }
 0x154   :  { %v577_v44 = vmul.f32 %v10282_v43, %v10280_v42  ;;  %v10573_v42 = vld [vmem:[#allocation5 + $0x168] ss:$16 sps:$4 sm:$0xff]   ;;  %v10574_v43 = vld [vmem:[#allocation5 + $0x184] ss:$16 sps:$4 sm:$0xff]  }
 0x156   :  { %v10941_v46 = vpack.c.bf16 %v577_v44, %v577_v44  ;;  %v10575_v44 = vld [vmem:[#allocation5 + $0x18c] ss:$16 sps:$4 sm:$0xff]  }
 0x158   :  { %12895 = vst [vmem:[#allocation12_spill] sm:$0xff] %v10941_v46  ;;  %1025 = vmatprep.mubr.bf16.mxu0 %v10941_v46  ;;  %1066 = vmatprep.mubr.bf16.mxu1 %v10941_v46  ;;  %v11143_v46 = vld [vmem:[#allocation5 + $0x188] ss:$16 sps:$4 sm:$0xff]  }
 0x159   :  { %1026 = vmatmul.mubr.bf16.vlgmr.msra.gmra.mrb[4].mxu0 %v9633_v45  ;;  %1067 = vmatmul.mubr.bf16.vlgmr.msra.gmra.mrb[4].mxu1 %v9633_v45  ;;  %v10576_v45 = vld [vmem:[#allocation5 + $0x180] ss:$16 sps:$4 sm:$0xff]   ;;  %12915 = vst [vmem:[#allocation32_spill] sm:$0xff] %v11143_v46 }
 0x15a   :  { %1515 = vmatpush1.bf16.msra.mxu0 %v10528_v47  ;;  %1556 = vmatpush1.bf16.msra.mxu1 %v10529_v48  ;;  %v10577_v47 = vld [vmem:[#allocation5 + $0x188] ss:$16 sps:$4 sm:$0xff]   ;;  %v10578_v48 = vld [vmem:[#allocation5 + $0x1a4] ss:$16 sps:$4 sm:$0xff]  }
 0x15b   :  { %1516 = vmatprep.subr.bf16.mxu0 %v10530_v49  ;;  %1557 = vmatprep.subr.bf16.mxu1 %v10531_v50  ;;  %v10579_v49 = vld [vmem:[#allocation5 + $0x1ac] ss:$16 sps:$4 sm:$0xff]   ;;  %v10580_v50 = vld [vmem:[#allocation5 + $0x1a0] ss:$16 sps:$4 sm:$0xff]  }
 0x15e   :  { %1517 = vmatpush1.bf16.msra.mxu0 %v10532_v51  ;;  %1558 = vmatpush1.bf16.msra.mxu1 %v10533_v52  ;;  %v10581_v51 = vld [vmem:[#allocation5 + $0x1c4] ss:$16 sps:$4 sm:$0xff]  }
 0x15f   :  { %1518 = vmatprep.subr.bf16.mxu0 %v10534_v53  ;;  %1559 = vmatprep.subr.bf16.mxu1 %v10535_v55  ;;  %v10953_v52 = vld [vmem:[#allocation5 + $0x4] ss:$16 sps:$4 sm:$0xff]  }
 0x160   :  { %12896 = vst [vmem:[#allocation13_spill] sm:$0xff] %v10953_v52 }
 0x162   :  { %1519 = vmatpush1.bf16.msra.mxu0 %v10536_v56  ;;  %1560 = vmatpush1.bf16.msra.mxu1 %v10537_v62 }
 0x163   :  { %1520 = vmatprep.subr.bf16.mxu0 %v10538_v2  ;;  %1561 = vmatprep.subr.bf16.mxu1 %v10539_v3 }
 0x166   :  { %1521 = vmatpush1.bf16.msra.mxu0 %v10540_v4  ;;  %1562 = vmatpush1.bf16.msra.mxu1 %v10541_v6 }
 0x167   :  { %1522 = vmatprep.subr.bf16.mxu0 %v10542_v8  ;;  %1563 = vmatprep.subr.bf16.mxu1 %v10543_v10 }
 0x16a   :  { %1523 = vmatpush1.bf16.msra.mxu0 %v10544_v1  ;;  %1564 = vmatpush1.bf16.msra.mxu1 %v10545_v12 }
 0x16b   :  { %1524 = vmatprep.subr.bf16.mxu0 %v10546_v13  ;;  %1565 = vmatprep.subr.bf16.mxu1 %v10547_v14 }
 0x16e   :  { %1525 = vmatpush1.bf16.msra.mxu0 %v10548_v15  ;;  %1566 = vmatpush1.bf16.msra.mxu1 %v10549_v16 }
 0x16f   :  { %1526 = vmatprep.subr.bf16.mxu0 %v10550_v17  ;;  %1567 = vmatprep.subr.bf16.mxu1 %v10551_v18 }
 0x172   :  { %1527 = vmatpush1.bf16.msra.mxu0 %v10552_v19  ;;  %1568 = vmatpush1.bf16.msra.mxu1 %v10553_v20 }
 0x173   :  { %1528 = vmatprep.subr.bf16.mxu0 %v10554_v22  ;;  %1569 = vmatprep.subr.bf16.mxu1 %v10555_v23 }
 0x176   :  { %1529 = vmatpush1.bf16.msra.mxu0 %v10556_v24  ;;  %1570 = vmatpush1.bf16.msra.mxu1 %v10557_v25 }
 0x177   :  { %1530 = vmatprep.subr.bf16.mxu0 %v10558_v26  ;;  %1571 = vmatprep.subr.bf16.mxu1 %v10559_v27 }
 0x17a   :  { %1531 = vmatpush1.bf16.msra.mxu0 %v10560_v28  ;;  %1572 = vmatpush1.bf16.msra.mxu1 %v10561_v29  ;;  %v10973_v28 = vld [vmem:[%s12685_s0 + $0x8] sm:$0xff]  }
 0x17b   :  { %1532 = vmatprep.subr.bf16.mxu0 %v10562_v30  ;;  %1573 = vmatprep.subr.bf16.mxu1 %v10563_v31  ;;  %v9634_v31 = vcombine.low %v10973_v28, %v10973_v28 }
 0x17e   :  { %1533 = vmatpush1.bf16.msra.mxu0 %v10564_v32  ;;  %1574 = vmatpush1.bf16.msra.mxu1 %v10565_v33  ;;  %v10979_v33 = vld [vmem:[#allocation5] ss:$16 sps:$4 sm:$0xff]  }
 0x17f   :  { %1534 = vmatprep.subr.bf16.mxu0 %v10566_v34  ;;  %1575 = vmatprep.subr.bf16.mxu1 %v10567_v35  ;;  %v10983_v34 = vld [vmem:[#allocation5 + $0x24] ss:$16 sps:$4 sm:$0xff]   ;;  %v10988_v35 = vld [vmem:[#allocation5 + $0x20] ss:$16 sps:$4 sm:$0xff]  }
 0x182   :  { %1535 = vmatpush1.bf16.msra.mxu0 %v10568_v36  ;;  %1576 = vmatpush1.bf16.msra.mxu1 %v10569_v37  ;;  %v10992_v36 = vld [vmem:[#allocation5 + $0x44] ss:$16 sps:$4 sm:$0xff]   ;;  %v10995_v37 = vld [vmem:[#allocation5 + $0x40] ss:$16 sps:$4 sm:$0xff]  }
 0x183   :  { %1536 = vmatprep.subr.bf16.mxu0 %v10570_v38  ;;  %1577 = vmatprep.subr.bf16.mxu1 %v10571_v39  ;;  %v10998_v38 = vld [vmem:[#allocation5 + $0x64] ss:$16 sps:$4 sm:$0xff]   ;;  %v11001_v39 = vld [vmem:[#allocation5 + $0x60] ss:$16 sps:$4 sm:$0xff]  }
 0x186   :  { %1537 = vmatpush1.bf16.msra.mxu0 %v10572_v40  ;;  %1578 = vmatpush1.bf16.msra.mxu1 %v10573_v42  ;;  %v11005_v40 = vld [vmem:[#allocation5 + $0x84] ss:$16 sps:$4 sm:$0xff]   ;;  %v11007_v42 = vld [vmem:[#allocation5 + $0x2c] ss:$16 sps:$4 sm:$0xff]  }
 0x187   :  { %1538 = vmatprep.subr.bf16.mxu0 %v10574_v43  ;;  %1579 = vmatprep.subr.bf16.mxu1 %v10575_v44  ;;  %v11009_v43 = vld [vmem:[#allocation5 + $0x80] ss:$16 sps:$4 sm:$0xff]   ;;  %v11011_v44 = vld [vmem:[#allocation5 + $0x28] ss:$16 sps:$4 sm:$0xff]  }
 0x18a   :  { %1539 = vmatpush1.bf16.msra.mxu0 %v10576_v45  ;;  %1580 = vmatpush1.bf16.msra.mxu1 %v10577_v47  ;;  %v11017_v45 = vld [vmem:[#allocation5 + $0xa4] ss:$16 sps:$4 sm:$0xff]   ;;  %v11019_v47 = vld [vmem:[#allocation5 + $0x4c] ss:$16 sps:$4 sm:$0xff]  }
 0x18b   :  { %1540 = vmatprep.subr.bf16.mxu0 %v10578_v48  ;;  %1581 = vmatprep.subr.bf16.mxu1 %v10579_v49  ;;  %v11021_v48 = vld [vmem:[#allocation5 + $0xa0] ss:$16 sps:$4 sm:$0xff]   ;;  %v11023_v49 = vld [vmem:[#allocation5 + $0x48] ss:$16 sps:$4 sm:$0xff]  }
 0x18e   :  { %1541 = vmatpush1.bf16.msra.mxu0 %v10580_v50  ;;  %1582 = vmatpush1.bf16.msra.mxu1 %v10824_v59  ;;  %v10956_v59 = vld [vmem:[#allocation5 + $0xc] ss:$16 sps:$4 sm:$0xff]   ;;  %v11029_v50 = vld [vmem:[#allocation5 + $0xc4] ss:$16 sps:$4 sm:$0xff]  }
 0x18f   :  { %1542 = vmatprep.subr.bf16.mxu0 %v10581_v51  ;;  %1583 = vmatprep.subr.bf16.mxu1 %v10827_v60  ;;  %12897 = vst [vmem:[#allocation14_spill] sm:$0xff] %v10956_v59  ;;  %v11031_v51 = vld [vmem:[#allocation5 + $0x6c] ss:$16 sps:$4 sm:$0xff]  }
 0x192   :  { %1543 = vmatpush1.bf16.msra.mxu0 %v10819_v57  ;;  %1584 = vmatpush1.bf16.msra.mxu1 %v10839_v63  ;;  %v651_v57 = vld [vmem:[%s12687_s2] sm:$0xf] }
 0x193   :  { %1544 = vmatprep.subr.bf16.mxu0 %v10822_v58  ;;  %1585 = vmatprep.subr.bf16.mxu1 %v10842_v0  ;;  %v656_v58 = vrot.slane %v651_v57, %v10921_v7  ;;  %v660_v0 = vrot.slane %v651_v57, %v10926_v9  ;;  %v668_v4 = vrot.slane %v651_v57, %v10930_v11 }
 0x194   :  { %v664_v1 = vrot.slane %v651_v57, %v10933_v21  ;;  %v11033_v57 = vld [vmem:[#allocation5 + $0xc0] ss:$16 sps:$4 sm:$0xff]  }
 0x196   :  { %1545 = vmatpush1.bf16.msra.mxu0 %v10831_v61  ;;  %1586 = vmatpush1.bf16.msra.mxu1 %v10849_v54 }
 0x197   :  { %2035 = vmatprep.subr.bf16.mxu0 %v10953_v52  ;;  %2076 = vmatprep.subr.bf16.mxu1 %v10956_v59 }
 0x22c   :  { %v1027_v60 = vpop.f32.mrb[4].mxu0  ;;  %v1068_v61 = vpop.f32.mrb[4].mxu1 }
 0x22d   :  { %v1028_v63 = vadd.f32 %v1027_v60, %v656_v58  ;;  %v1029_v54 = vpop.f32.mrb[5].mxu0  ;;  %v1070_v53 = vpop.f32.mrb[5].mxu1  ;;  %v1069_v13 = vadd.f32 %v1068_v61, %v664_v1  ;;  %v11035_v58 = vld [vmem:[#allocation5 + $0x68] ss:$16 sps:$4 sm:$0xff]   ;;  %v11043_v60 = vld [vmem:[#allocation5 + $0x8c] ss:$16 sps:$4 sm:$0xff]  }
 0x22e   :  { %v1030_v55 = vadd.f32 %v1029_v54, %v660_v0  ;;  %v1031_v56 = vpop.f32.mrb[6].mxu0  ;;  %v1072_v62 = vpop.f32.mrb[6].mxu1  ;;  %v1071_v10 = vadd.f32 %v1070_v53, %v668_v4  ;;  %v11041_v0 = vld [vmem:[#allocation5 + $0xe4] ss:$16 sps:$4 sm:$0xff]   ;;  %v11045_v61 = vld [vmem:[#allocation5 + $0xe0] ss:$16 sps:$4 sm:$0xff]  }
 0x22f   :  { %v8655_v2 = vmul.f32 -1.442695, %v1028_v63  ;;  %v1032_v3 = vpop.f32.mrb[7].mxu0  ;;  %v1073_v6 = vpop.f32.mrb[7].mxu1  ;;  %v11047_v63 = vld [vmem:[#allocation5 + $0x88] ss:$16 sps:$4 sm:$0xff]  }
 0x230   :  { %v8656_v8 = vmul.f32 -1.442695, %v1030_v55  ;;  %v8657_v12 = vmul.f32 -1.442695, %v1071_v10  ;;  %v11053_v54 = vld [vmem:[#allocation5 + $0x104] ss:$16 sps:$4 sm:$0xff]  }
 0x231   :  { %10283 = vpow2.f32 %v8655_v2  ;;  %v11055_v53 = vld [vmem:[#allocation5 + $0xac] ss:$16 sps:$4 sm:$0xff]   ;;  %v11057_v55 = vld [vmem:[#allocation5 + $0x100] ss:$16 sps:$4 sm:$0xff]   ;;  %v11059_v56 = vld [vmem:[#allocation5 + $0xa8] ss:$16 sps:$4 sm:$0xff]  }
 0x232   :  { %10285 = vpow2.f32 %v8656_v8  ;;  %v11065_v62 = vld [vmem:[#allocation5 + $0x124] ss:$16 sps:$4 sm:$0xff]   ;;  %v11067_v2 = vld [vmem:[#allocation5 + $0xcc] ss:$16 sps:$4 sm:$0xff]   ;;  %v11069_v3 = vld [vmem:[#allocation5 + $0x120] ss:$16 sps:$4 sm:$0xff]  }
 0x233   :  { %10287 = vpow2.f32 %v8657_v12  ;;  %v11071_v4 = vld [vmem:[#allocation5 + $0xc8] ss:$16 sps:$4 sm:$0xff]   ;;  %v11077_v6 = vld [vmem:[#allocation5 + $0x144] ss:$16 sps:$4 sm:$0xff]   ;;  %v11079_v8 = vld [vmem:[#allocation5 + $0xec] ss:$16 sps:$4 sm:$0xff]  }
 0x234   :  { %10289 = vtanh.f32 %v1069_v13  ;;  %v11081_v10 = vld [vmem:[#allocation5 + $0x140] ss:$16 sps:$4 sm:$0xff]   ;;  %v11083_v1 = vld [vmem:[#allocation5 + $0xe8] ss:$16 sps:$4 sm:$0xff]   ;;  %v11089_v12 = vld [vmem:[#allocation5 + $0x164] ss:$16 sps:$4 sm:$0xff]  }
 0x235   :  { %12899 = vst [vmem:[#allocation16_spill] sm:$0xff] %v11081_v10  ;;  %12900 = vst [vmem:[#allocation17_spill] sm:$0xff] %v11089_v12  ;;  %v11091_v13 = vld [vmem:[#allocation5 + $0x10c] ss:$16 sps:$4 sm:$0xff]  }
 0x23b   :  { %v10284_v14 = vpop.eup %10283 }
 0x23c   :  { %v10286_v15 = vpop.eup %10285  ;;  %v1078_v16 = vadd.f32 1.0, %v10284_v14  ;;  %v11093_v14 = vld [vmem:[#allocation5 + $0x160] ss:$16 sps:$4 sm:$0xff]  }
 0x23d   :  { %v1084_v17 = vadd.f32 1.0, %v10286_v15  ;;  %v10288_v18 = vpop.eup %10287  ;;  %12901 = vst [vmem:[#allocation18_spill] sm:$0xff] %v11093_v14  ;;  %v11095_v15 = vld [vmem:[#allocation5 + $0x108] ss:$16 sps:$4 sm:$0xff]  }
 0x23e   :  { %10291 = vrcp.f32 %v1078_v16  ;;  %v10290_v19 = vpop.eup %10289  ;;  %v1091_v22 = vadd.f32 1.0, %v10288_v18  ;;  %v11101_v16 = vld [vmem:[#allocation5 + $0x184] ss:$16 sps:$4 sm:$0xff]   ;;  %v11105_v18 = vld [vmem:[#allocation5 + $0x180] ss:$16 sps:$4 sm:$0xff]  }
 0x23f   :  { %10293 = vrcp.f32 %v1084_v17  ;;  %12902 = vst [vmem:[#allocation19_spill] sm:$0xff] %v11101_v16  ;;  %v11103_v17 = vld [vmem:[#allocation5 + $0x12c] ss:$16 sps:$4 sm:$0xff]   ;;  %12903 = vst [vmem:[#allocation20_spill] sm:$0xff] %v11105_v18 }
 0x240   :  { %10295 = vrcp.f32 %v1091_v22  ;;  %v11115_v22 = vld [vmem:[#allocation5 + $0x1a0] ss:$16 sps:$4 sm:$0xff]  }
 0x241   :  { %12905 = vst [vmem:[#allocation22_spill] sm:$0xff] %v11115_v22 }
 0x248   :  { %v10292_v20 = vpop.eup %10291 }
 0x249   :  { %v10294_v23 = vpop.eup %10293  ;;  %v1095_v24 = vmul.f32 %v10292_v20, %v10290_v19  ;;  %v11107_v19 = vld [vmem:[#allocation5 + $0x128] ss:$16 sps:$4 sm:$0xff]   ;;  %v11111_v20 = vld [vmem:[#allocation5 + $0x1a4] ss:$16 sps:$4 sm:$0xff]  }
 0x24a   :  { %v1094_v25 = vmul.f32 %v10294_v23, %v10936_v41  ;;  %v10296_v27 = vpop.eup %10295  ;;  %v10981_v41 = vld [vmem:[#allocation5 + $0x8] ss:$16 sps:$4 sm:$0xff]   ;;  %12904 = vst [vmem:[#allocation21_spill] sm:$0xff] %v11111_v20 }
 0x24b   :  { %v11117_v23 = vld [vmem:[#allocation5 + $0x148] ss:$16 sps:$4 sm:$0xff]  }
 0x24c   :  { %v10967_v26 = vadd.f32 %v1095_v24, %v1094_v25  ;;  %12906 = vst [vmem:[#allocation23_spill] sm:$0xff] %v11117_v23  ;;  %v11119_v24 = vld [vmem:[#allocation5 + $0x14c] ss:$16 sps:$4 sm:$0xff]   ;;  %v11122_v25 = vld [vmem:[#allocation5 + $0x1c4] ss:$16 sps:$4 sm:$0xff]  }
 0x24d   :  { %12907 = vst [vmem:[#allocation24_spill] sm:$0xff] %v11119_v24  ;;  %12908 = vst [vmem:[#allocation25_spill] sm:$0xff] %v11122_v25 }
 0x24e   :  { %10297 = vtanh.f32 %v10967_v26 }
 0x258   :  { %v10298_v29 = vpop.eup %10297 }
 0x259   :  { %v1098_v30 = vmul.f32 %v10298_v29, %v10296_v27  ;;  %v11124_v27 = vld [vmem:[#allocation5 + $0x16c] ss:$16 sps:$4 sm:$0xff]   ;;  %v11129_v29 = vld [vmem:[#allocation5 + $0x1c0] ss:$16 sps:$4 sm:$0xff]  }
 0x25a   :  { %12909 = vst [vmem:[#allocation26_spill] sm:$0xff] %v11124_v27  ;;  %12910 = vst [vmem:[#allocation27_spill] sm:$0xff] %v11129_v29 }
 0x25b   :  { %v10977_v32 = vpack.c.bf16 %v1098_v30, %v1098_v30  ;;  %v11131_v30 = vld [vmem:[#allocation5 + $0x168] ss:$16 sps:$4 sm:$0xff]  }
 0x25c   :  { %12911 = vst [vmem:[#allocation28_spill] sm:$0xff] %v11131_v30 }
 0x25d   :  { %12898 = vst [vmem:[#allocation15_spill] sm:$0xff] %v10977_v32  ;;  %1546 = vmatprep.mubr.bf16.mxu0 %v10977_v32  ;;  %1587 = vmatprep.mubr.bf16.mxu1 %v10977_v32  ;;  %v11141_v32 = vld [vmem:[#allocation5 + $0x1e0] ss:$16 sps:$4 sm:$0xff]  }
 0x25e   :  { %1547 = vmatmul.mubr.bf16.vlgmr.msra.gmra.mrb[8].mxu0 %v9634_v31  ;;  %1588 = vmatmul.mubr.bf16.vlgmr.msra.gmra.mrb[8].mxu1 %v9634_v31  ;;  %v11135_v31 = vld [vmem:[#allocation5 + $0x1e4] ss:$16 sps:$4 sm:$0xff]   ;;  %12914 = vst [vmem:[#allocation31_spill] sm:$0xff] %v11141_v32 }
 0x25f   :  { %2036 = vmatpush1.bf16.msra.mxu0 %v10979_v33  ;;  %2077 = vmatpush1.bf16.msra.mxu1 %v10981_v41  ;;  %12912 = vst [vmem:[#allocation29_spill] sm:$0xff] %v11135_v31 }
 0x260   :  { %2037 = vmatprep.subr.bf16.mxu0 %v10983_v34  ;;  %2078 = vmatprep.subr.bf16.mxu1 %v11007_v42 }
 0x263   :  { %2038 = vmatpush1.bf16.msra.mxu0 %v10988_v35  ;;  %2079 = vmatpush1.bf16.msra.mxu1 %v11011_v44 }
 0x264   :  { %2039 = vmatprep.subr.bf16.mxu0 %v10992_v36  ;;  %2080 = vmatprep.subr.bf16.mxu1 %v11019_v47 }
 0x267   :  { %2040 = vmatpush1.bf16.msra.mxu0 %v10995_v37  ;;  %2081 = vmatpush1.bf16.msra.mxu1 %v11023_v49 }
 0x268   :  { %2041 = vmatprep.subr.bf16.mxu0 %v10998_v38  ;;  %2082 = vmatprep.subr.bf16.mxu1 %v11031_v51 }
 0x26b   :  { %2042 = vmatpush1.bf16.msra.mxu0 %v11001_v39  ;;  %2083 = vmatpush1.bf16.msra.mxu1 %v11035_v58 }
 0x26c   :  { %2043 = vmatprep.subr.bf16.mxu0 %v11005_v40  ;;  %2084 = vmatprep.subr.bf16.mxu1 %v11043_v60 }
 0x26f   :  { %2044 = vmatpush1.bf16.msra.mxu0 %v11009_v43  ;;  %2085 = vmatpush1.bf16.msra.mxu1 %v11047_v63 }
 0x270   :  { %2045 = vmatprep.subr.bf16.mxu0 %v11017_v45  ;;  %2086 = vmatprep.subr.bf16.mxu1 %v11055_v53 }
 0x273   :  { %2046 = vmatpush1.bf16.msra.mxu0 %v11021_v48  ;;  %2087 = vmatpush1.bf16.msra.mxu1 %v11059_v56 }
 0x274   :  { %2047 = vmatprep.subr.bf16.mxu0 %v11029_v50  ;;  %2088 = vmatprep.subr.bf16.mxu1 %v11067_v2 }
 0x277   :  { %2048 = vmatpush1.bf16.msra.mxu0 %v11033_v57  ;;  %2089 = vmatpush1.bf16.msra.mxu1 %v11071_v4 }
 0x278   :  { %2049 = vmatprep.subr.bf16.mxu0 %v11041_v0  ;;  %2090 = vmatprep.subr.bf16.mxu1 %v11079_v8 }
 0x27b   :  { %2050 = vmatpush1.bf16.msra.mxu0 %v11045_v61  ;;  %2091 = vmatpush1.bf16.msra.mxu1 %v11083_v1 }
 0x27c   :  { %2051 = vmatprep.subr.bf16.mxu0 %v11053_v54  ;;  %2092 = vmatprep.subr.bf16.mxu1 %v11091_v13 }
 0x27f   :  { %2052 = vmatpush1.bf16.msra.mxu0 %v11057_v55  ;;  %2093 = vmatpush1.bf16.msra.mxu1 %v11095_v15 }
 0x280   :  { %2053 = vmatprep.subr.bf16.mxu0 %v11065_v62  ;;  %2094 = vmatprep.subr.bf16.mxu1 %v11103_v17 }
 0x283   :  { %2054 = vmatpush1.bf16.msra.mxu0 %v11069_v3  ;;  %2095 = vmatpush1.bf16.msra.mxu1 %v11107_v19 }
 0x284   :  { %2055 = vmatprep.subr.bf16.mxu0 %v11077_v6  ;;  %2096 = vmatprep.subr.bf16.mxu1 %v11119_v24 }
 0x287   :  { %2056 = vmatpush1.bf16.msra.mxu0 %v11081_v10  ;;  %2097 = vmatpush1.bf16.msra.mxu1 %v11117_v23 }
 0x288   :  { %2057 = vmatprep.subr.bf16.mxu0 %v11089_v12  ;;  %2098 = vmatprep.subr.bf16.mxu1 %v11124_v27 }
 0x28b   :  { %2058 = vmatpush1.bf16.msra.mxu0 %v11093_v14  ;;  %2099 = vmatpush1.bf16.msra.mxu1 %v11131_v30 }
 0x28c   :  { %2059 = vmatprep.subr.bf16.mxu0 %v11101_v16  ;;  %2100 = vmatprep.subr.bf16.mxu1 %v11137_v5 }
 0x28f   :  { %2060 = vmatpush1.bf16.msra.mxu0 %v11105_v18  ;;  %2101 = vmatpush1.bf16.msra.mxu1 %v11143_v46 }
 0x290   :  { %2061 = vmatprep.subr.bf16.mxu0 %v11111_v20  ;;  %v11158_v20 = vld [vmem:[#allocation5 + $0x1c8] ss:$16 sps:$4 sm:$0xff]  }
 0x291   :  { %12919 = vst [vmem:[#allocation36_spill] sm:$0xff] %v11158_v20 }
 0x293   :  { %2062 = vmatpush1.bf16.msra.mxu0 %v11115_v22  ;;  %v11152_v22 = vld [vmem:[#allocation5 + $0x1a8] ss:$16 sps:$4 sm:$0xff]  }
 0x294   :  { %2063 = vmatprep.subr.bf16.mxu0 %v11122_v25  ;;  %v11149_v25 = vld [vmem:[#allocation5 + $0x1ac] ss:$16 sps:$4 sm:$0xff]   ;;  %12917 = vst [vmem:[#allocation34_spill] sm:$0xff] %v11152_v22 }
 0x295   :  { %12916 = vst [vmem:[#allocation33_spill] sm:$0xff] %v11149_v25  ;;  %2102 = vmatprep.subr.bf16.mxu1 %v11149_v25 }
 0x296   :  { %2103 = vmatpush1.bf16.msra.mxu1 %v11152_v22 }
 0x297   :  { %2064 = vmatpush1.bf16.msra.mxu0 %v11129_v29  ;;  %v11155_v29 = vld [vmem:[#allocation5 + $0x1cc] ss:$16 sps:$4 sm:$0xff]  }
 0x298   :  { %2065 = vmatprep.subr.bf16.mxu0 %v11135_v31  ;;  %12918 = vst [vmem:[#allocation35_spill] sm:$0xff] %v11155_v29  ;;  %2104 = vmatprep.subr.bf16.mxu1 %v11155_v29  ;;  %v11161_v31 = vld [vmem:[#allocation5 + $0x1ec] ss:$16 sps:$4 sm:$0xff]  }
 0x299   :  { %12920 = vst [vmem:[#allocation37_spill] sm:$0xff] %v11161_v31 }
 0x29a   :  { %2105 = vmatpush1.bf16.msra.mxu1 %v11158_v20 }
 0x29b   :  { %2066 = vmatpush1.bf16.msra.mxu0 %v11141_v32  ;;  %v11164_v32 = vld [vmem:[#allocation5 + $0x1e8] ss:$16 sps:$4 sm:$0xff]   ;;  %2106 = vmatprep.subr.bf16.mxu1 %v11161_v31 }
 0x29c   :  { %2556 = vmatprep.subr.bf16.mxu0 %v10953_v52  ;;  %12921 = vst [vmem:[#allocation38_spill] sm:$0xff] %v11164_v32  ;;  %v1172_v52 = vld [vmem:[%s12687_s2] sm:$0xf] }
 0x29d   :  { %v1177_v22 = vrot.slane %v1172_v52, %v10921_v7  ;;  %v1181_v29 = vrot.slane %v1172_v52, %v10926_v9  ;;  %v1185_v7 = vrot.slane %v1172_v52, %v10933_v21 }
 0x29e   :  { %2107 = vmatpush1.bf16.msra.mxu1 %v11164_v32 }
 0x29f   :  { %2597 = vmatprep.subr.bf16.mxu1 %v10956_v59  ;;  %v1189_v59 = vrot.slane %v1172_v52, %v10930_v11  ;;  %v9635_v52 = vcombine.high %v10973_v28, %v10973_v28  ;;  %v12924_v28 = vld [vmem:[#allocation16_spill] sm:$0xff] }
 0x331   :  { %v1548_v25 = vpop.f32.mrb[8].mxu0  ;;  %v1589_v46 = vpop.f32.mrb[8].mxu1 }
 0x332   :  { %v1549_v18 = vadd.f32 %v1548_v25, %v1177_v22  ;;  %v1550_v20 = vpop.f32.mrb[9].mxu0  ;;  %v1591_v5 = vpop.f32.mrb[9].mxu1  ;;  %v1590_v10 = vadd.f32 %v1589_v46, %v1185_v7 }
 0x333   :  { %v1551_v16 = vadd.f32 %v1550_v20, %v1181_v29  ;;  %v1552_v30 = vpop.f32.mrb[10].mxu0  ;;  %v1593_v31 = vpop.f32.mrb[10].mxu1  ;;  %v1592_v23 = vadd.f32 %v1591_v5, %v1189_v59 }
 0x334   :  { %v8722_v14 = vmul.f32 -1.442695, %v1549_v18  ;;  %v1553_v32 = vpop.f32.mrb[11].mxu0  ;;  %v1594_v27 = vpop.f32.mrb[11].mxu1  ;;  %v12928_v30 = vld [vmem:[#allocation18_spill] sm:$0xff]  ;;  %v12929_v31 = vld [vmem:[#allocation28_spill] sm:$0xff] }
 0x335   :  { %v8723_v12 = vmul.f32 -1.442695, %v1551_v16  ;;  %v8724_v9 = vmul.f32 -1.442695, %v1592_v23  ;;  %v12926_v23 = vld [vmem:[#allocation17_spill] sm:$0xff] }
 0x336   :  { %10299 = vpow2.f32 %v8722_v14 }
 0x337   :  { %10301 = vpow2.f32 %v8723_v12  ;;  %v12925_v12 = vld [vmem:[#allocation23_spill] sm:$0xff] }
 0x338   :  { %10303 = vpow2.f32 %v8724_v9 }
 0x339   :  { %10305 = vtanh.f32 %v1590_v10 }
 0x340   :  { %v10300_v24 = vpop.eup %10299 }
 0x341   :  { %v10302_v22 = vpop.eup %10301  ;;  %v1599_v25 = vadd.f32 1.0, %v10300_v24  ;;  %v12927_v24 = vld [vmem:[#allocation26_spill] sm:$0xff] }
 0x342   :  { %v1605_v20 = vadd.f32 1.0, %v10302_v22  ;;  %v10304_v32 = vpop.eup %10303  ;;  %v12930_v22 = vld [vmem:[#allocation19_spill] sm:$0xff] }
 0x343   :  { %10307 = vrcp.f32 %v1599_v25  ;;  %v10306_v18 = vpop.eup %10305  ;;  %v1612_v27 = vadd.f32 1.0, %v10304_v32  ;;  %v12931_v25 = vld [vmem:[#allocation30_spill] sm:$0xff]  ;;  %v12933_v32 = vld [vmem:[#allocation32_spill] sm:$0xff] }
 0x344   :  { %10309 = vrcp.f32 %v1605_v20  ;;  %v12932_v20 = vld [vmem:[#allocation20_spill] sm:$0xff] }
 0x345   :  { %10311 = vrcp.f32 %v1612_v27  ;;  %v12936_v27 = vld [vmem:[#allocation22_spill] sm:$0xff] }
 0x34d   :  { %v10308_v29 = vpop.eup %10307 }
 0x34e   :  { %v10310_v16 = vpop.eup %10309  ;;  %v1616_v14 = vmul.f32 %v10308_v29, %v10306_v18  ;;  %v12934_v18 = vld [vmem:[#allocation21_spill] sm:$0xff] }
 0x34f   :  { %v1615_v5 = vmul.f32 %v10310_v16, %v10967_v26  ;;  %v10312_v7 = vpop.eup %10311  ;;  %v12923_v26 = vld [vmem:[#allocation24_spill] sm:$0xff]  ;;  %v12935_v29 = vld [vmem:[#allocation33_spill] sm:$0xff]  ;;  %v12937_v16 = vld [vmem:[#allocation34_spill] sm:$0xff] }
 0x351   :  { %v11177_v59 = vadd.f32 %v1616_v14, %v1615_v5  ;;  %v12938_v14 = vld [vmem:[#allocation25_spill] sm:$0xff]  ;;  %v12939_v5 = vld [vmem:[#allocation35_spill] sm:$0xff] }
 0x353   :  { %10313 = vtanh.f32 %v11177_v59 }
 0x35d   :  { %v10314_v9 = vpop.eup %10313 }
 0x35e   :  { %v1619_v46 = vmul.f32 %v10314_v9, %v10312_v7  ;;  %v12940_v7 = vld [vmem:[#allocation27_spill] sm:$0xff]  ;;  %v12941_v9 = vld [vmem:[#allocation36_spill] sm:$0xff] }
 0x360   :  { %v11182_v10 = vpack.c.bf16 %v1619_v46, %v1619_v46  ;;  %v12942_v46 = vld [vmem:[#allocation29_spill] sm:$0xff] }
 0x362   :  { %12922 = vst [vmem:[#allocation39_spill] sm:$0xff] %v11182_v10  ;;  %2067 = vmatprep.mubr.bf16.mxu0 %v11182_v10  ;;  %2108 = vmatprep.mubr.bf16.mxu1 %v11182_v10  ;;  %v12944_v10 = vld [vmem:[#allocation31_spill] sm:$0xff] }
 0x363   :  { %2068 = vmatmul.mubr.bf16.vlgmr.msra.gmra.mrb[12].mxu0 %v9635_v52  ;;  %2109 = vmatmul.mubr.bf16.vlgmr.msra.gmra.mrb[12].mxu1 %v9635_v52  ;;  %v12943_v52 = vld [vmem:[#allocation37_spill] sm:$0xff] }
 0x364   :  { %2557 = vmatpush1.bf16.msra.mxu0 %v10979_v33  ;;  %2598 = vmatpush1.bf16.msra.mxu1 %v10981_v41 }
 0x365   :  { %2558 = vmatprep.subr.bf16.mxu0 %v10983_v34  ;;  %2599 = vmatprep.subr.bf16.mxu1 %v11007_v42 }
 0x368   :  { %2559 = vmatpush1.bf16.msra.mxu0 %v10988_v35  ;;  %2600 = vmatpush1.bf16.msra.mxu1 %v11011_v44 }
 0x369   :  { %2560 = vmatprep.subr.bf16.mxu0 %v10992_v36  ;;  %2601 = vmatprep.subr.bf16.mxu1 %v11019_v47 }
 0x36c   :  { %2561 = vmatpush1.bf16.msra.mxu0 %v10995_v37  ;;  %2602 = vmatpush1.bf16.msra.mxu1 %v11023_v49 }
 0x36d   :  { %2562 = vmatprep.subr.bf16.mxu0 %v10998_v38  ;;  %2603 = vmatprep.subr.bf16.mxu1 %v11031_v51 }
 0x370   :  { %2563 = vmatpush1.bf16.msra.mxu0 %v11001_v39  ;;  %2604 = vmatpush1.bf16.msra.mxu1 %v11035_v58 }
 0x371   :  { %2564 = vmatprep.subr.bf16.mxu0 %v11005_v40  ;;  %2605 = vmatprep.subr.bf16.mxu1 %v11043_v60 }
 0x374   :  { %2565 = vmatpush1.bf16.msra.mxu0 %v11009_v43  ;;  %2606 = vmatpush1.bf16.msra.mxu1 %v11047_v63 }
 0x375   :  { %2566 = vmatprep.subr.bf16.mxu0 %v11017_v45  ;;  %2607 = vmatprep.subr.bf16.mxu1 %v11055_v53 }
 0x378   :  { %2567 = vmatpush1.bf16.msra.mxu0 %v11021_v48  ;;  %2608 = vmatpush1.bf16.msra.mxu1 %v11059_v56 }
 0x379   :  { %2568 = vmatprep.subr.bf16.mxu0 %v11029_v50  ;;  %2609 = vmatprep.subr.bf16.mxu1 %v11067_v2 }
 0x37c   :  { %2569 = vmatpush1.bf16.msra.mxu0 %v11033_v57  ;;  %2610 = vmatpush1.bf16.msra.mxu1 %v11071_v4 }
 0x37d   :  { %2570 = vmatprep.subr.bf16.mxu0 %v11041_v0  ;;  %2611 = vmatprep.subr.bf16.mxu1 %v11079_v8 }
 0x380   :  { %2571 = vmatpush1.bf16.msra.mxu0 %v11045_v61  ;;  %2612 = vmatpush1.bf16.msra.mxu1 %v11083_v1 }
 0x381   :  { %2572 = vmatprep.subr.bf16.mxu0 %v11053_v54  ;;  %2613 = vmatprep.subr.bf16.mxu1 %v11091_v13 }
 0x384   :  { %2573 = vmatpush1.bf16.msra.mxu0 %v11057_v55  ;;  %2614 = vmatpush1.bf16.msra.mxu1 %v11095_v15 }
 0x385   :  { %2574 = vmatprep.subr.bf16.mxu0 %v11065_v62  ;;  %2615 = vmatprep.subr.bf16.mxu1 %v11103_v17 }
 0x388   :  { %2575 = vmatpush1.bf16.msra.mxu0 %v11069_v3  ;;  %2616 = vmatpush1.bf16.msra.mxu1 %v11107_v19 }
 0x389   :  { %2576 = vmatprep.subr.bf16.mxu0 %v11077_v6  ;;  %2617 = vmatprep.subr.bf16.mxu1 %v12923_v26 }
 0x38c   :  { %2577 = vmatpush1.bf16.msra.mxu0 %v12924_v28  ;;  %2618 = vmatpush1.bf16.msra.mxu1 %v12925_v12 }
 0x38d   :  { %2578 = vmatprep.subr.bf16.mxu0 %v12926_v23  ;;  %2619 = vmatprep.subr.bf16.mxu1 %v12927_v24 }
 0x390   :  { %2579 = vmatpush1.bf16.msra.mxu0 %v12928_v30  ;;  %2620 = vmatpush1.bf16.msra.mxu1 %v12929_v31 }
 0x391   :  { %2580 = vmatprep.subr.bf16.mxu0 %v12930_v22  ;;  %2621 = vmatprep.subr.bf16.mxu1 %v12931_v25 }
 0x394   :  { %2581 = vmatpush1.bf16.msra.mxu0 %v12932_v20  ;;  %2622 = vmatpush1.bf16.msra.mxu1 %v12933_v32 }
 0x395   :  { %2582 = vmatprep.subr.bf16.mxu0 %v12934_v18  ;;  %2623 = vmatprep.subr.bf16.mxu1 %v12935_v29  ;;  %v12945_v18 = vld [vmem:[#allocation38_spill] sm:$0xff]  ;;  %v12946_v29 = vld [vmem:[#allocation13_spill] sm:$0xff] }
 0x398   :  { %2583 = vmatpush1.bf16.msra.mxu0 %v12936_v27  ;;  %2624 = vmatpush1.bf16.msra.mxu1 %v12937_v16  ;;  %v12947_v27 = vld [vmem:[#allocation14_spill] sm:$0xff]  ;;  %v12949_v16 = vld [vmem:[#allocation9_spill] sm:$0xff] }
 0x399   :  { %2584 = vmatprep.subr.bf16.mxu0 %v12938_v14  ;;  %2625 = vmatprep.subr.bf16.mxu1 %v12939_v5  ;;  %v1693_v5 = vld [vmem:[%s12687_s2] sm:$0xf] }
 0x39a   :  { %v12948_v14 = vld [vmem:[#allocation8_spill] sm:$0xff] }
 0x39c   :  { %2585 = vmatpush1.bf16.msra.mxu0 %v12940_v7  ;;  %2626 = vmatpush1.bf16.msra.mxu1 %v12941_v9  ;;  %v1698_v7 = vrot.slane %v1693_v5, %v12948_v14  ;;  %v1702_v9 = vrot.slane %v1693_v5, %v12949_v16  ;;  %v1706_v14 = vrot.slane %v1693_v5, %v10933_v21 }
 0x39d   :  { %2586 = vmatprep.subr.bf16.mxu0 %v12942_v46  ;;  %2627 = vmatprep.subr.bf16.mxu1 %v12943_v52 }
 0x3a0   :  { %2587 = vmatpush1.bf16.msra.mxu0 %v12944_v10  ;;  %2628 = vmatpush1.bf16.msra.mxu1 %v12945_v18 }
 0x3a1   :  { %3077 = vmatprep.subr.bf16.mxu0 %v12946_v29  ;;  %3118 = vmatprep.subr.bf16.mxu1 %v12947_v27  ;;  %v1710_v27 = vrot.slane %v1693_v5, %v10930_v11 }
 0x436   :  { %v2069_v32 = vpop.f32.mrb[12].mxu0  ;;  %v2110_v46 = vpop.f32.mrb[12].mxu1 }
 0x437   :  { %v2070_v20 = vadd.f32 %v2069_v32, %v1698_v7  ;;  %v2071_v52 = vpop.f32.mrb[13].mxu0  ;;  %v2112_v25 = vpop.f32.mrb[13].mxu1  ;;  %v2111_v12 = vadd.f32 %v2110_v46, %v1706_v14 }
 0x438   :  { %v2072_v10 = vadd.f32 %v2071_v52, %v1702_v9  ;;  %v2073_v22 = vpop.f32.mrb[14].mxu0  ;;  %v2114_v18 = vpop.f32.mrb[14].mxu1  ;;  %v2113_v23 = vadd.f32 %v2112_v25, %v1710_v27 }
 0x439   :  { %v8789_v31 = vmul.f32 -1.442695, %v2070_v20  ;;  %v2074_v29 = vpop.f32.mrb[15].mxu0  ;;  %v2115_v30 = vpop.f32.mrb[15].mxu1 }
 0x43a   :  { %v8790_v24 = vmul.f32 -1.442695, %v2072_v10  ;;  %v8791_v16 = vmul.f32 -1.442695, %v2113_v23 }
 0x43b   :  { %10315 = vpow2.f32 %v8789_v31 }
 0x43c   :  { %10317 = vpow2.f32 %v8790_v24 }
 0x43d   :  { %10319 = vpow2.f32 %v8791_v16 }
 0x43e   :  { %10321 = vtanh.f32 %v2111_v12 }
 0x445   :  { %v10316_v28 = vpop.eup %10315 }
 0x446   :  { %v10318_v32 = vpop.eup %10317  ;;  %v2120_v7 = vadd.f32 1.0, %v10316_v28  ;;  %v11264_v28 = vld [vmem:[%s12685_s0 + $0x10] sm:$0xff]  }
 0x447   :  { %v2126_v22 = vadd.f32 1.0, %v10318_v32  ;;  %v10320_v20 = vpop.eup %10319  ;;  %v9636_v14 = vcombine.low %v11264_v28, %v11264_v28 }
 0x448   :  { %10323 = vrcp.f32 %v2120_v7  ;;  %v10322_v18 = vpop.eup %10321  ;;  %v2133_v30 = vadd.f32 1.0, %v10320_v20 }
 0x449   :  { %10325 = vrcp.f32 %v2126_v22 }
 0x44a   :  { %10327 = vrcp.f32 %v2133_v30 }
 0x452   :  { %v10324_v9 = vpop.eup %10323 }
 0x453   :  { %v10326_v10 = vpop.eup %10325  ;;  %v2137_v31 = vmul.f32 %v10324_v9, %v10322_v18 }
 0x454   :  { %v2136_v24 = vmul.f32 %v10326_v10, %v11177_v59  ;;  %v10328_v23 = vpop.eup %10327 }
 0x456   :  { %v11258_v25 = vadd.f32 %v2137_v31, %v2136_v24 }
 0x458   :  { %10329 = vtanh.f32 %v11258_v25 }
 0x462   :  { %v10330_v12 = vpop.eup %10329 }
 0x463   :  { %v2140_v16 = vmul.f32 %v10330_v12, %v10328_v23 }
 0x465   :  { %v11268_v5 = vpack.c.bf16 %v2140_v16, %v2140_v16 }
 0x467   :  { %12950 = vst [vmem:[#allocation24_spill] sm:$0xff] %v11268_v5  ;;  %2588 = vmatprep.mubr.bf16.mxu0 %v11268_v5  ;;  %2629 = vmatprep.mubr.bf16.mxu1 %v11268_v5  ;;  %v11525_v5 = vld [vmem:[#allocation5 + $0x1ac] ss:$16 sps:$4 sm:$0xff]  }
 0x468   :  { %2589 = vmatmul.mubr.bf16.vlgmr.msra.gmra.mrb[16].mxu0 %v9636_v14  ;;  %2630 = vmatmul.mubr.bf16.vlgmr.msra.gmra.mrb[16].mxu1 %v9636_v14 }
 0x469   :  { %3078 = vmatpush1.bf16.msra.mxu0 %v10979_v33  ;;  %3119 = vmatpush1.bf16.msra.mxu1 %v10981_v41  ;;  %v12951_v33 = vld [vmem:[#allocation16_spill] sm:$0xff]  ;;  %v12952_v41 = vld [vmem:[#allocation23_spill] sm:$0xff] }
 0x46a   :  { %3079 = vmatprep.subr.bf16.mxu0 %v10983_v34  ;;  %3120 = vmatprep.subr.bf16.mxu1 %v11007_v42  ;;  %v12953_v34 = vld [vmem:[#allocation17_spill] sm:$0xff]  ;;  %v12960_v42 = vld [vmem:[#allocation32_spill] sm:$0xff] }
 0x46d   :  { %3080 = vmatpush1.bf16.msra.mxu0 %v10988_v35  ;;  %3121 = vmatpush1.bf16.msra.mxu1 %v11011_v44  ;;  %v12954_v35 = vld [vmem:[#allocation26_spill] sm:$0xff]  ;;  %v12962_v44 = vld [vmem:[#allocation33_spill] sm:$0xff] }
 0x46e   :  { %3081 = vmatprep.subr.bf16.mxu0 %v10992_v36  ;;  %3122 = vmatprep.subr.bf16.mxu1 %v11019_v47  ;;  %v12955_v36 = vld [vmem:[#allocation18_spill] sm:$0xff] }
 0x46f   :  { %v12964_v47 = vld [vmem:[#allocation34_spill] sm:$0xff] }
 0x471   :  { %3082 = vmatpush1.bf16.msra.mxu0 %v10995_v37  ;;  %3123 = vmatpush1.bf16.msra.mxu1 %v11023_v49  ;;  %v12956_v37 = vld [vmem:[#allocation28_spill] sm:$0xff]  ;;  %v12966_v49 = vld [vmem:[#allocation35_spill] sm:$0xff] }
 0x472   :  { %3083 = vmatprep.subr.bf16.mxu0 %v10998_v38  ;;  %3124 = vmatprep.subr.bf16.mxu1 %v11031_v51  ;;  %v12957_v38 = vld [vmem:[#allocation19_spill] sm:$0xff]  ;;  %v12968_v51 = vld [vmem:[#allocation36_spill] sm:$0xff]  ;;  %12992 = vst [vmem:[#allocation35_spill] sm:$0xff] %v11525_v5 }
 0x475   :  { %3084 = vmatpush1.bf16.msra.mxu0 %v11001_v39  ;;  %3125 = vmatpush1.bf16.msra.mxu1 %v11035_v58  ;;  %v12958_v39 = vld [vmem:[#allocation30_spill] sm:$0xff]  ;;  %v12970_v58 = vld [vmem:[#allocation37_spill] sm:$0xff] }
 0x476   :  { %3085 = vmatprep.subr.bf16.mxu0 %v11005_v40  ;;  %3126 = vmatprep.subr.bf16.mxu1 %v11043_v60  ;;  %v12959_v40 = vld [vmem:[#allocation20_spill] sm:$0xff]  ;;  %v12972_v60 = vld [vmem:[#allocation38_spill] sm:$0xff] }
 0x479   :  { %3086 = vmatpush1.bf16.msra.mxu0 %v11009_v43  ;;  %3127 = vmatpush1.bf16.msra.mxu1 %v11047_v63  ;;  %v12961_v43 = vld [vmem:[#allocation21_spill] sm:$0xff] }
 0x47a   :  { %3087 = vmatprep.subr.bf16.mxu0 %v11017_v45  ;;  %3128 = vmatprep.subr.bf16.mxu1 %v11055_v53  ;;  %v12963_v45 = vld [vmem:[#allocation22_spill] sm:$0xff]  ;;  %v11337_v63 = vld [vmem:[#allocation5 + $0xc] ss:$16 sps:$4 sm:$0xff]   ;;  %v12973_v53 = vld [vmem:[#allocation8_spill] sm:$0xff] }
 0x47d   :  { %3088 = vmatpush1.bf16.msra.mxu0 %v11021_v48  ;;  %3129 = vmatpush1.bf16.msra.mxu1 %v11059_v56  ;;  %v12965_v48 = vld [vmem:[#allocation25_spill] sm:$0xff] }
 0x47e   :  { %3089 = vmatprep.subr.bf16.mxu0 %v11029_v50  ;;  %3130 = vmatprep.subr.bf16.mxu1 %v11067_v2  ;;  %v12967_v50 = vld [vmem:[#allocation27_spill] sm:$0xff]  ;;  %v12974_v56 = vld [vmem:[#allocation9_spill] sm:$0xff] }
 0x481   :  { %3090 = vmatpush1.bf16.msra.mxu0 %v11033_v57  ;;  %3131 = vmatpush1.bf16.msra.mxu1 %v11071_v4  ;;  %v12969_v57 = vld [vmem:[#allocation29_spill] sm:$0xff] }
 0x482   :  { %3091 = vmatprep.subr.bf16.mxu0 %v11041_v0  ;;  %3132 = vmatprep.subr.bf16.mxu1 %v11079_v8  ;;  %v12971_v0 = vld [vmem:[#allocation31_spill] sm:$0xff] }
 0x485   :  { %3092 = vmatpush1.bf16.msra.mxu0 %v11045_v61  ;;  %3133 = vmatpush1.bf16.msra.mxu1 %v11083_v1  ;;  %v11334_v61 = vld [vmem:[#allocation5 + $0x4] ss:$16 sps:$4 sm:$0xff]  }
 0x486   :  { %3093 = vmatprep.subr.bf16.mxu0 %v11053_v54  ;;  %3134 = vmatprep.subr.bf16.mxu1 %v11091_v13  ;;  %v2214_v54 = vld [vmem:[%s12687_s2] sm:$0xf] }
 0x487   :  { %v2231_v59 = vrot.slane %v2214_v54, %v10930_v11  ;;  %v2227_v29 = vrot.slane %v2214_v54, %v10933_v21 }
 0x489   :  { %3094 = vmatpush1.bf16.msra.mxu0 %v11057_v55  ;;  %3135 = vmatpush1.bf16.msra.mxu1 %v11095_v15  ;;  %v2219_v55 = vrot.slane %v2214_v54, %v12973_v53 }
 0x48a   :  { %3095 = vmatprep.subr.bf16.mxu0 %v11065_v62  ;;  %3136 = vmatprep.subr.bf16.mxu1 %v11103_v17  ;;  %v2223_v62 = vrot.slane %v2214_v54, %v12974_v56  ;;  %v11417_v54 = vld [vmem:[#allocation5 + $0xe4] ss:$16 sps:$4 sm:$0xff]  }
 0x48d   :  { %3096 = vmatpush1.bf16.msra.mxu0 %v11069_v3  ;;  %3137 = vmatpush1.bf16.msra.mxu1 %v11107_v19 }
 0x48e   :  { %3097 = vmatprep.subr.bf16.mxu0 %v11077_v6  ;;  %3138 = vmatprep.subr.bf16.mxu1 %v12923_v26 }
 0x491   :  { %3098 = vmatpush1.bf16.msra.mxu0 %v12951_v33  ;;  %3139 = vmatpush1.bf16.msra.mxu1 %v12952_v41 }
 0x492   :  { %3099 = vmatprep.subr.bf16.mxu0 %v12953_v34  ;;  %3140 = vmatprep.subr.bf16.mxu1 %v12954_v35  ;;  %v9637_v34 = vcombine.high %v11264_v28, %v11264_v28  ;;  %v11368_v28 = vld [vmem:[#allocation5 + $0x44] ss:$16 sps:$4 sm:$0xff]  }
 0x495   :  { %3100 = vmatpush1.bf16.msra.mxu0 %v12955_v36  ;;  %3141 = vmatpush1.bf16.msra.mxu1 %v12956_v37  ;;  %v11355_v36 = vld [vmem:[#allocation5] ss:$16 sps:$4 sm:$0xff]   ;;  %v11357_v37 = vld [vmem:[#allocation5 + $0x8] ss:$16 sps:$4 sm:$0xff]  }
 0x496   :  { %3101 = vmatprep.subr.bf16.mxu0 %v12957_v38  ;;  %3142 = vmatprep.subr.bf16.mxu1 %v12958_v39  ;;  %v11359_v38 = vld [vmem:[#allocation5 + $0x24] ss:$16 sps:$4 sm:$0xff]   ;;  %v11371_v39 = vld [vmem:[#allocation5 + $0x40] ss:$16 sps:$4 sm:$0xff]  }
 0x499   :  { %3102 = vmatpush1.bf16.msra.mxu0 %v12959_v40  ;;  %3143 = vmatpush1.bf16.msra.mxu1 %v12960_v42  ;;  %v11374_v40 = vld [vmem:[#allocation5 + $0x64] ss:$16 sps:$4 sm:$0xff]   ;;  %v11377_v42 = vld [vmem:[#allocation5 + $0x60] ss:$16 sps:$4 sm:$0xff]  }
 0x49a   :  { %3103 = vmatprep.subr.bf16.mxu0 %v12961_v43  ;;  %3144 = vmatprep.subr.bf16.mxu1 %v12962_v44  ;;  %v11381_v43 = vld [vmem:[#allocation5 + $0x84] ss:$16 sps:$4 sm:$0xff]   ;;  %v11383_v44 = vld [vmem:[#allocation5 + $0x2c] ss:$16 sps:$4 sm:$0xff]  }
 0x49d   :  { %3104 = vmatpush1.bf16.msra.mxu0 %v12963_v45  ;;  %3145 = vmatpush1.bf16.msra.mxu1 %v12964_v47  ;;  %v11385_v45 = vld [vmem:[#allocation5 + $0x80] ss:$16 sps:$4 sm:$0xff]   ;;  %v11387_v47 = vld [vmem:[#allocation5 + $0x28] ss:$16 sps:$4 sm:$0xff]  }
 0x49e   :  { %3105 = vmatprep.subr.bf16.mxu0 %v12965_v48  ;;  %3146 = vmatprep.subr.bf16.mxu1 %v12966_v49  ;;  %v11393_v48 = vld [vmem:[#allocation5 + $0xa4] ss:$16 sps:$4 sm:$0xff]   ;;  %v11395_v49 = vld [vmem:[#allocation5 + $0x4c] ss:$16 sps:$4 sm:$0xff]  }
 0x4a1   :  { %3106 = vmatpush1.bf16.msra.mxu0 %v12967_v50  ;;  %3147 = vmatpush1.bf16.msra.mxu1 %v12968_v51  ;;  %v11397_v50 = vld [vmem:[#allocation5 + $0xa0] ss:$16 sps:$4 sm:$0xff]   ;;  %v11399_v51 = vld [vmem:[#allocation5 + $0x48] ss:$16 sps:$4 sm:$0xff]  }
 0x4a2   :  { %3107 = vmatprep.subr.bf16.mxu0 %v12969_v57  ;;  %3148 = vmatprep.subr.bf16.mxu1 %v12970_v58  ;;  %v11405_v57 = vld [vmem:[#allocation5 + $0xc4] ss:$16 sps:$4 sm:$0xff]   ;;  %v11407_v58 = vld [vmem:[#allocation5 + $0x6c] ss:$16 sps:$4 sm:$0xff]  }
 0x4a5   :  { %3108 = vmatpush1.bf16.msra.mxu0 %v12971_v0  ;;  %3149 = vmatpush1.bf16.msra.mxu1 %v12972_v60  ;;  %v11409_v0 = vld [vmem:[#allocation5 + $0xc0] ss:$16 sps:$4 sm:$0xff]   ;;  %v11411_v60 = vld [vmem:[#allocation5 + $0x68] ss:$16 sps:$4 sm:$0xff]  }
 0x4a6   :  { %3598 = vmatprep.subr.bf16.mxu0 %v11334_v61  ;;  %3639 = vmatprep.subr.bf16.mxu1 %v11337_v63 }
 0x53b   :  { %v2590_v2 = vpop.f32.mrb[16].mxu0  ;;  %v2631_v3 = vpop.f32.mrb[16].mxu1 }
 0x53c   :  { %v2591_v4 = vadd.f32 %v2590_v2, %v2219_v55  ;;  %v2592_v6 = vpop.f32.mrb[17].mxu0  ;;  %v2633_v8 = vpop.f32.mrb[17].mxu1  ;;  %v2632_v32 = vadd.f32 %v2631_v3, %v2227_v29  ;;  %v11419_v55 = vld [vmem:[#allocation5 + $0x8c] ss:$16 sps:$4 sm:$0xff]   ;;  %v11423_v2 = vld [vmem:[#allocation5 + $0x88] ss:$16 sps:$4 sm:$0xff]  }
 0x53d   :  { %v2593_v1 = vadd.f32 %v2592_v6, %v2223_v62  ;;  %v2594_v13 = vpop.f32.mrb[18].mxu0  ;;  %v2635_v15 = vpop.f32.mrb[18].mxu1  ;;  %v2634_v52 = vadd.f32 %v2633_v8, %v2231_v59  ;;  %v11421_v62 = vld [vmem:[#allocation5 + $0xe0] ss:$16 sps:$4 sm:$0xff]   ;;  %v11429_v3 = vld [vmem:[#allocation5 + $0x104] ss:$16 sps:$4 sm:$0xff]  }
 0x53e   :  { %v8856_v17 = vmul.f32 -1.442695, %v2591_v4  ;;  %v2595_v19 = vpop.f32.mrb[19].mxu0  ;;  %v2636_v26 = vpop.f32.mrb[19].mxu1  ;;  %v11431_v4 = vld [vmem:[#allocation5 + $0xac] ss:$16 sps:$4 sm:$0xff]  }
 0x53f   :  { %v8857_v46 = vmul.f32 -1.442695, %v2593_v1  ;;  %v8858_v27 = vmul.f32 -1.442695, %v2634_v52  ;;  %v11433_v6 = vld [vmem:[#allocation5 + $0x100] ss:$16 sps:$4 sm:$0xff]  }
 0x540   :  { %10331 = vpow2.f32 %v8856_v17  ;;  %v11435_v8 = vld [vmem:[#allocation5 + $0xa8] ss:$16 sps:$4 sm:$0xff]   ;;  %v11441_v1 = vld [vmem:[#allocation5 + $0x124] ss:$16 sps:$4 sm:$0xff]   ;;  %v11443_v13 = vld [vmem:[#allocation5 + $0xcc] ss:$16 sps:$4 sm:$0xff]  }
 0x541   :  { %10333 = vpow2.f32 %v8857_v46  ;;  %v11445_v15 = vld [vmem:[#allocation5 + $0x120] ss:$16 sps:$4 sm:$0xff]   ;;  %v11447_v17 = vld [vmem:[#allocation5 + $0xc8] ss:$16 sps:$4 sm:$0xff]   ;;  %v11453_v19 = vld [vmem:[#allocation5 + $0x144] ss:$16 sps:$4 sm:$0xff]  }
 0x542   :  { %10335 = vpow2.f32 %v8858_v27  ;;  %v11455_v59 = vld [vmem:[#allocation5 + $0xec] ss:$16 sps:$4 sm:$0xff]   ;;  %v11457_v26 = vld [vmem:[#allocation5 + $0x140] ss:$16 sps:$4 sm:$0xff]   ;;  %v11459_v46 = vld [vmem:[#allocation5 + $0xe8] ss:$16 sps:$4 sm:$0xff]  }
 0x543   :  { %10337 = vtanh.f32 %v2632_v32  ;;  %12976 = vst [vmem:[#allocation14_spill] sm:$0xff] %v11457_v26  ;;  %v11465_v52 = vld [vmem:[#allocation5 + $0x164] ss:$16 sps:$4 sm:$0xff]   ;;  %v11467_v29 = vld [vmem:[#allocation5 + $0x10c] ss:$16 sps:$4 sm:$0xff]  }
 0x544   :  { %12977 = vst [vmem:[#allocation16_spill] sm:$0xff] %v11465_v52  ;;  %v11469_v27 = vld [vmem:[#allocation5 + $0x160] ss:$16 sps:$4 sm:$0xff]   ;;  %v11471_v32 = vld [vmem:[#allocation5 + $0x108] ss:$16 sps:$4 sm:$0xff]  }
 0x545   :  { %12978 = vst [vmem:[#allocation23_spill] sm:$0xff] %v11469_v27 }
 0x54a   :  { %v10332_v7 = vpop.eup %10331 }
 0x54b   :  { %v10334_v22 = vpop.eup %10333  ;;  %v2641_v20 = vadd.f32 1.0, %v10332_v7  ;;  %v11477_v7 = vld [vmem:[#allocation5 + $0x184] ss:$16 sps:$4 sm:$0xff]  }
 0x54c   :  { %v2647_v18 = vadd.f32 1.0, %v10334_v22  ;;  %v10336_v9 = vpop.eup %10335  ;;  %12979 = vst [vmem:[#allocation17_spill] sm:$0xff] %v11477_v7  ;;  %v11479_v22 = vld [vmem:[#allocation5 + $0x12c] ss:$16 sps:$4 sm:$0xff]  }
 0x54d   :  { %10339 = vrcp.f32 %v2641_v20  ;;  %v10338_v30 = vpop.eup %10337  ;;  %v2654_v31 = vadd.f32 1.0, %v10336_v9  ;;  %v11481_v20 = vld [vmem:[#allocation5 + $0x180] ss:$16 sps:$4 sm:$0xff]   ;;  %v11487_v9 = vld [vmem:[#allocation5 + $0x1a4] ss:$16 sps:$4 sm:$0xff]  }
 0x54e   :  { %10341 = vrcp.f32 %v2647_v18  ;;  %12980 = vst [vmem:[#allocation26_spill] sm:$0xff] %v11481_v20  ;;  %v11483_v18 = vld [vmem:[#allocation5 + $0x128] ss:$16 sps:$4 sm:$0xff]   ;;  %12981 = vst [vmem:[#allocation18_spill] sm:$0xff] %v11487_v9 }
 0x54f   :  { %10343 = vrcp.f32 %v2654_v31  ;;  %v11495_v31 = vld [vmem:[#allocation5 + $0x14c] ss:$16 sps:$4 sm:$0xff]  }
 0x557   :  { %v10340_v10 = vpop.eup %10339 }
 0x558   :  { %v10342_v24 = vpop.eup %10341  ;;  %v2658_v23 = vmul.f32 %v10340_v10, %v10338_v30  ;;  %v11491_v30 = vld [vmem:[#allocation5 + $0x1a0] ss:$16 sps:$4 sm:$0xff]   ;;  %v11493_v10 = vld [vmem:[#allocation5 + $0x148] ss:$16 sps:$4 sm:$0xff]  }
 0x559   :  { %v2657_v12 = vmul.f32 %v10342_v24, %v11258_v25  ;;  %v10344_v14 = vpop.eup %10343  ;;  %v11364_v25 = vld [vmem:[#allocation5 + $0x20] ss:$16 sps:$4 sm:$0xff]   ;;  %12982 = vst [vmem:[#allocation28_spill] sm:$0xff] %v11491_v30  ;;  %12983 = vst [vmem:[#allocation19_spill] sm:$0xff] %v11493_v10  ;;  %v11498_v24 = vld [vmem:[#allocation5 + $0x1c4] ss:$16 sps:$4 sm:$0xff]  }
 0x55a   :  { %12984 = vst [vmem:[#allocation30_spill] sm:$0xff] %v11498_v24 }
 0x55b   :  { %v11348_v16 = vadd.f32 %v2658_v23, %v2657_v12  ;;  %v11500_v23 = vld [vmem:[#allocation5 + $0x16c] ss:$16 sps:$4 sm:$0xff]   ;;  %v11505_v12 = vld [vmem:[#allocation5 + $0x1c0] ss:$16 sps:$4 sm:$0xff]  }
 0x55c   :  { %12985 = vst [vmem:[#allocation20_spill] sm:$0xff] %v11500_v23  ;;  %12986 = vst [vmem:[#allocation32_spill] sm:$0xff] %v11505_v12 }
 0x55d   :  { %10345 = vtanh.f32 %v11348_v16 }
 0x567   :  { %v10346_v33 = vpop.eup %10345 }
 0x568   :  { %v2661_v41 = vmul.f32 %v10346_v33, %v10344_v14  ;;  %v11507_v14 = vld [vmem:[#allocation5 + $0x168] ss:$16 sps:$4 sm:$0xff]   ;;  %v11511_v33 = vld [vmem:[#allocation5 + $0x1e4] ss:$16 sps:$4 sm:$0xff]  }
 0x569   :  { %12987 = vst [vmem:[#allocation21_spill] sm:$0xff] %v11507_v14  ;;  %12988 = vst [vmem:[#allocation33_spill] sm:$0xff] %v11511_v33 }
 0x56a   :  { %v11353_v35 = vpack.c.bf16 %v2661_v41, %v2661_v41  ;;  %v11513_v41 = vld [vmem:[#allocation5 + $0x18c] ss:$16 sps:$4 sm:$0xff]  }
 0x56b   :  { %12989 = vst [vmem:[#allocation22_spill] sm:$0xff] %v11513_v41 }
 0x56c   :  { %12975 = vst [vmem:[#allocation13_spill] sm:$0xff] %v11353_v35  ;;  %3109 = vmatprep.mubr.bf16.mxu0 %v11353_v35  ;;  %3150 = vmatprep.mubr.bf16.mxu1 %v11353_v35  ;;  %v11519_v35 = vld [vmem:[#allocation5 + $0x188] ss:$16 sps:$4 sm:$0xff]  }
 0x56d   :  { %3110 = vmatmul.mubr.bf16.vlgmr.msra.gmra.mrb[20].mxu0 %v9637_v34  ;;  %3151 = vmatmul.mubr.bf16.vlgmr.msra.gmra.mrb[20].mxu1 %v9637_v34  ;;  %v11517_v34 = vld [vmem:[#allocation5 + $0x1e0] ss:$16 sps:$4 sm:$0xff]   ;;  %12991 = vst [vmem:[#allocation25_spill] sm:$0xff] %v11519_v35 }
 0x56e   :  { %3599 = vmatpush1.bf16.msra.mxu0 %v11355_v36  ;;  %3640 = vmatpush1.bf16.msra.mxu1 %v11357_v37  ;;  %12990 = vst [vmem:[#allocation34_spill] sm:$0xff] %v11517_v34 }
 0x56f   :  { %3600 = vmatprep.subr.bf16.mxu0 %v11359_v38  ;;  %3641 = vmatprep.subr.bf16.mxu1 %v11383_v44 }
 0x572   :  { %3601 = vmatpush1.bf16.msra.mxu0 %v11364_v25  ;;  %3642 = vmatpush1.bf16.msra.mxu1 %v11387_v47 }
 0x573   :  { %3602 = vmatprep.subr.bf16.mxu0 %v11368_v28  ;;  %3643 = vmatprep.subr.bf16.mxu1 %v11395_v49 }
 0x576   :  { %3603 = vmatpush1.bf16.msra.mxu0 %v11371_v39  ;;  %3644 = vmatpush1.bf16.msra.mxu1 %v11399_v51 }
 0x577   :  { %3604 = vmatprep.subr.bf16.mxu0 %v11374_v40  ;;  %3645 = vmatprep.subr.bf16.mxu1 %v11407_v58 }
 0x57a   :  { %3605 = vmatpush1.bf16.msra.mxu0 %v11377_v42  ;;  %3646 = vmatpush1.bf16.msra.mxu1 %v11411_v60 }
 0x57b   :  { %3606 = vmatprep.subr.bf16.mxu0 %v11381_v43  ;;  %3647 = vmatprep.subr.bf16.mxu1 %v11419_v55 }
 0x57e   :  { %3607 = vmatpush1.bf16.msra.mxu0 %v11385_v45  ;;  %3648 = vmatpush1.bf16.msra.mxu1 %v11423_v2 }
 0x57f   :  { %3608 = vmatprep.subr.bf16.mxu0 %v11393_v48  ;;  %3649 = vmatprep.subr.bf16.mxu1 %v11431_v4 }
 0x582   :  { %3609 = vmatpush1.bf16.msra.mxu0 %v11397_v50  ;;  %3650 = vmatpush1.bf16.msra.mxu1 %v11435_v8 }
 0x583   :  { %3610 = vmatprep.subr.bf16.mxu0 %v11405_v57  ;;  %3651 = vmatprep.subr.bf16.mxu1 %v11443_v13 }
 0x586   :  { %3611 = vmatpush1.bf16.msra.mxu0 %v11409_v0  ;;  %3652 = vmatpush1.bf16.msra.mxu1 %v11447_v17 }
 0x587   :  { %3612 = vmatprep.subr.bf16.mxu0 %v11417_v54  ;;  %3653 = vmatprep.subr.bf16.mxu1 %v11455_v59 }
 0x58a   :  { %3613 = vmatpush1.bf16.msra.mxu0 %v11421_v62  ;;  %3654 = vmatpush1.bf16.msra.mxu1 %v11459_v46 }
 0x58b   :  { %3614 = vmatprep.subr.bf16.mxu0 %v11429_v3  ;;  %3655 = vmatprep.subr.bf16.mxu1 %v11467_v29 }
 0x58e   :  { %3615 = vmatpush1.bf16.msra.mxu0 %v11433_v6  ;;  %3656 = vmatpush1.bf16.msra.mxu1 %v11471_v32 }
 0x58f   :  { %3616 = vmatprep.subr.bf16.mxu0 %v11441_v1  ;;  %3657 = vmatprep.subr.bf16.mxu1 %v11479_v22 }
 0x592   :  { %3617 = vmatpush1.bf16.msra.mxu0 %v11445_v15  ;;  %3658 = vmatpush1.bf16.msra.mxu1 %v11483_v18 }
 0x593   :  { %3618 = vmatprep.subr.bf16.mxu0 %v11453_v19  ;;  %3659 = vmatprep.subr.bf16.mxu1 %v11495_v31 }
 0x596   :  { %3619 = vmatpush1.bf16.msra.mxu0 %v11457_v26  ;;  %3660 = vmatpush1.bf16.msra.mxu1 %v11493_v10 }
 0x597   :  { %3620 = vmatprep.subr.bf16.mxu0 %v11465_v52  ;;  %3661 = vmatprep.subr.bf16.mxu1 %v11500_v23 }
 0x59a   :  { %3621 = vmatpush1.bf16.msra.mxu0 %v11469_v27  ;;  %3662 = vmatpush1.bf16.msra.mxu1 %v11507_v14 }
 0x59b   :  { %3622 = vmatprep.subr.bf16.mxu0 %v11477_v7  ;;  %3663 = vmatprep.subr.bf16.mxu1 %v11513_v41 }
 0x59e   :  { %3623 = vmatpush1.bf16.msra.mxu0 %v11481_v20  ;;  %3664 = vmatpush1.bf16.msra.mxu1 %v11519_v35 }
 0x59f   :  { %3624 = vmatprep.subr.bf16.mxu0 %v11487_v9  ;;  %3665 = vmatprep.subr.bf16.mxu1 %v11525_v5 }
 0x5a2   :  { %3625 = vmatpush1.bf16.msra.mxu0 %v11491_v30  ;;  %v11534_v30 = vld [vmem:[#allocation5 + $0x1c8] ss:$16 sps:$4 sm:$0xff]  }
 0x5a3   :  { %3626 = vmatprep.subr.bf16.mxu0 %v11498_v24  ;;  %v11528_v24 = vld [vmem:[#allocation5 + $0x1a8] ss:$16 sps:$4 sm:$0xff]   ;;  %12995 = vst [vmem:[#allocation29_spill] sm:$0xff] %v11534_v30 }
 0x5a4   :  { %12993 = vst [vmem:[#allocation27_spill] sm:$0xff] %v11528_v24  ;;  %3666 = vmatpush1.bf16.msra.mxu1 %v11528_v24 }
 0x5a6   :  { %3627 = vmatpush1.bf16.msra.mxu0 %v11505_v12  ;;  %v11531_v12 = vld [vmem:[#allocation5 + $0x1cc] ss:$16 sps:$4 sm:$0xff]  }
 0x5a7   :  { %3628 = vmatprep.subr.bf16.mxu0 %v11511_v33  ;;  %12994 = vst [vmem:[#allocation36_spill] sm:$0xff] %v11531_v12  ;;  %3667 = vmatprep.subr.bf16.mxu1 %v11531_v12  ;;  %v11537_v33 = vld [vmem:[#allocation5 + $0x1ec] ss:$16 sps:$4 sm:$0xff]  }
 0x5a8   :  { %12996 = vst [vmem:[#allocation37_spill] sm:$0xff] %v11537_v33  ;;  %3668 = vmatpush1.bf16.msra.mxu1 %v11534_v30 }
 0x5a9   :  { %3669 = vmatprep.subr.bf16.mxu1 %v11537_v33 }
 0x5aa   :  { %3629 = vmatpush1.bf16.msra.mxu0 %v11517_v34  ;;  %v11540_v34 = vld [vmem:[#allocation5 + $0x1e8] ss:$16 sps:$4 sm:$0xff]  }
 0x5ab   :  { %4119 = vmatprep.subr.bf16.mxu0 %v11334_v61  ;;  %12997 = vst [vmem:[#allocation31_spill] sm:$0xff] %v11540_v34  ;;  %v2735_v61 = vld [vmem:[%s12687_s2] sm:$0xf] }
 0x5ac   :  { %3670 = vmatpush1.bf16.msra.mxu1 %v11540_v34  ;;  %v2740_v24 = vrot.slane %v2735_v61, %v12973_v53  ;;  %v2744_v12 = vrot.slane %v2735_v61, %v12974_v56  ;;  %v2748_v53 = vrot.slane %v2735_v61, %v10933_v21 }
 0x5ad   :  { %4160 = vmatprep.subr.bf16.mxu1 %v11337_v63  ;;  %v2752_v63 = vrot.slane %v2735_v61, %v10930_v11 }
 0x640   :  { %v3111_v5 = vpop.f32.mrb[20].mxu0  ;;  %v3152_v9 = vpop.f32.mrb[20].mxu1 }
 0x641   :  { %v3112_v35 = vadd.f32 %v3111_v5, %v2740_v24  ;;  %v3113_v30 = vpop.f32.mrb[21].mxu0  ;;  %v3154_v20 = vpop.f32.mrb[21].mxu1  ;;  %v3153_v10 = vadd.f32 %v3152_v9, %v2748_v53 }
 0x642   :  { %v3114_v41 = vadd.f32 %v3113_v30, %v2744_v12  ;;  %v3115_v7 = vpop.f32.mrb[22].mxu0  ;;  %v3156_v33 = vpop.f32.mrb[22].mxu1  ;;  %v3155_v52 = vadd.f32 %v3154_v20, %v2752_v63 }
 0x643   :  { %v8923_v14 = vmul.f32 -1.442695, %v3112_v35  ;;  %v3116_v34 = vpop.f32.mrb[23].mxu0  ;;  %v3157_v27 = vpop.f32.mrb[23].mxu1 }
 0x644   :  { %v8924_v23 = vmul.f32 -1.442695, %v3114_v41  ;;  %v8925_v56 = vmul.f32 -1.442695, %v3155_v52 }
 0x645   :  { %10347 = vpow2.f32 %v8923_v14 }
 0x646   :  { %10349 = vpow2.f32 %v8924_v23 }
 0x647   :  { %10351 = vpow2.f32 %v8925_v56  ;;  %v11559_v56 = vld [vmem:[%s12685_s0 + $0x18] sm:$0xff]  }
 0x648   :  { %10353 = vtanh.f32 %v3153_v10  ;;  %v9638_v9 = vcombine.low %v11559_v56, %v11559_v56 }
 0x64f   :  { %v10348_v26 = vpop.eup %10347 }
 0x650   :  { %v10350_v5 = vpop.eup %10349  ;;  %v3162_v24 = vadd.f32 1.0, %v10348_v26 }
 0x651   :  { %v3168_v7 = vadd.f32 1.0, %v10350_v5  ;;  %v10352_v35 = vpop.eup %10351 }
 0x652   :  { %10355 = vrcp.f32 %v3162_v24  ;;  %v10354_v30 = vpop.eup %10353  ;;  %v3175_v27 = vadd.f32 1.0, %v10352_v35 }
 0x653   :  { %10357 = vrcp.f32 %v3168_v7 }
 0x654   :  { %10359 = vrcp.f32 %v3175_v27 }
 0x65c   :  { %v10356_v12 = vpop.eup %10355 }
 0x65d   :  { %v10358_v33 = vpop.eup %10357  ;;  %v3179_v14 = vmul.f32 %v10356_v12, %v10354_v30 }
 0x65e   :  { %v3178_v20 = vmul.f32 %v10358_v33, %v11348_v16  ;;  %v10360_v53 = vpop.eup %10359  ;;  %v12999_v16 = vld [vmem:[#allocation14_spill] sm:$0xff] }
 0x660   :  { %v11553_v23 = vadd.f32 %v3179_v14, %v3178_v20 }
 0x662   :  { %10361 = vtanh.f32 %v11553_v23 }
 0x66c   :  { %v10362_v26 = vpop.eup %10361 }
 0x66d   :  { %v3182_v52 = vmul.f32 %v10362_v26, %v10360_v53 }
 0x66f   :  { %v11563_v10 = vpack.c.bf16 %v3182_v52, %v3182_v52 }
 0x671   :  { %12998 = vst [vmem:[#allocation38_spill] sm:$0xff] %v11563_v10  ;;  %3630 = vmatprep.mubr.bf16.mxu0 %v11563_v10  ;;  %3671 = vmatprep.mubr.bf16.mxu1 %v11563_v10  ;;  %v11820_v10 = vld [vmem:[#allocation5 + $0x3c0] ss:$16 sps:$4 sm:$0xff]  }
 0x672   :  { %3631 = vmatmul.mubr.bf16.vlgmr.msra.gmra.mrb[24].mxu0 %v9638_v9  ;;  %3672 = vmatmul.mubr.bf16.vlgmr.msra.gmra.mrb[24].mxu1 %v9638_v9 }
 0x673   :  { %4120 = vmatpush1.bf16.msra.mxu0 %v11355_v36  ;;  %4161 = vmatpush1.bf16.msra.mxu1 %v11357_v37  ;;  %v13000_v36 = vld [vmem:[#allocation19_spill] sm:$0xff]  ;;  %v13001_v37 = vld [vmem:[#allocation16_spill] sm:$0xff] }
 0x674   :  { %4121 = vmatprep.subr.bf16.mxu0 %v11359_v38  ;;  %4162 = vmatprep.subr.bf16.mxu1 %v11383_v44  ;;  %v13002_v38 = vld [vmem:[#allocation20_spill] sm:$0xff]  ;;  %v13009_v44 = vld [vmem:[#allocation18_spill] sm:$0xff] }
 0x677   :  { %4122 = vmatpush1.bf16.msra.mxu0 %v11364_v25  ;;  %4163 = vmatpush1.bf16.msra.mxu1 %v11387_v47  ;;  %v13003_v25 = vld [vmem:[#allocation23_spill] sm:$0xff]  ;;  %v13011_v47 = vld [vmem:[#allocation28_spill] sm:$0xff] }
 0x678   :  { %4123 = vmatprep.subr.bf16.mxu0 %v11368_v28  ;;  %4164 = vmatprep.subr.bf16.mxu1 %v11395_v49  ;;  %v13004_v28 = vld [vmem:[#allocation21_spill] sm:$0xff]  ;;  %v13013_v49 = vld [vmem:[#allocation30_spill] sm:$0xff] }
 0x67b   :  { %4124 = vmatpush1.bf16.msra.mxu0 %v11371_v39  ;;  %4165 = vmatpush1.bf16.msra.mxu1 %v11399_v51  ;;  %v13005_v39 = vld [vmem:[#allocation17_spill] sm:$0xff]  ;;  %v13015_v51 = vld [vmem:[#allocation32_spill] sm:$0xff] }
 0x67c   :  { %4125 = vmatprep.subr.bf16.mxu0 %v11374_v40  ;;  %4166 = vmatprep.subr.bf16.mxu1 %v11407_v58  ;;  %v13006_v40 = vld [vmem:[#allocation22_spill] sm:$0xff]  ;;  %v13017_v58 = vld [vmem:[#allocation33_spill] sm:$0xff] }
 0x67f   :  { %4126 = vmatpush1.bf16.msra.mxu0 %v11377_v42  ;;  %4167 = vmatpush1.bf16.msra.mxu1 %v11411_v60  ;;  %v13007_v42 = vld [vmem:[#allocation26_spill] sm:$0xff] }
 0x680   :  { %4127 = vmatprep.subr.bf16.mxu0 %v11381_v43  ;;  %4168 = vmatprep.subr.bf16.mxu1 %v11419_v55  ;;  %v13008_v43 = vld [vmem:[#allocation25_spill] sm:$0xff]  ;;  %v13019_v60 = vld [vmem:[#allocation34_spill] sm:$0xff] }
 0x681   :  { %v11629_v55 = vld [vmem:[#allocation5 + $0x204] ss:$16 sps:$4 sm:$0xff]  }
 0x683   :  { %4128 = vmatpush1.bf16.msra.mxu0 %v11385_v45  ;;  %4169 = vmatpush1.bf16.msra.mxu1 %v11423_v2  ;;  %v13010_v45 = vld [vmem:[#allocation35_spill] sm:$0xff]  ;;  %v3256_v2 = vld [vmem:[%s12687_s2] sm:$0xf] }
 0x684   :  { %4129 = vmatprep.subr.bf16.mxu0 %v11393_v48  ;;  %4170 = vmatprep.subr.bf16.mxu1 %v11431_v4  ;;  %v13012_v48 = vld [vmem:[#allocation27_spill] sm:$0xff]  ;;  %v3269_v61 = vrot.slane %v3256_v2, %v10933_v21  ;;  %v11826_v21 = vld [vmem:[#allocation5 + $0x3e4] ss:$16 sps:$4 sm:$0xff]  }
 0x687   :  { %4130 = vmatpush1.bf16.msra.mxu0 %v11397_v50  ;;  %4171 = vmatpush1.bf16.msra.mxu1 %v11435_v8  ;;  %v13014_v50 = vld [vmem:[#allocation36_spill] sm:$0xff] }
 0x688   :  { %4131 = vmatprep.subr.bf16.mxu0 %v11405_v57  ;;  %4172 = vmatprep.subr.bf16.mxu1 %v11443_v13  ;;  %v13016_v57 = vld [vmem:[#allocation29_spill] sm:$0xff] }
 0x68b   :  { %4132 = vmatpush1.bf16.msra.mxu0 %v11409_v0  ;;  %4173 = vmatpush1.bf16.msra.mxu1 %v11447_v17  ;;  %v13018_v0 = vld [vmem:[#allocation37_spill] sm:$0xff] }
 0x68c   :  { %4133 = vmatprep.subr.bf16.mxu0 %v11417_v54  ;;  %4174 = vmatprep.subr.bf16.mxu1 %v11455_v59  ;;  %v13020_v54 = vld [vmem:[#allocation31_spill] sm:$0xff]  ;;  %13043 = vst [vmem:[#allocation37_spill] sm:$0xff] %v11820_v10 }
 0x68d   :  { %13045 = vst [vmem:[#allocation31_spill] sm:$0xff] %v11826_v21 }
 0x68f   :  { %4134 = vmatpush1.bf16.msra.mxu0 %v11421_v62  ;;  %4175 = vmatpush1.bf16.msra.mxu1 %v11459_v46  ;;  %v11631_v62 = vld [vmem:[#allocation5 + $0x20c] ss:$16 sps:$4 sm:$0xff]  }
 0x690   :  { %4135 = vmatprep.subr.bf16.mxu0 %v11429_v3  ;;  %4176 = vmatprep.subr.bf16.mxu1 %v11467_v29  ;;  %v13021_v3 = vld [vmem:[#allocation8_spill] sm:$0xff] }
 0x691   :  { %v3261_v4 = vrot.slane %v3256_v2, %v13021_v3  ;;  %v11834_v3 = vld [vmem:[#allocation5 + $0x3e8] ss:$16 sps:$4 sm:$0xff]  }
 0x692   :  { %13048 = vst [vmem:[#allocation42_spill] sm:$0xff] %v11834_v3 }
 0x693   :  { %4136 = vmatpush1.bf16.msra.mxu0 %v11433_v6  ;;  %4177 = vmatpush1.bf16.msra.mxu1 %v11471_v32  ;;  %v13022_v6 = vld [vmem:[#allocation9_spill] sm:$0xff] }
 0x694   :  { %4137 = vmatprep.subr.bf16.mxu0 %v11441_v1  ;;  %4178 = vmatprep.subr.bf16.mxu1 %v11479_v22  ;;  %v3265_v8 = vrot.slane %v3256_v2, %v13022_v6  ;;  %v11832_v6 = vld [vmem:[#allocation5 + $0x3e0] ss:$16 sps:$4 sm:$0xff]  }
 0x695   :  { %13047 = vst [vmem:[#allocation41_spill] sm:$0xff] %v11832_v6 }
 0x697   :  { %4138 = vmatpush1.bf16.msra.mxu0 %v11445_v15  ;;  %4179 = vmatpush1.bf16.msra.mxu1 %v11483_v18  ;;  %v3273_v18 = vrot.slane %v3256_v2, %v10930_v11  ;;  %v11708_v2 = vld [vmem:[#allocation5 + $0x2ac] ss:$16 sps:$4 sm:$0xff]  }
 0x698   :  { %4139 = vmatprep.subr.bf16.mxu0 %v11453_v19  ;;  %4180 = vmatprep.subr.bf16.mxu1 %v11495_v31  ;;  %v11828_v11 = vld [vmem:[#allocation5 + $0x3ec] ss:$16 sps:$4 sm:$0xff]  }
 0x699   :  { %13046 = vst [vmem:[#allocation40_spill] sm:$0xff] %v11828_v11 }
 0x69b   :  { %4140 = vmatpush1.bf16.msra.mxu0 %v12999_v16  ;;  %4181 = vmatpush1.bf16.msra.mxu1 %v13000_v36 }
 0x69c   :  { %4141 = vmatprep.subr.bf16.mxu0 %v13001_v37  ;;  %4182 = vmatprep.subr.bf16.mxu1 %v13002_v38  ;;  %v9639_v37 = vcombine.high %v11559_v56, %v11559_v56  ;;  %v11662_v56 = vld [vmem:[#allocation5 + $0x220] ss:$16 sps:$4 sm:$0xff]  }
 0x69f   :  { %4142 = vmatpush1.bf16.msra.mxu0 %v13003_v25  ;;  %4183 = vmatpush1.bf16.msra.mxu1 %v13004_v28  ;;  %v11650_v25 = vld [vmem:[#allocation5 + $0x200] ss:$16 sps:$4 sm:$0xff]   ;;  %v11652_v28 = vld [vmem:[#allocation5 + $0x208] ss:$16 sps:$4 sm:$0xff]  }
 0x6a0   :  { %4143 = vmatprep.subr.bf16.mxu0 %v13005_v39  ;;  %4184 = vmatprep.subr.bf16.mxu1 %v13006_v40  ;;  %v11654_v39 = vld [vmem:[#allocation5 + $0x224] ss:$16 sps:$4 sm:$0xff]   ;;  %v11664_v40 = vld [vmem:[#allocation5 + $0x228] ss:$16 sps:$4 sm:$0xff]  }
 0x6a3   :  { %4144 = vmatpush1.bf16.msra.mxu0 %v13007_v42  ;;  %4185 = vmatpush1.bf16.msra.mxu1 %v13008_v43  ;;  %v11668_v42 = vld [vmem:[#allocation5 + $0x244] ss:$16 sps:$4 sm:$0xff]   ;;  %v11670_v43 = vld [vmem:[#allocation5 + $0x24c] ss:$16 sps:$4 sm:$0xff]  }
 0x6a4   :  { %4145 = vmatprep.subr.bf16.mxu0 %v13009_v44  ;;  %4186 = vmatprep.subr.bf16.mxu1 %v13010_v45  ;;  %v13025_v44 = vmov 0.0|0.0   ;;  %v11676_v45 = vld [vmem:[#allocation5 + $0x240] ss:$16 sps:$4 sm:$0xff]  }
 0x6a7   :  { %4146 = vmatpush1.bf16.msra.mxu0 %v13011_v47  ;;  %4187 = vmatpush1.bf16.msra.mxu1 %v13012_v48  ;;  %v11678_v47 = vld [vmem:[#allocation5 + $0x248] ss:$16 sps:$4 sm:$0xff]   ;;  %v11682_v48 = vld [vmem:[#allocation5 + $0x264] ss:$16 sps:$4 sm:$0xff]  }
 0x6a8   :  { %4147 = vmatprep.subr.bf16.mxu0 %v13013_v49  ;;  %4188 = vmatprep.subr.bf16.mxu1 %v13014_v50  ;;  %v11684_v49 = vld [vmem:[#allocation5 + $0x26c] ss:$16 sps:$4 sm:$0xff]   ;;  %v11688_v50 = vld [vmem:[#allocation5 + $0x260] ss:$16 sps:$4 sm:$0xff]  }
 0x6ab   :  { %4148 = vmatpush1.bf16.msra.mxu0 %v13015_v51  ;;  %4189 = vmatpush1.bf16.msra.mxu1 %v13016_v57  ;;  %v11690_v51 = vld [vmem:[#allocation5 + $0x268] ss:$16 sps:$4 sm:$0xff]   ;;  %v11694_v57 = vld [vmem:[#allocation5 + $0x284] ss:$16 sps:$4 sm:$0xff]  }
 0x6ac   :  { %4149 = vmatprep.subr.bf16.mxu0 %v13017_v58  ;;  %4190 = vmatprep.subr.bf16.mxu1 %v13018_v0  ;;  %v11696_v58 = vld [vmem:[#allocation5 + $0x28c] ss:$16 sps:$4 sm:$0xff]   ;;  %v11700_v0 = vld [vmem:[#allocation5 + $0x280] ss:$16 sps:$4 sm:$0xff]  }
 0x6af   :  { %4150 = vmatpush1.bf16.msra.mxu0 %v13019_v60  ;;  %4191 = vmatpush1.bf16.msra.mxu1 %v13020_v54  ;;  %v11702_v60 = vld [vmem:[#allocation5 + $0x288] ss:$16 sps:$4 sm:$0xff]   ;;  %v11706_v54 = vld [vmem:[#allocation5 + $0x2a4] ss:$16 sps:$4 sm:$0xff]  }
 0x6b0   :  { %4643 = vmatprep.subr.bf16.mxu0 %v11629_v55  ;;  %4684 = vmatprep.subr.bf16.mxu1 %v11631_v62 }
 0x745   :  { %v3632_v1 = vpop.f32.mrb[24].mxu0  ;;  %v3673_v13 = vpop.f32.mrb[24].mxu1 }
 0x746   :  { %v3633_v15 = vadd.f32 %v3632_v1, %v3261_v4  ;;  %v3634_v17 = vpop.f32.mrb[25].mxu0  ;;  %v3675_v19 = vpop.f32.mrb[25].mxu1  ;;  %v3674_v5 = vadd.f32 %v3673_v13, %v3269_v61  ;;  %v11712_v4 = vld [vmem:[#allocation5 + $0x2a0] ss:$16 sps:$4 sm:$0xff]   ;;  %v11718_v1 = vld [vmem:[#allocation5 + $0x2c4] ss:$16 sps:$4 sm:$0xff]  }
 0x747   :  { %v3635_v59 = vadd.f32 %v3634_v17, %v3265_v8  ;;  %v3636_v46 = vpop.f32.mrb[26].mxu0  ;;  %v3677_v29 = vpop.f32.mrb[26].mxu1  ;;  %v3676_v34 = vadd.f32 %v3675_v19, %v3273_v18  ;;  %v11714_v8 = vld [vmem:[#allocation5 + $0x2a8] ss:$16 sps:$4 sm:$0xff]   ;;  %v11720_v13 = vld [vmem:[#allocation5 + $0x2cc] ss:$16 sps:$4 sm:$0xff]  }
 0x748   :  { %v8990_v32 = vmul.f32 -1.442695, %v3633_v15  ;;  %v3637_v22 = vpop.f32.mrb[27].mxu0  ;;  %v3678_v31 = vpop.f32.mrb[27].mxu1  ;;  %v11724_v15 = vld [vmem:[#allocation5 + $0x2c0] ss:$16 sps:$4 sm:$0xff]  }
 0x749   :  { %v8991_v41 = vmul.f32 -1.442695, %v3635_v59  ;;  %v8992_v63 = vmul.f32 -1.442695, %v3676_v34  ;;  %v11726_v17 = vld [vmem:[#allocation5 + $0x2c8] ss:$16 sps:$4 sm:$0xff]  }
 0x74a   :  { %10363 = vpow2.f32 %v8990_v32  ;;  %v11730_v19 = vld [vmem:[#allocation5 + $0x2e4] ss:$16 sps:$4 sm:$0xff]   ;;  %v11732_v59 = vld [vmem:[#allocation5 + $0x2ec] ss:$16 sps:$4 sm:$0xff]   ;;  %v11736_v46 = vld [vmem:[#allocation5 + $0x2e0] ss:$16 sps:$4 sm:$0xff]  }
 0x74b   :  { %10365 = vpow2.f32 %v8991_v41  ;;  %v11738_v29 = vld [vmem:[#allocation5 + $0x2e8] ss:$16 sps:$4 sm:$0xff]   ;;  %v11742_v32 = vld [vmem:[#allocation5 + $0x304] ss:$16 sps:$4 sm:$0xff]   ;;  %v11744_v22 = vld [vmem:[#allocation5 + $0x30c] ss:$16 sps:$4 sm:$0xff]  }
 0x74c   :  { %10367 = vpow2.f32 %v8992_v63  ;;  %v11748_v18 = vld [vmem:[#allocation5 + $0x300] ss:$16 sps:$4 sm:$0xff]   ;;  %v11750_v31 = vld [vmem:[#allocation5 + $0x308] ss:$16 sps:$4 sm:$0xff]   ;;  %v11754_v41 = vld [vmem:[#allocation5 + $0x324] ss:$16 sps:$4 sm:$0xff]  }
 0x74d   :  { %10369 = vtanh.f32 %v3674_v5  ;;  %v11756_v34 = vld [vmem:[#allocation5 + $0x32c] ss:$16 sps:$4 sm:$0xff]   ;;  %v11760_v61 = vld [vmem:[#allocation5 + $0x320] ss:$16 sps:$4 sm:$0xff]   ;;  %v11762_v63 = vld [vmem:[#allocation5 + $0x328] ss:$16 sps:$4 sm:$0xff]  }
 0x74e   :  { %v11766_v5 = vld [vmem:[#allocation5 + $0x344] ss:$16 sps:$4 sm:$0xff]  }
 0x754   :  { %v10364_v24 = vpop.eup %10363 }
 0x755   :  { %v10366_v7 = vpop.eup %10365  ;;  %v3683_v35 = vadd.f32 1.0, %v10364_v24  ;;  %v11768_v24 = vld [vmem:[#allocation5 + $0x34c] ss:$16 sps:$4 sm:$0xff]  }
 0x756   :  { %v3689_v30 = vadd.f32 1.0, %v10366_v7  ;;  %v10368_v12 = vpop.eup %10367  ;;  %13026 = vst [vmem:[#allocation16_spill] sm:$0xff] %v11768_v24  ;;  %v11772_v7 = vld [vmem:[#allocation5 + $0x340] ss:$16 sps:$4 sm:$0xff]  }
 0x757   :  { %10371 = vrcp.f32 %v3683_v35  ;;  %v10370_v27 = vpop.eup %10369  ;;  %v3696_v14 = vadd.f32 1.0, %v10368_v12  ;;  %13027 = vst [vmem:[#allocation20_spill] sm:$0xff] %v11772_v7  ;;  %v11774_v35 = vld [vmem:[#allocation5 + $0x348] ss:$16 sps:$4 sm:$0xff]   ;;  %v11780_v12 = vld [vmem:[#allocation5 + $0x36c] ss:$16 sps:$4 sm:$0xff]  }
 0x758   :  { %10373 = vrcp.f32 %v3689_v30  ;;  %13028 = vst [vmem:[#allocation23_spill] sm:$0xff] %v11774_v35  ;;  %v11778_v30 = vld [vmem:[#allocation5 + $0x364] ss:$16 sps:$4 sm:$0xff]   ;;  %13030 = vst [vmem:[#allocation17_spill] sm:$0xff] %v11780_v12 }
 0x759   :  { %10375 = vrcp.f32 %v3696_v14  ;;  %13029 = vst [vmem:[#allocation21_spill] sm:$0xff] %v11778_v30  ;;  %v11790_v14 = vld [vmem:[#allocation5 + $0x384] ss:$16 sps:$4 sm:$0xff]  }
 0x75a   :  { %13033 = vst [vmem:[#allocation25_spill] sm:$0xff] %v11790_v14 }
 0x761   :  { %v10372_v33 = vpop.eup %10371 }
 0x762   :  { %v10374_v20 = vpop.eup %10373  ;;  %v3700_v53 = vmul.f32 %v10372_v33, %v10370_v27  ;;  %v11784_v27 = vld [vmem:[#allocation5 + $0x360] ss:$16 sps:$4 sm:$0xff]   ;;  %v11786_v33 = vld [vmem:[#allocation5 + $0x368] ss:$16 sps:$4 sm:$0xff]  }
 0x763   :  { %v3699_v26 = vmul.f32 %v10374_v20, %v11553_v23  ;;  %v10376_v9 = vpop.eup %10375  ;;  %v11656_v23 = vld [vmem:[#allocation5 + $0x22c] ss:$16 sps:$4 sm:$0xff]   ;;  %13031 = vst [vmem:[#allocation22_spill] sm:$0xff] %v11784_v27  ;;  %13032 = vst [vmem:[#allocation26_spill] sm:$0xff] %v11786_v33 }
 0x764   :  { %v11792_v20 = vld [vmem:[#allocation5 + $0x38c] ss:$16 sps:$4 sm:$0xff]  }
 0x765   :  { %v11643_v52 = vadd.f32 %v3700_v53, %v3699_v26  ;;  %13034 = vst [vmem:[#allocation18_spill] sm:$0xff] %v11792_v20  ;;  %v11796_v53 = vld [vmem:[#allocation5 + $0x380] ss:$16 sps:$4 sm:$0xff]   ;;  %v11798_v26 = vld [vmem:[#allocation5 + $0x388] ss:$16 sps:$4 sm:$0xff]  }
 0x766   :  { %13035 = vst [vmem:[#allocation35_spill] sm:$0xff] %v11796_v53  ;;  %13036 = vst [vmem:[#allocation28_spill] sm:$0xff] %v11798_v26 }
 0x767   :  { %13023 = vst [vmem:[#allocation14_spill] sm:$0xff] %v11643_v52  ;;  %10377 = vtanh.f32 %v11643_v52  ;;  %v11822_v52 = vld [vmem:[#allocation5 + $0x3c8] ss:$16 sps:$4 sm:$0xff]  }
 0x768   :  { %13044 = vst [vmem:[#allocation34_spill] sm:$0xff] %v11822_v52 }
 0x771   :  { %v10378_v16 = vpop.eup %10377 }
 0x772   :  { %v3703_v36 = vmul.f32 %v10378_v16, %v10376_v9  ;;  %v11802_v9 = vld [vmem:[#allocation5 + $0x3a4] ss:$16 sps:$4 sm:$0xff]   ;;  %v11804_v16 = vld [vmem:[#allocation5 + $0x3ac] ss:$16 sps:$4 sm:$0xff]  }
 0x773   :  { %13037 = vst [vmem:[#allocation27_spill] sm:$0xff] %v11802_v9  ;;  %13038 = vst [vmem:[#allocation30_spill] sm:$0xff] %v11804_v16 }
 0x774   :  { %v11648_v38 = vpack.c.bf16 %v3703_v36, %v3703_v36  ;;  %v11808_v36 = vld [vmem:[#allocation5 + $0x3a0] ss:$16 sps:$4 sm:$0xff]  }
 0x775   :  { %13039 = vst [vmem:[#allocation36_spill] sm:$0xff] %v11808_v36 }
 0x776   :  { %13024 = vst [vmem:[#allocation19_spill] sm:$0xff] %v11648_v38  ;;  %4151 = vmatprep.mubr.bf16.mxu0 %v11648_v38  ;;  %4192 = vmatprep.mubr.bf16.mxu1 %v11648_v38  ;;  %v11816_v38 = vld [vmem:[#allocation5 + $0x3cc] ss:$16 sps:$4 sm:$0xff]  }
 0x777   :  { %4152 = vmatmul.mubr.bf16.vlgmr.msra.gmra.mrb[28].mxu0 %v9639_v37  ;;  %4193 = vmatmul.mubr.bf16.vlgmr.msra.gmra.mrb[28].mxu1 %v9639_v37  ;;  %v11810_v37 = vld [vmem:[#allocation5 + $0x3a8] ss:$16 sps:$4 sm:$0xff]   ;;  %13042 = vst [vmem:[#allocation33_spill] sm:$0xff] %v11816_v38 }
 0x778   :  { %4644 = vmatpush1.bf16.msra.mxu0 %v11650_v25  ;;  %4685 = vmatpush1.bf16.msra.mxu1 %v11652_v28  ;;  %13040 = vst [vmem:[#allocation32_spill] sm:$0xff] %v11810_v37 }
 0x779   :  { %4645 = vmatprep.subr.bf16.mxu0 %v11654_v39  ;;  %4686 = vmatprep.subr.bf16.mxu1 %v11656_v23 }
 0x77a   :  { %4675 = vmatprep.mubr.bf16.mxu0 %v13025_v44  ;;  %4716 = vmatprep.mubr.bf16.mxu1 %v13025_v44  ;;  %v11814_v44 = vld [vmem:[#allocation5 + $0x3c4] ss:$16 sps:$4 sm:$0xff]  }
 0x77b   :  { %13041 = vst [vmem:[#allocation29_spill] sm:$0xff] %v11814_v44 }
 0x77c   :  { %4646 = vmatpush1.bf16.msra.mxu0 %v11662_v56  ;;  %4687 = vmatpush1.bf16.msra.mxu1 %v11664_v40 }
 0x77d   :  { %4647 = vmatprep.subr.bf16.mxu0 %v11668_v42  ;;  %4688 = vmatprep.subr.bf16.mxu1 %v11670_v43 }
 0x780   :  { %4648 = vmatpush1.bf16.msra.mxu0 %v11676_v45  ;;  %4689 = vmatpush1.bf16.msra.mxu1 %v11678_v47 }
 0x781   :  { %4649 = vmatprep.subr.bf16.mxu0 %v11682_v48  ;;  %4690 = vmatprep.subr.bf16.mxu1 %v11684_v49 }
 0x784   :  { %4650 = vmatpush1.bf16.msra.mxu0 %v11688_v50  ;;  %4691 = vmatpush1.bf16.msra.mxu1 %v11690_v51 }
 0x785   :  { %4651 = vmatprep.subr.bf16.mxu0 %v11694_v57  ;;  %4692 = vmatprep.subr.bf16.mxu1 %v11696_v58 }
 0x788   :  { %4652 = vmatpush1.bf16.msra.mxu0 %v11700_v0  ;;  %4693 = vmatpush1.bf16.msra.mxu1 %v11702_v60 }
 0x789   :  { %4653 = vmatprep.subr.bf16.mxu0 %v11706_v54  ;;  %4694 = vmatprep.subr.bf16.mxu1 %v11708_v2 }
 0x78c   :  { %4654 = vmatpush1.bf16.msra.mxu0 %v11712_v4  ;;  %4695 = vmatpush1.bf16.msra.mxu1 %v11714_v8 }
 0x78d   :  { %4655 = vmatprep.subr.bf16.mxu0 %v11718_v1  ;;  %4696 = vmatprep.subr.bf16.mxu1 %v11720_v13 }
 0x790   :  { %4656 = vmatpush1.bf16.msra.mxu0 %v11724_v15  ;;  %4697 = vmatpush1.bf16.msra.mxu1 %v11726_v17 }
 0x791   :  { %4657 = vmatprep.subr.bf16.mxu0 %v11730_v19  ;;  %4698 = vmatprep.subr.bf16.mxu1 %v11732_v59 }
 0x794   :  { %4658 = vmatpush1.bf16.msra.mxu0 %v11736_v46  ;;  %4699 = vmatpush1.bf16.msra.mxu1 %v11738_v29 }
 0x795   :  { %4659 = vmatprep.subr.bf16.mxu0 %v11742_v32  ;;  %4700 = vmatprep.subr.bf16.mxu1 %v11744_v22 }
 0x798   :  { %4660 = vmatpush1.bf16.msra.mxu0 %v11748_v18  ;;  %4701 = vmatpush1.bf16.msra.mxu1 %v11750_v31 }
 0x799   :  { %4661 = vmatprep.subr.bf16.mxu0 %v11754_v41  ;;  %4702 = vmatprep.subr.bf16.mxu1 %v11756_v34 }
 0x79c   :  { %4662 = vmatpush1.bf16.msra.mxu0 %v11760_v61  ;;  %4703 = vmatpush1.bf16.msra.mxu1 %v11762_v63 }
 0x79d   :  { %4663 = vmatprep.subr.bf16.mxu0 %v11766_v5  ;;  %4704 = vmatprep.subr.bf16.mxu1 %v11768_v24 }
 0x7a0   :  { %4664 = vmatpush1.bf16.msra.mxu0 %v11772_v7  ;;  %4705 = vmatpush1.bf16.msra.mxu1 %v11774_v35 }
 0x7a1   :  { %4665 = vmatprep.subr.bf16.mxu0 %v11778_v30  ;;  %4706 = vmatprep.subr.bf16.mxu1 %v11780_v12 }
 0x7a4   :  { %4666 = vmatpush1.bf16.msra.mxu0 %v11784_v27  ;;  %4707 = vmatpush1.bf16.msra.mxu1 %v11786_v33 }
 0x7a5   :  { %4667 = vmatprep.subr.bf16.mxu0 %v11790_v14  ;;  %4708 = vmatprep.subr.bf16.mxu1 %v11792_v20 }
 0x7a8   :  { %4668 = vmatpush1.bf16.msra.mxu0 %v11796_v53  ;;  %4709 = vmatpush1.bf16.msra.mxu1 %v11798_v26 }
 0x7a9   :  { %4669 = vmatprep.subr.bf16.mxu0 %v11802_v9  ;;  %4710 = vmatprep.subr.bf16.mxu1 %v11804_v16 }
 0x7ac   :  { %4670 = vmatpush1.bf16.msra.mxu0 %v11808_v36  ;;  %4711 = vmatpush1.bf16.msra.mxu1 %v11810_v37 }
 0x7ad   :  { %4671 = vmatprep.subr.bf16.mxu0 %v11814_v44  ;;  %4712 = vmatprep.subr.bf16.mxu1 %v11816_v38  ;;  %v13049_v38 = vld [vmem:[#allocation12_spill] sm:$0xff] }
 0x7b0   :  { %4672 = vmatpush1.bf16.msra.mxu0 %v11820_v10  ;;  %4713 = vmatpush1.bf16.msra.mxu1 %v11822_v52 }
 0x7b1   :  { %4673 = vmatprep.subr.bf16.mxu0 %v11826_v21  ;;  %4714 = vmatprep.subr.bf16.mxu1 %v11828_v11 }
 0x7b4   :  { %4674 = vmatpush1.bf16.msra.mxu0 %v11832_v6  ;;  %4715 = vmatpush1.bf16.msra.mxu1 %v11834_v3 }
 0x7b5   :  { %5163 = vmatprep.subr.bf16.mxu0 %v11629_v55  ;;  %5204 = vmatprep.subr.bf16.mxu1 %v11631_v62 }
 0x7b7   :  { %4676 = vmatmul.mubr.bf16.vlgmr.msra.gmra.mrb[32].mxu0 %v13049_v38  ;;  %4717 = vmatmul.mubr.bf16.vlgmr.msra.gmra.mrb[32].mxu1 %v13049_v38  ;;  %v13050_v38 = vld [vmem:[#allocation33_spill] sm:$0xff] }
 0x7b8   :  { %5164 = vmatpush1.bf16.msra.mxu0 %v11650_v25  ;;  %5205 = vmatpush1.bf16.msra.mxu1 %v11652_v28 }
 0x7b9   :  { %5165 = vmatprep.subr.bf16.mxu0 %v11654_v39  ;;  %5206 = vmatprep.subr.bf16.mxu1 %v11656_v23 }
 0x7bc   :  { %5166 = vmatpush1.bf16.msra.mxu0 %v11662_v56  ;;  %5207 = vmatpush1.bf16.msra.mxu1 %v11664_v40 }
 0x7bd   :  { %5167 = vmatprep.subr.bf16.mxu0 %v11668_v42  ;;  %5208 = vmatprep.subr.bf16.mxu1 %v11670_v43 }
 0x7c0   :  { %5168 = vmatpush1.bf16.msra.mxu0 %v11676_v45  ;;  %5209 = vmatpush1.bf16.msra.mxu1 %v11678_v47 }
 0x7c1   :  { %5169 = vmatprep.subr.bf16.mxu0 %v11682_v48  ;;  %5210 = vmatprep.subr.bf16.mxu1 %v11684_v49 }
 0x7c4   :  { %5170 = vmatpush1.bf16.msra.mxu0 %v11688_v50  ;;  %5211 = vmatpush1.bf16.msra.mxu1 %v11690_v51 }
 0x7c5   :  { %5171 = vmatprep.subr.bf16.mxu0 %v11694_v57  ;;  %5212 = vmatprep.subr.bf16.mxu1 %v11696_v58 }
 0x7c8   :  { %5172 = vmatpush1.bf16.msra.mxu0 %v11700_v0  ;;  %5213 = vmatpush1.bf16.msra.mxu1 %v11702_v60 }
 0x7c9   :  { %5173 = vmatprep.subr.bf16.mxu0 %v11706_v54  ;;  %5214 = vmatprep.subr.bf16.mxu1 %v11708_v2 }
 0x7cc   :  { %5174 = vmatpush1.bf16.msra.mxu0 %v11712_v4  ;;  %5215 = vmatpush1.bf16.msra.mxu1 %v11714_v8 }
 0x7cd   :  { %5175 = vmatprep.subr.bf16.mxu0 %v11718_v1  ;;  %5216 = vmatprep.subr.bf16.mxu1 %v11720_v13 }
 0x7d0   :  { %5176 = vmatpush1.bf16.msra.mxu0 %v11724_v15  ;;  %5217 = vmatpush1.bf16.msra.mxu1 %v11726_v17 }
 0x7d1   :  { %5177 = vmatprep.subr.bf16.mxu0 %v11730_v19  ;;  %5218 = vmatprep.subr.bf16.mxu1 %v11732_v59 }
 0x7d4   :  { %5178 = vmatpush1.bf16.msra.mxu0 %v11736_v46  ;;  %5219 = vmatpush1.bf16.msra.mxu1 %v11738_v29 }
 0x7d5   :  { %5179 = vmatprep.subr.bf16.mxu0 %v11742_v32  ;;  %5220 = vmatprep.subr.bf16.mxu1 %v11744_v22 }
 0x7d8   :  { %5180 = vmatpush1.bf16.msra.mxu0 %v11748_v18  ;;  %5221 = vmatpush1.bf16.msra.mxu1 %v11750_v31 }
 0x7d9   :  { %5181 = vmatprep.subr.bf16.mxu0 %v11754_v41  ;;  %5222 = vmatprep.subr.bf16.mxu1 %v11756_v34 }
 0x7dc   :  { %5182 = vmatpush1.bf16.msra.mxu0 %v11760_v61  ;;  %5223 = vmatpush1.bf16.msra.mxu1 %v11762_v63 }
 0x7dd   :  { %5183 = vmatprep.subr.bf16.mxu0 %v11766_v5  ;;  %5224 = vmatprep.subr.bf16.mxu1 %v11768_v24 }
 0x7e0   :  { %5184 = vmatpush1.bf16.msra.mxu0 %v11772_v7  ;;  %5225 = vmatpush1.bf16.msra.mxu1 %v11774_v35 }
 0x7e1   :  { %5185 = vmatprep.subr.bf16.mxu0 %v11778_v30  ;;  %5226 = vmatprep.subr.bf16.mxu1 %v11780_v12  ;;  %v13054_v12 = vld [vmem:[#allocation11_spill] sm:$0xff] }
 0x7e4   :  { %5186 = vmatpush1.bf16.msra.mxu0 %v11784_v27  ;;  %5227 = vmatpush1.bf16.msra.mxu1 %v11786_v33 }
 0x7e5   :  { %5187 = vmatprep.subr.bf16.mxu0 %v11790_v14  ;;  %5228 = vmatprep.subr.bf16.mxu1 %v11792_v20  ;;  %v13053_v20 = vld [vmem:[#allocation10_spill] sm:$0xff] }
 0x7e8   :  { %5188 = vmatpush1.bf16.msra.mxu0 %v11796_v53  ;;  %5229 = vmatpush1.bf16.msra.mxu1 %v11798_v26 }
 0x7e9   :  { %5189 = vmatprep.subr.bf16.mxu0 %v11802_v9  ;;  %5230 = vmatprep.subr.bf16.mxu1 %v11804_v16 }
 0x7ec   :  { %5190 = vmatpush1.bf16.msra.mxu0 %v11808_v36  ;;  %5231 = vmatpush1.bf16.msra.mxu1 %v11810_v37  ;;  %v13052_v37 = vld [vmem:[#allocation9_spill] sm:$0xff] }
 0x7ed   :  { %5191 = vmatprep.subr.bf16.mxu0 %v11814_v44  ;;  %5232 = vmatprep.subr.bf16.mxu1 %v13050_v38  ;;  %v3777_v38 = vld [vmem:[%s12687_s2] sm:$0xf] }
 0x7ee   :  { %v13051_v44 = vld [vmem:[#allocation8_spill] sm:$0xff]  ;;  %v3790_v30 = vrot.slane %v3777_v38, %v13054_v12 }
 0x7f0   :  { %5192 = vmatpush1.bf16.msra.mxu0 %v11820_v10  ;;  %5233 = vmatpush1.bf16.msra.mxu1 %v11822_v52  ;;  %v3782_v10 = vrot.slane %v3777_v38, %v13051_v44  ;;  %v3786_v52 = vrot.slane %v3777_v38, %v13052_v37 }
 0x7f1   :  { %5193 = vmatprep.subr.bf16.mxu0 %v11826_v21  ;;  %5234 = vmatprep.subr.bf16.mxu1 %v11828_v11 }
 0x7f4   :  { %5194 = vmatpush1.bf16.msra.mxu0 %v11832_v6  ;;  %5235 = vmatpush1.bf16.msra.mxu1 %v11834_v3 }
 0x7f5   :  { %5683 = vmatprep.subr.bf16.mxu0 %v11629_v55  ;;  %5724 = vmatprep.subr.bf16.mxu1 %v11631_v62  ;;  %v3794_v62 = vrot.slane %v3777_v38, %v13053_v20 }
 0x84a   :  { %v4153_v36 = vpop.f32.mrb[28].mxu0  ;;  %v4194_v21 = vpop.f32.mrb[28].mxu1 }
 0x84b   :  { %v4154_v16 = vadd.f32 %v4153_v36, %v3782_v10  ;;  %v4155_v11 = vpop.f32.mrb[29].mxu0  ;;  %v4196_v9 = vpop.f32.mrb[29].mxu1  ;;  %v4195_v7 = vadd.f32 %v4194_v21, %v3790_v30 }
 0x84c   :  { %v4156_v6 = vadd.f32 %v4155_v11, %v3786_v52  ;;  %v4157_v26 = vpop.f32.mrb[30].mxu0  ;;  %v4198_v3 = vpop.f32.mrb[30].mxu1  ;;  %v4197_v27 = vadd.f32 %v4196_v9, %v3794_v62 }
 0x84d   :  { %v9057_v53 = vmul.f32 -1.442695, %v4154_v16  ;;  %v4158_v55 = vpop.f32.mrb[31].mxu0  ;;  %v4199_v14 = vpop.f32.mrb[31].mxu1 }
 0x84e   :  { %v9058_v33 = vmul.f32 -1.442695, %v4156_v6  ;;  %v9059_v35 = vmul.f32 -1.442695, %v4197_v27 }
 0x84f   :  { %10379 = vpow2.f32 %v9057_v53 }
 0x850   :  { %10381 = vpow2.f32 %v9058_v33  ;;  %v13055_v33 = vld [vmem:[#allocation14_spill] sm:$0xff] }
 0x851   :  { %10383 = vpow2.f32 %v9059_v35 }
 0x852   :  { %10385 = vtanh.f32 %v4195_v7 }
 0x859   :  { %v10380_v24 = vpop.eup %10379 }
 0x85a   :  { %v10382_v10 = vpop.eup %10381  ;;  %v4204_v36 = vadd.f32 1.0, %v10380_v24  ;;  %v9060_v24 = vld [vmem:[%s12687_s2 + $0x4] sm:$0xf] }
 0x85b   :  { %v4210_v11 = vadd.f32 1.0, %v10382_v10  ;;  %v10384_v3 = vpop.eup %10383  ;;  %v4306_v7 = vrot.slane %v9060_v24, %v13051_v44  ;;  %v4310_v27 = vrot.slane %v9060_v24, %v13052_v37 }
 0x85c   :  { %10387 = vrcp.f32 %v4204_v36  ;;  %v10386_v52 = vpop.eup %10385  ;;  %v4217_v14 = vadd.f32 1.0, %v10384_v3 }
 0x85d   :  { %10389 = vrcp.f32 %v4210_v11 }
 0x85e   :  { %10391 = vrcp.f32 %v4217_v14 }
 0x866   :  { %v10388_v26 = vpop.eup %10387 }
 0x867   :  { %v10390_v6 = vpop.eup %10389  ;;  %v4221_v53 = vmul.f32 %v10388_v26, %v10386_v52 }
 0x868   :  { %v4220_v9 = vmul.f32 %v10390_v6, %v13055_v33  ;;  %v10392_v21 = vpop.eup %10391  ;;  %v4318_v33 = vrot.slane %v9060_v24, %v13053_v20 }
 0x86a   :  { %v4222_v16 = vadd.f32 %v4221_v53, %v4220_v9 }
 0x86c   :  { %10393 = vtanh.f32 %v4222_v16  ;;  %v4314_v16 = vrot.slane %v9060_v24, %v13054_v12 }
 0x876   :  { %v10394_v30 = vpop.eup %10393 }
 0x877   :  { %v11916_v35 = vmul.f32 %v10394_v30, %v10392_v21 }
 0x879   :  { %13056 = vst [vmem:[#allocation12_spill] sm:$0xff] %v11916_v35 }
 0x88a   :  { %v4677_v38 = vpop.f32.mrb[32].mxu0  ;;  %v4718_v55 = vpop.f32.mrb[32].mxu1 }
 0x88b   :  { %v4678_v62 = vadd.f32 %v4677_v38, %v4306_v7  ;;  %v4679_v10 = vpop.f32.mrb[33].mxu0  ;;  %v4720_v36 = vpop.f32.mrb[33].mxu1  ;;  %v4719_v30 = vadd.f32 %v4718_v55, %v4314_v16 }
 0x88c   :  { %v4680_v11 = vadd.f32 %v4679_v10, %v4310_v27  ;;  %v4681_v3 = vpop.f32.mrb[34].mxu0  ;;  %v4722_v52 = vpop.f32.mrb[34].mxu1  ;;  %v4721_v9 = vadd.f32 %v4720_v36, %v4318_v33 }
 0x88d   :  { %v9125_v26 = vmul.f32 -1.442695, %v4678_v62  ;;  %v4682_v14 = vpop.f32.mrb[35].mxu0  ;;  %v4723_v6 = vpop.f32.mrb[35].mxu1 }
 0x88e   :  { %v9126_v53 = vmul.f32 -1.442695, %v4680_v11  ;;  %v9127_v21 = vmul.f32 -1.442695, %v4721_v9 }
 0x88f   :  { %10395 = vpow2.f32 %v9125_v26 }
 0x890   :  { %10397 = vpow2.f32 %v9126_v53  ;;  %v13057_v53 = vld [vmem:[#allocation15_spill] sm:$0xff] }
 0x891   :  { %10399 = vpow2.f32 %v9127_v21 }
 0x892   :  { %10401 = vtanh.f32 %v4719_v30 }
 0x899   :  { %v10396_v35 = vpop.eup %10395 }
 0x89a   :  { %v10398_v7 = vpop.eup %10397  ;;  %v4728_v38 = vadd.f32 1.0, %v10396_v35 }
 0x89b   :  { %v4734_v27 = vadd.f32 1.0, %v10398_v7  ;;  %v10400_v62 = vpop.eup %10399 }
 0x89c   :  { %10403 = vrcp.f32 %v4728_v38  ;;  %v10402_v10 = vpop.eup %10401  ;;  %v4741_v26 = vadd.f32 1.0, %v10400_v62 }
 0x89d   :  { %10405 = vrcp.f32 %v4734_v27 }
 0x89e   :  { %10407 = vrcp.f32 %v4741_v26 }
 0x8a6   :  { %v10404_v11 = vpop.eup %10403 }
 0x8a7   :  { %v10406_v3 = vpop.eup %10405  ;;  %v4745_v52 = vmul.f32 %v10404_v11, %v10402_v10 }
 0x8a8   :  { %v4744_v14 = vmul.f32 0.0, %v10406_v3  ;;  %v10408_v24 = vpop.eup %10407 }
 0x8aa   :  { %v11925_v36 = vadd.f32 %v4745_v52, %v4744_v14 }
 0x8ac   :  { %10409 = vtanh.f32 %v11925_v36 }
 0x8b6   :  { %v10410_v55 = vpop.eup %10409 }
 0x8b7   :  { %v4748_v35 = vmul.f32 %v10410_v55, %v10408_v24 }
 0x8b9   :  { %v4756_v6 = vpack.c.bf16 %v4748_v35, %v4748_v35 }
 0x8bb   :  { %5195 = vmatprep.mubr.bf16.mxu0 %v4756_v6  ;;  %5236 = vmatprep.mubr.bf16.mxu1 %v4756_v6 }
 0x8bc   :  { %5196 = vmatmul.mubr.bf16.vlgmr.msra.gmra.mrb[36].mxu0 %v13057_v53  ;;  %5237 = vmatmul.mubr.bf16.vlgmr.msra.gmra.mrb[36].mxu1 %v13057_v53 }
 0x8bd   :  { %5684 = vmatpush1.bf16.msra.mxu0 %v11650_v25  ;;  %5725 = vmatpush1.bf16.msra.mxu1 %v11652_v28  ;;  %v13058_v25 = vld [vmem:[#allocation16_spill] sm:$0xff] }
 0x8be   :  { %5685 = vmatprep.subr.bf16.mxu0 %v11654_v39  ;;  %5726 = vmatprep.subr.bf16.mxu1 %v11656_v23  ;;  %v13059_v28 = vld [vmem:[#allocation20_spill] sm:$0xff]  ;;  %v13060_v39 = vld [vmem:[#allocation23_spill] sm:$0xff]  ;;  %v13061_v23 = vld [vmem:[#allocation21_spill] sm:$0xff] }
 0x8c1   :  { %5686 = vmatpush1.bf16.msra.mxu0 %v11662_v56  ;;  %5727 = vmatpush1.bf16.msra.mxu1 %v11664_v40  ;;  %v13062_v56 = vld [vmem:[#allocation17_spill] sm:$0xff]  ;;  %v13063_v40 = vld [vmem:[#allocation22_spill] sm:$0xff] }
 0x8c2   :  { %5687 = vmatprep.subr.bf16.mxu0 %v11668_v42  ;;  %5728 = vmatprep.subr.bf16.mxu1 %v11670_v43  ;;  %v13064_v42 = vld [vmem:[#allocation26_spill] sm:$0xff]  ;;  %v13065_v43 = vld [vmem:[#allocation25_spill] sm:$0xff] }
 0x8c5   :  { %5688 = vmatpush1.bf16.msra.mxu0 %v11676_v45  ;;  %5729 = vmatpush1.bf16.msra.mxu1 %v11678_v47  ;;  %v13066_v45 = vld [vmem:[#allocation18_spill] sm:$0xff]  ;;  %v13067_v47 = vld [vmem:[#allocation35_spill] sm:$0xff] }
 0x8c6   :  { %5689 = vmatprep.subr.bf16.mxu0 %v11682_v48  ;;  %5730 = vmatprep.subr.bf16.mxu1 %v11684_v49  ;;  %v13068_v48 = vld [vmem:[#allocation28_spill] sm:$0xff]  ;;  %v13069_v49 = vld [vmem:[#allocation27_spill] sm:$0xff] }
 0x8c9   :  { %5690 = vmatpush1.bf16.msra.mxu0 %v11688_v50  ;;  %5731 = vmatpush1.bf16.msra.mxu1 %v11690_v51  ;;  %v13070_v50 = vld [vmem:[#allocation30_spill] sm:$0xff]  ;;  %v13071_v51 = vld [vmem:[#allocation36_spill] sm:$0xff] }
 0x8ca   :  { %5691 = vmatprep.subr.bf16.mxu0 %v11694_v57  ;;  %5732 = vmatprep.subr.bf16.mxu1 %v11696_v58  ;;  %v13072_v57 = vld [vmem:[#allocation32_spill] sm:$0xff]  ;;  %v13073_v58 = vld [vmem:[#allocation29_spill] sm:$0xff] }
 0x8cd   :  { %5692 = vmatpush1.bf16.msra.mxu0 %v11700_v0  ;;  %5733 = vmatpush1.bf16.msra.mxu1 %v11702_v60  ;;  %v13074_v0 = vld [vmem:[#allocation33_spill] sm:$0xff] }
 0x8ce   :  { %5693 = vmatprep.subr.bf16.mxu0 %v11706_v54  ;;  %5734 = vmatprep.subr.bf16.mxu1 %v11708_v2  ;;  %v13075_v60 = vld [vmem:[#allocation37_spill] sm:$0xff]  ;;  %v13076_v54 = vld [vmem:[#allocation34_spill] sm:$0xff]  ;;  %v13077_v2 = vld [vmem:[#allocation31_spill] sm:$0xff] }
 0x8d1   :  { %5694 = vmatpush1.bf16.msra.mxu0 %v11712_v4  ;;  %5735 = vmatpush1.bf16.msra.mxu1 %v11714_v8  ;;  %v13078_v4 = vld [vmem:[#allocation40_spill] sm:$0xff]  ;;  %v13079_v8 = vld [vmem:[#allocation41_spill] sm:$0xff] }
 0x8d2   :  { %5695 = vmatprep.subr.bf16.mxu0 %v11718_v1  ;;  %5736 = vmatprep.subr.bf16.mxu1 %v11720_v13  ;;  %v13080_v1 = vld [vmem:[#allocation42_spill] sm:$0xff] }
 0x8d3   :  { %v11992_v13 = vld [vmem:[#allocation5 + $0x204] ss:$16 sps:$4 sm:$0xff]  }
 0x8d4   :  { %13081 = vst [vmem:[#allocation10_spill] sm:$0xff] %v11992_v13 }
 0x8d5   :  { %5696 = vmatpush1.bf16.msra.mxu0 %v11724_v15  ;;  %5737 = vmatpush1.bf16.msra.mxu1 %v11726_v17  ;;  %v11994_v15 = vld [vmem:[#allocation5 + $0x20c] ss:$16 sps:$4 sm:$0xff]   ;;  %v9128_v17 = vld [vmem:[%s12687_s2 + $0x4] sm:$0xf] }
 0x8d6   :  { %5697 = vmatprep.subr.bf16.mxu0 %v11730_v19  ;;  %5738 = vmatprep.subr.bf16.mxu1 %v11732_v59  ;;  %13082 = vst [vmem:[#allocation11_spill] sm:$0xff] %v11994_v15  ;;  %v4826_v19 = vrot.slane %v9128_v17, %v13051_v44  ;;  %v4830_v59 = vrot.slane %v9128_v17, %v13052_v37 }
 0x8d7   :  { %v4838_v9 = vrot.slane %v9128_v17, %v13053_v20  ;;  %v4834_v21 = vrot.slane %v9128_v17, %v13054_v12  ;;  %v12071_v17 = vld [vmem:[#allocation5 + $0x2a8] ss:$16 sps:$4 sm:$0xff]  }
 0x8d9   :  { %5698 = vmatpush1.bf16.msra.mxu0 %v11736_v46  ;;  %5739 = vmatpush1.bf16.msra.mxu1 %v11738_v29 }
 0x8da   :  { %5699 = vmatprep.subr.bf16.mxu0 %v11742_v32  ;;  %5740 = vmatprep.subr.bf16.mxu1 %v11744_v22 }
 0x8dd   :  { %5700 = vmatpush1.bf16.msra.mxu0 %v11748_v18  ;;  %5741 = vmatpush1.bf16.msra.mxu1 %v11750_v31 }
 0x8de   :  { %5701 = vmatprep.subr.bf16.mxu0 %v11754_v41  ;;  %5742 = vmatprep.subr.bf16.mxu1 %v11756_v34 }
 0x8e1   :  { %5702 = vmatpush1.bf16.msra.mxu0 %v11760_v61  ;;  %5743 = vmatpush1.bf16.msra.mxu1 %v11762_v63 }
 0x8e2   :  { %5703 = vmatprep.subr.bf16.mxu0 %v11766_v5  ;;  %5744 = vmatprep.subr.bf16.mxu1 %v13058_v25 }
 0x8e5   :  { %5704 = vmatpush1.bf16.msra.mxu0 %v13059_v28  ;;  %5745 = vmatpush1.bf16.msra.mxu1 %v13060_v39  ;;  %v12009_v39 = vld [vmem:[#allocation5 + $0x200] ss:$16 sps:$4 sm:$0xff]  }
 0x8e6   :  { %5705 = vmatprep.subr.bf16.mxu0 %v13061_v23  ;;  %5746 = vmatprep.subr.bf16.mxu1 %v13062_v56  ;;  %v12011_v23 = vld [vmem:[#allocation5 + $0x208] ss:$16 sps:$4 sm:$0xff]   ;;  %v12013_v56 = vld [vmem:[#allocation5 + $0x224] ss:$16 sps:$4 sm:$0xff]  }
 0x8e9   :  { %5706 = vmatpush1.bf16.msra.mxu0 %v13063_v40  ;;  %5747 = vmatpush1.bf16.msra.mxu1 %v13064_v42  ;;  %v12015_v40 = vld [vmem:[#allocation5 + $0x22c] ss:$16 sps:$4 sm:$0xff]   ;;  %v12021_v42 = vld [vmem:[#allocation5 + $0x220] ss:$16 sps:$4 sm:$0xff]  }
 0x8ea   :  { %5707 = vmatprep.subr.bf16.mxu0 %v13065_v43  ;;  %5748 = vmatprep.subr.bf16.mxu1 %v13066_v45  ;;  %v12023_v43 = vld [vmem:[#allocation5 + $0x228] ss:$16 sps:$4 sm:$0xff]   ;;  %v12027_v45 = vld [vmem:[#allocation5 + $0x244] ss:$16 sps:$4 sm:$0xff]  }
 0x8ed   :  { %5708 = vmatpush1.bf16.msra.mxu0 %v13067_v47  ;;  %5749 = vmatpush1.bf16.msra.mxu1 %v13068_v48  ;;  %v12029_v47 = vld [vmem:[#allocation5 + $0x24c] ss:$16 sps:$4 sm:$0xff]   ;;  %v12033_v48 = vld [vmem:[#allocation5 + $0x240] ss:$16 sps:$4 sm:$0xff]  }
 0x8ee   :  { %5709 = vmatprep.subr.bf16.mxu0 %v13069_v49  ;;  %5750 = vmatprep.subr.bf16.mxu1 %v13070_v50  ;;  %v12035_v49 = vld [vmem:[#allocation5 + $0x248] ss:$16 sps:$4 sm:$0xff]   ;;  %v12039_v50 = vld [vmem:[#allocation5 + $0x264] ss:$16 sps:$4 sm:$0xff]  }
 0x8f1   :  { %5710 = vmatpush1.bf16.msra.mxu0 %v13071_v51  ;;  %5751 = vmatpush1.bf16.msra.mxu1 %v13072_v57  ;;  %v12041_v51 = vld [vmem:[#allocation5 + $0x26c] ss:$16 sps:$4 sm:$0xff]   ;;  %v12045_v57 = vld [vmem:[#allocation5 + $0x260] ss:$16 sps:$4 sm:$0xff]  }
 0x8f2   :  { %5711 = vmatprep.subr.bf16.mxu0 %v13073_v58  ;;  %5752 = vmatprep.subr.bf16.mxu1 %v13074_v0  ;;  %v12047_v58 = vld [vmem:[#allocation5 + $0x268] ss:$16 sps:$4 sm:$0xff]   ;;  %v12053_v0 = vld [vmem:[#allocation5 + $0x284] ss:$16 sps:$4 sm:$0xff]  }
 0x8f5   :  { %5712 = vmatpush1.bf16.msra.mxu0 %v13075_v60  ;;  %5753 = vmatpush1.bf16.msra.mxu1 %v13076_v54  ;;  %v12055_v60 = vld [vmem:[#allocation5 + $0x28c] ss:$16 sps:$4 sm:$0xff]   ;;  %v12057_v54 = vld [vmem:[#allocation5 + $0x280] ss:$16 sps:$4 sm:$0xff]  }
 0x8f6   :  { %5713 = vmatprep.subr.bf16.mxu0 %v13077_v2  ;;  %5754 = vmatprep.subr.bf16.mxu1 %v13078_v4  ;;  %v12059_v2 = vld [vmem:[#allocation5 + $0x288] ss:$16 sps:$4 sm:$0xff]   ;;  %v12065_v4 = vld [vmem:[#allocation5 + $0x2a4] ss:$16 sps:$4 sm:$0xff]  }
 0x8f9   :  { %5714 = vmatpush1.bf16.msra.mxu0 %v13079_v8  ;;  %5755 = vmatpush1.bf16.msra.mxu1 %v13080_v1  ;;  %v12067_v8 = vld [vmem:[#allocation5 + $0x2ac] ss:$16 sps:$4 sm:$0xff]   ;;  %v12069_v1 = vld [vmem:[#allocation5 + $0x2a0] ss:$16 sps:$4 sm:$0xff]  }
 0x8fa   :  { %6203 = vmatprep.subr.bf16.mxu0 %v11992_v13  ;;  %6244 = vmatprep.subr.bf16.mxu1 %v11994_v15 }
 0x98f   :  { %v5197_v46 = vpop.f32.mrb[36].mxu0  ;;  %v5238_v29 = vpop.f32.mrb[36].mxu1 }
 0x990   :  { %v5198_v32 = vadd.f32 %v5197_v46, %v4826_v19  ;;  %v5199_v22 = vpop.f32.mrb[37].mxu0  ;;  %v5240_v18 = vpop.f32.mrb[37].mxu1  ;;  %v5239_v7 = vadd.f32 %v5238_v29, %v4834_v21  ;;  %v12077_v19 = vld [vmem:[#allocation5 + $0x2c4] ss:$16 sps:$4 sm:$0xff]   ;;  %v12081_v46 = vld [vmem:[#allocation5 + $0x2c0] ss:$16 sps:$4 sm:$0xff]  }
 0x991   :  { %v5200_v31 = vadd.f32 %v5199_v22, %v4830_v59  ;;  %v5201_v41 = vpop.f32.mrb[38].mxu0  ;;  %v5242_v34 = vpop.f32.mrb[38].mxu1  ;;  %v5241_v16 = vadd.f32 %v5240_v18, %v4838_v9  ;;  %v12079_v59 = vld [vmem:[#allocation5 + $0x2cc] ss:$16 sps:$4 sm:$0xff]   ;;  %v12083_v29 = vld [vmem:[#allocation5 + $0x2c8] ss:$16 sps:$4 sm:$0xff]  }
 0x992   :  { %v9193_v61 = vmul.f32 -1.442695, %v5198_v32  ;;  %v5202_v63 = vpop.f32.mrb[39].mxu0  ;;  %v5243_v5 = vpop.f32.mrb[39].mxu1  ;;  %v12089_v32 = vld [vmem:[#allocation5 + $0x2e4] ss:$16 sps:$4 sm:$0xff]  }
 0x993   :  { %v9194_v33 = vmul.f32 -1.442695, %v5200_v31  ;;  %v9195_v30 = vmul.f32 -1.442695, %v5241_v16  ;;  %v12091_v22 = vld [vmem:[#allocation5 + $0x2ec] ss:$16 sps:$4 sm:$0xff]  }
 0x994   :  { %10411 = vpow2.f32 %v9193_v61  ;;  %v12093_v18 = vld [vmem:[#allocation5 + $0x2e0] ss:$16 sps:$4 sm:$0xff]   ;;  %v12095_v31 = vld [vmem:[#allocation5 + $0x2e8] ss:$16 sps:$4 sm:$0xff]   ;;  %v12101_v41 = vld [vmem:[#allocation5 + $0x304] ss:$16 sps:$4 sm:$0xff]  }
 0x995   :  { %10413 = vpow2.f32 %v9194_v33  ;;  %v12103_v34 = vld [vmem:[#allocation5 + $0x30c] ss:$16 sps:$4 sm:$0xff]   ;;  %v12105_v61 = vld [vmem:[#allocation5 + $0x300] ss:$16 sps:$4 sm:$0xff]   ;;  %v12107_v63 = vld [vmem:[#allocation5 + $0x308] ss:$16 sps:$4 sm:$0xff]  }
 0x996   :  { %10415 = vpow2.f32 %v9195_v30  ;;  %v12113_v5 = vld [vmem:[#allocation5 + $0x324] ss:$16 sps:$4 sm:$0xff]   ;;  %v12115_v33 = vld [vmem:[#allocation5 + $0x32c] ss:$16 sps:$4 sm:$0xff]   ;;  %v12117_v9 = vld [vmem:[#allocation5 + $0x320] ss:$16 sps:$4 sm:$0xff]  }
 0x997   :  { %10417 = vtanh.f32 %v5239_v7  ;;  %v12119_v16 = vld [vmem:[#allocation5 + $0x328] ss:$16 sps:$4 sm:$0xff]   ;;  %v12125_v21 = vld [vmem:[#allocation5 + $0x344] ss:$16 sps:$4 sm:$0xff]   ;;  %v12127_v30 = vld [vmem:[#allocation5 + $0x34c] ss:$16 sps:$4 sm:$0xff]  }
 0x998   :  { %v12129_v7 = vld [vmem:[#allocation5 + $0x340] ss:$16 sps:$4 sm:$0xff]  }
 0x999   :  { %13084 = vst [vmem:[#allocation14_spill] sm:$0xff] %v12129_v7 }
 0x99e   :  { %v10412_v38 = vpop.eup %10411 }
 0x99f   :  { %v10414_v27 = vpop.eup %10413  ;;  %v5248_v62 = vadd.f32 1.0, %v10412_v38  ;;  %v12131_v38 = vld [vmem:[#allocation5 + $0x348] ss:$16 sps:$4 sm:$0xff]  }
 0x9a0   :  { %v5254_v10 = vadd.f32 1.0, %v10414_v27  ;;  %v10416_v11 = vpop.eup %10415  ;;  %13085 = vst [vmem:[#allocation15_spill] sm:$0xff] %v12131_v38  ;;  %v12137_v27 = vld [vmem:[#allocation5 + $0x364] ss:$16 sps:$4 sm:$0xff]  }
 0x9a1   :  { %10419 = vrcp.f32 %v5248_v62  ;;  %v10418_v3 = vpop.eup %10417  ;;  %v5261_v24 = vadd.f32 1.0, %v10416_v11  ;;  %13086 = vst [vmem:[#allocation16_spill] sm:$0xff] %v12137_v27  ;;  %v12139_v62 = vld [vmem:[#allocation5 + $0x36c] ss:$16 sps:$4 sm:$0xff]   ;;  %v12143_v11 = vld [vmem:[#allocation5 + $0x368] ss:$16 sps:$4 sm:$0xff]  }
 0x9a2   :  { %10421 = vrcp.f32 %v5254_v10  ;;  %13087 = vst [vmem:[#allocation20_spill] sm:$0xff] %v12139_v62  ;;  %v12141_v10 = vld [vmem:[#allocation5 + $0x360] ss:$16 sps:$4 sm:$0xff]   ;;  %13089 = vst [vmem:[#allocation21_spill] sm:$0xff] %v12143_v11 }
 0x9a3   :  { %10423 = vrcp.f32 %v5261_v24  ;;  %13088 = vst [vmem:[#allocation23_spill] sm:$0xff] %v12141_v10  ;;  %v12159_v24 = vld [vmem:[#allocation5 + $0x3a4] ss:$16 sps:$4 sm:$0xff]  }
 0x9a4   :  { %13094 = vst [vmem:[#allocation18_spill] sm:$0xff] %v12159_v24 }
 0x9ab   :  { %v10420_v52 = vpop.eup %10419 }
 0x9ac   :  { %v10422_v26 = vpop.eup %10421  ;;  %v5265_v14 = vmul.f32 %v10420_v52, %v10418_v3  ;;  %v12147_v3 = vld [vmem:[#allocation5 + $0x384] ss:$16 sps:$4 sm:$0xff]   ;;  %v12149_v52 = vld [vmem:[#allocation5 + $0x38c] ss:$16 sps:$4 sm:$0xff]  }
 0x9ad   :  { %v5264_v55 = vmul.f32 %v10422_v26, %v11925_v36  ;;  %v10424_v6 = vpop.eup %10423  ;;  %v13083_v36 = vld [vmem:[#allocation39_spill] sm:$0xff]  ;;  %13090 = vst [vmem:[#allocation17_spill] sm:$0xff] %v12147_v3  ;;  %13091 = vst [vmem:[#allocation22_spill] sm:$0xff] %v12149_v52  ;;  %v12153_v26 = vld [vmem:[#allocation5 + $0x380] ss:$16 sps:$4 sm:$0xff]  }
 0x9ae   :  { %13092 = vst [vmem:[#allocation26_spill] sm:$0xff] %v12153_v26 }
 0x9af   :  { %v12006_v35 = vadd.f32 %v5265_v14, %v5264_v55  ;;  %v12155_v14 = vld [vmem:[#allocation5 + $0x388] ss:$16 sps:$4 sm:$0xff]   ;;  %v12161_v55 = vld [vmem:[#allocation5 + $0x3ac] ss:$16 sps:$4 sm:$0xff]  }
 0x9b0   :  { %13093 = vst [vmem:[#allocation25_spill] sm:$0xff] %v12155_v14  ;;  %13095 = vst [vmem:[#allocation35_spill] sm:$0xff] %v12161_v55 }
 0x9b1   :  { %10425 = vtanh.f32 %v12006_v35 }
 0x9bb   :  { %v10426_v53 = vpop.eup %10425 }
 0x9bc   :  { %v5268_v25 = vmul.f32 %v10426_v53, %v10424_v6  ;;  %v12165_v6 = vld [vmem:[#allocation5 + $0x3a0] ss:$16 sps:$4 sm:$0xff]   ;;  %v12167_v53 = vld [vmem:[#allocation5 + $0x3a8] ss:$16 sps:$4 sm:$0xff]  }
 0x9bd   :  { %13096 = vst [vmem:[#allocation28_spill] sm:$0xff] %v12165_v6  ;;  %13097 = vst [vmem:[#allocation27_spill] sm:$0xff] %v12167_v53 }
 0x9be   :  { %v5276_v28 = vpack.c.bf16 %v5268_v25, %v5268_v25  ;;  %v12171_v25 = vld [vmem:[#allocation5 + $0x3c4] ss:$16 sps:$4 sm:$0xff]  }
 0x9bf   :  { %13098 = vst [vmem:[#allocation30_spill] sm:$0xff] %v12171_v25 }
 0x9c0   :  { %5715 = vmatprep.mubr.bf16.mxu0 %v5276_v28  ;;  %5756 = vmatprep.mubr.bf16.mxu1 %v5276_v28  ;;  %v12173_v28 = vld [vmem:[#allocation5 + $0x3cc] ss:$16 sps:$4 sm:$0xff]  }
 0x9c1   :  { %5716 = vmatmul.mubr.bf16.vlgmr.msra.gmra.mrb[40].mxu0 %v13083_v36  ;;  %5757 = vmatmul.mubr.bf16.vlgmr.msra.gmra.mrb[40].mxu1 %v13083_v36  ;;  %13099 = vst [vmem:[#allocation36_spill] sm:$0xff] %v12173_v28  ;;  %v12177_v36 = vld [vmem:[#allocation5 + $0x3c0] ss:$16 sps:$4 sm:$0xff]  }
 0x9c2   :  { %6204 = vmatpush1.bf16.msra.mxu0 %v12009_v39  ;;  %6245 = vmatpush1.bf16.msra.mxu1 %v12011_v23  ;;  %13100 = vst [vmem:[#allocation32_spill] sm:$0xff] %v12177_v36 }
 0x9c3   :  { %6205 = vmatprep.subr.bf16.mxu0 %v12013_v56  ;;  %6246 = vmatprep.subr.bf16.mxu1 %v12015_v40 }
 0x9c6   :  { %6206 = vmatpush1.bf16.msra.mxu0 %v12021_v42  ;;  %6247 = vmatpush1.bf16.msra.mxu1 %v12023_v43 }
 0x9c7   :  { %6207 = vmatprep.subr.bf16.mxu0 %v12027_v45  ;;  %6248 = vmatprep.subr.bf16.mxu1 %v12029_v47 }
 0x9ca   :  { %6208 = vmatpush1.bf16.msra.mxu0 %v12033_v48  ;;  %6249 = vmatpush1.bf16.msra.mxu1 %v12035_v49 }
 0x9cb   :  { %6209 = vmatprep.subr.bf16.mxu0 %v12039_v50  ;;  %6250 = vmatprep.subr.bf16.mxu1 %v12041_v51 }
 0x9ce   :  { %6210 = vmatpush1.bf16.msra.mxu0 %v12045_v57  ;;  %6251 = vmatpush1.bf16.msra.mxu1 %v12047_v58 }
 0x9cf   :  { %6211 = vmatprep.subr.bf16.mxu0 %v12053_v0  ;;  %6252 = vmatprep.subr.bf16.mxu1 %v12055_v60 }
 0x9d2   :  { %6212 = vmatpush1.bf16.msra.mxu0 %v12057_v54  ;;  %6253 = vmatpush1.bf16.msra.mxu1 %v12059_v2 }
 0x9d3   :  { %6213 = vmatprep.subr.bf16.mxu0 %v12065_v4  ;;  %6254 = vmatprep.subr.bf16.mxu1 %v12067_v8 }
 0x9d6   :  { %6214 = vmatpush1.bf16.msra.mxu0 %v12069_v1  ;;  %6255 = vmatpush1.bf16.msra.mxu1 %v12071_v17 }
 0x9d7   :  { %6215 = vmatprep.subr.bf16.mxu0 %v12077_v19  ;;  %6256 = vmatprep.subr.bf16.mxu1 %v12079_v59 }
 0x9da   :  { %6216 = vmatpush1.bf16.msra.mxu0 %v12081_v46  ;;  %6257 = vmatpush1.bf16.msra.mxu1 %v12083_v29 }
 0x9db   :  { %6217 = vmatprep.subr.bf16.mxu0 %v12089_v32  ;;  %6258 = vmatprep.subr.bf16.mxu1 %v12091_v22 }
 0x9de   :  { %6218 = vmatpush1.bf16.msra.mxu0 %v12093_v18  ;;  %6259 = vmatpush1.bf16.msra.mxu1 %v12095_v31 }
 0x9df   :  { %6219 = vmatprep.subr.bf16.mxu0 %v12101_v41  ;;  %6260 = vmatprep.subr.bf16.mxu1 %v12103_v34 }
 0x9e2   :  { %6220 = vmatpush1.bf16.msra.mxu0 %v12105_v61  ;;  %6261 = vmatpush1.bf16.msra.mxu1 %v12107_v63 }
 0x9e3   :  { %6221 = vmatprep.subr.bf16.mxu0 %v12113_v5  ;;  %6262 = vmatprep.subr.bf16.mxu1 %v12115_v33 }
 0x9e6   :  { %6222 = vmatpush1.bf16.msra.mxu0 %v12117_v9  ;;  %6263 = vmatpush1.bf16.msra.mxu1 %v12119_v16 }
 0x9e7   :  { %6223 = vmatprep.subr.bf16.mxu0 %v12125_v21  ;;  %6264 = vmatprep.subr.bf16.mxu1 %v12127_v30 }
 0x9ea   :  { %6224 = vmatpush1.bf16.msra.mxu0 %v12129_v7  ;;  %6265 = vmatpush1.bf16.msra.mxu1 %v12131_v38 }
 0x9eb   :  { %6225 = vmatprep.subr.bf16.mxu0 %v12137_v27  ;;  %6266 = vmatprep.subr.bf16.mxu1 %v12139_v62 }
 0x9ee   :  { %6226 = vmatpush1.bf16.msra.mxu0 %v12141_v10  ;;  %6267 = vmatpush1.bf16.msra.mxu1 %v12143_v11 }
 0x9ef   :  { %6227 = vmatprep.subr.bf16.mxu0 %v12147_v3  ;;  %6268 = vmatprep.subr.bf16.mxu1 %v12149_v52 }
 0x9f2   :  { %6228 = vmatpush1.bf16.msra.mxu0 %v12153_v26  ;;  %6269 = vmatpush1.bf16.msra.mxu1 %v12155_v14  ;;  %v12179_v26 = vld [vmem:[#allocation5 + $0x3c8] ss:$16 sps:$4 sm:$0xff]   ;;  %v12183_v14 = vld [vmem:[#allocation5 + $0x3e4] ss:$16 sps:$4 sm:$0xff]  }
 0x9f3   :  { %6229 = vmatprep.subr.bf16.mxu0 %v12159_v24  ;;  %6270 = vmatprep.subr.bf16.mxu1 %v12161_v55  ;;  %13101 = vst [vmem:[#allocation29_spill] sm:$0xff] %v12179_v26  ;;  %13102 = vst [vmem:[#allocation33_spill] sm:$0xff] %v12183_v14  ;;  %v12185_v24 = vld [vmem:[#allocation5 + $0x3ec] ss:$16 sps:$4 sm:$0xff]   ;;  %v12189_v55 = vld [vmem:[#allocation5 + $0x3e0] ss:$16 sps:$4 sm:$0xff]  }
 0x9f4   :  { %13103 = vst [vmem:[#allocation37_spill] sm:$0xff] %v12185_v24  ;;  %13104 = vst [vmem:[#allocation34_spill] sm:$0xff] %v12189_v55 }
 0x9f6   :  { %6230 = vmatpush1.bf16.msra.mxu0 %v12165_v6  ;;  %6271 = vmatpush1.bf16.msra.mxu1 %v12167_v53  ;;  %v12191_v6 = vld [vmem:[#allocation5 + $0x3e8] ss:$16 sps:$4 sm:$0xff]  }
 0x9f7   :  { %6231 = vmatprep.subr.bf16.mxu0 %v12171_v25  ;;  %6272 = vmatprep.subr.bf16.mxu1 %v12173_v28  ;;  %13105 = vst [vmem:[#allocation31_spill] sm:$0xff] %v12191_v6 }
 0x9fa   :  { %6232 = vmatpush1.bf16.msra.mxu0 %v12177_v36  ;;  %6273 = vmatpush1.bf16.msra.mxu1 %v12179_v26  ;;  %v9196_v26 = vld [vmem:[%s12687_s2 + $0x4] sm:$0xf] }
 0x9fb   :  { %6233 = vmatprep.subr.bf16.mxu0 %v12183_v14  ;;  %6274 = vmatprep.subr.bf16.mxu1 %v12185_v24  ;;  %v5346_v36 = vrot.slane %v9196_v26, %v13051_v44  ;;  %v5350_v28 = vrot.slane %v9196_v26, %v13052_v37  ;;  %v5358_v62 = vrot.slane %v9196_v26, %v13053_v20 }
 0x9fc   :  { %v5354_v44 = vrot.slane %v9196_v26, %v13054_v12  ;;  %v13109_v26 = vld [vmem:[#allocation16_spill] sm:$0xff] }
 0x9fe   :  { %6234 = vmatpush1.bf16.msra.mxu0 %v12189_v55  ;;  %6275 = vmatpush1.bf16.msra.mxu1 %v12191_v6 }
 0x9ff   :  { %6723 = vmatprep.subr.bf16.mxu0 %v11992_v13  ;;  %6764 = vmatprep.subr.bf16.mxu1 %v11994_v15 }
 0xa94   :  { %v5717_v25 = vpop.f32.mrb[40].mxu0  ;;  %v5758_v14 = vpop.f32.mrb[40].mxu1 }
 0xa95   :  { %v5718_v53 = vadd.f32 %v5717_v25, %v5346_v36  ;;  %v5719_v24 = vpop.f32.mrb[41].mxu0  ;;  %v5760_v52 = vpop.f32.mrb[41].mxu1  ;;  %v5759_v38 = vadd.f32 %v5758_v14, %v5354_v44  ;;  %v13110_v14 = vld [vmem:[#allocation20_spill] sm:$0xff] }
 0xa96   :  { %v5720_v55 = vadd.f32 %v5719_v24, %v5350_v28  ;;  %v5721_v3 = vpop.f32.mrb[42].mxu0  ;;  %v5762_v6 = vpop.f32.mrb[42].mxu1  ;;  %v5761_v27 = vadd.f32 %v5760_v52, %v5358_v62  ;;  %v13108_v52 = vld [vmem:[#allocation15_spill] sm:$0xff]  ;;  %v13112_v28 = vld [vmem:[#allocation21_spill] sm:$0xff] }
 0xa97   :  { %v9261_v11 = vmul.f32 -1.442695, %v5718_v53  ;;  %v5722_v13 = vpop.f32.mrb[43].mxu0  ;;  %v5763_v10 = vpop.f32.mrb[43].mxu1  ;;  %v13111_v53 = vld [vmem:[#allocation23_spill] sm:$0xff] }
 0xa98   :  { %v9262_v15 = vmul.f32 -1.442695, %v5720_v55  ;;  %v9263_v37 = vmul.f32 -1.442695, %v5761_v27  ;;  %v13106_v27 = vld [vmem:[#allocation24_spill] sm:$0xff] }
 0xa99   :  { %10427 = vpow2.f32 %v9261_v11 }
 0xa9a   :  { %10429 = vpow2.f32 %v9262_v15 }
 0xa9b   :  { %10431 = vpow2.f32 %v9263_v37 }
 0xa9c   :  { %10433 = vtanh.f32 %v5759_v38 }
 0xaa3   :  { %v10428_v7 = vpop.eup %10427 }
 0xaa4   :  { %v10430_v25 = vpop.eup %10429  ;;  %v5768_v36 = vadd.f32 1.0, %v10428_v7 }
 0xaa5   :  { %v5774_v3 = vadd.f32 1.0, %v10430_v25  ;;  %v10432_v13 = vpop.eup %10431  ;;  %v13113_v25 = vld [vmem:[#allocation17_spill] sm:$0xff] }
 0xaa6   :  { %10435 = vrcp.f32 %v5768_v36  ;;  %v10434_v10 = vpop.eup %10433  ;;  %v5781_v11 = vadd.f32 1.0, %v10432_v13  ;;  %v13114_v36 = vld [vmem:[#allocation22_spill] sm:$0xff]  ;;  %v13116_v13 = vld [vmem:[#allocation25_spill] sm:$0xff] }
 0xaa7   :  { %10437 = vrcp.f32 %v5774_v3  ;;  %v13115_v3 = vld [vmem:[#allocation26_spill] sm:$0xff] }
 0xaa8   :  { %10439 = vrcp.f32 %v5781_v11  ;;  %v13121_v11 = vld [vmem:[#allocation30_spill] sm:$0xff] }
 0xab0   :  { %v10436_v24 = vpop.eup %10435 }
 0xab1   :  { %v10438_v55 = vpop.eup %10437  ;;  %v5785_v6 = vmul.f32 %v10436_v24, %v10434_v10  ;;  %v13117_v10 = vld [vmem:[#allocation18_spill] sm:$0xff]  ;;  %v13118_v24 = vld [vmem:[#allocation35_spill] sm:$0xff] }
 0xab2   :  { %v5784_v15 = vmul.f32 %v10438_v55, %v12006_v35  ;;  %v10440_v44 = vpop.eup %10439  ;;  %v13107_v35 = vld [vmem:[#allocation14_spill] sm:$0xff]  ;;  %v13119_v55 = vld [vmem:[#allocation28_spill] sm:$0xff] }
 0xab4   :  { %v12207_v62 = vadd.f32 %v5785_v6, %v5784_v15  ;;  %v13120_v6 = vld [vmem:[#allocation27_spill] sm:$0xff]  ;;  %v13122_v15 = vld [vmem:[#allocation36_spill] sm:$0xff] }
 0xab6   :  { %10441 = vtanh.f32 %v12207_v62 }
 0xac0   :  { %v10442_v7 = vpop.eup %10441 }
 0xac1   :  { %v5788_v37 = vmul.f32 %v10442_v7, %v10440_v44  ;;  %v13123_v44 = vld [vmem:[#allocation32_spill] sm:$0xff]  ;;  %v13124_v7 = vld [vmem:[#allocation29_spill] sm:$0xff] }
 0xac3   :  { %v5796_v38 = vpack.c.bf16 %v5788_v37, %v5788_v37  ;;  %v13125_v37 = vld [vmem:[#allocation33_spill] sm:$0xff] }
 0xac5   :  { %6235 = vmatprep.mubr.bf16.mxu0 %v5796_v38  ;;  %6276 = vmatprep.mubr.bf16.mxu1 %v5796_v38  ;;  %v13126_v38 = vld [vmem:[#allocation37_spill] sm:$0xff] }
 0xac6   :  { %6236 = vmatmul.mubr.bf16.vlgmr.msra.gmra.mrb[44].mxu0 %v13106_v27  ;;  %6277 = vmatmul.mubr.bf16.vlgmr.msra.gmra.mrb[44].mxu1 %v13106_v27  ;;  %v13127_v27 = vld [vmem:[#allocation34_spill] sm:$0xff] }
 0xac7   :  { %6724 = vmatpush1.bf16.msra.mxu0 %v12009_v39  ;;  %6765 = vmatpush1.bf16.msra.mxu1 %v12011_v23 }
 0xac8   :  { %6725 = vmatprep.subr.bf16.mxu0 %v12013_v56  ;;  %6766 = vmatprep.subr.bf16.mxu1 %v12015_v40 }
 0xacb   :  { %6726 = vmatpush1.bf16.msra.mxu0 %v12021_v42  ;;  %6767 = vmatpush1.bf16.msra.mxu1 %v12023_v43 }
 0xacc   :  { %6727 = vmatprep.subr.bf16.mxu0 %v12027_v45  ;;  %6768 = vmatprep.subr.bf16.mxu1 %v12029_v47 }
 0xacf   :  { %6728 = vmatpush1.bf16.msra.mxu0 %v12033_v48  ;;  %6769 = vmatpush1.bf16.msra.mxu1 %v12035_v49 }
 0xad0   :  { %6729 = vmatprep.subr.bf16.mxu0 %v12039_v50  ;;  %6770 = vmatprep.subr.bf16.mxu1 %v12041_v51 }
 0xad3   :  { %6730 = vmatpush1.bf16.msra.mxu0 %v12045_v57  ;;  %6771 = vmatpush1.bf16.msra.mxu1 %v12047_v58 }
 0xad4   :  { %6731 = vmatprep.subr.bf16.mxu0 %v12053_v0  ;;  %6772 = vmatprep.subr.bf16.mxu1 %v12055_v60 }
 0xad7   :  { %6732 = vmatpush1.bf16.msra.mxu0 %v12057_v54  ;;  %6773 = vmatpush1.bf16.msra.mxu1 %v12059_v2 }
 0xad8   :  { %6733 = vmatprep.subr.bf16.mxu0 %v12065_v4  ;;  %6774 = vmatprep.subr.bf16.mxu1 %v12067_v8 }
 0xadb   :  { %6734 = vmatpush1.bf16.msra.mxu0 %v12069_v1  ;;  %6775 = vmatpush1.bf16.msra.mxu1 %v12071_v17 }
 0xadc   :  { %6735 = vmatprep.subr.bf16.mxu0 %v12077_v19  ;;  %6776 = vmatprep.subr.bf16.mxu1 %v12079_v59 }
 0xadf   :  { %6736 = vmatpush1.bf16.msra.mxu0 %v12081_v46  ;;  %6777 = vmatpush1.bf16.msra.mxu1 %v12083_v29 }
 0xae0   :  { %6737 = vmatprep.subr.bf16.mxu0 %v12089_v32  ;;  %6778 = vmatprep.subr.bf16.mxu1 %v12091_v22 }
 0xae3   :  { %6738 = vmatpush1.bf16.msra.mxu0 %v12093_v18  ;;  %6779 = vmatpush1.bf16.msra.mxu1 %v12095_v31 }
 0xae4   :  { %6739 = vmatprep.subr.bf16.mxu0 %v12101_v41  ;;  %6780 = vmatprep.subr.bf16.mxu1 %v12103_v34 }
 0xae7   :  { %6740 = vmatpush1.bf16.msra.mxu0 %v12105_v61  ;;  %6781 = vmatpush1.bf16.msra.mxu1 %v12107_v63 }
 0xae8   :  { %6741 = vmatprep.subr.bf16.mxu0 %v12113_v5  ;;  %6782 = vmatprep.subr.bf16.mxu1 %v12115_v33 }
 0xaeb   :  { %6742 = vmatpush1.bf16.msra.mxu0 %v12117_v9  ;;  %6783 = vmatpush1.bf16.msra.mxu1 %v12119_v16 }
 0xaec   :  { %6743 = vmatprep.subr.bf16.mxu0 %v12125_v21  ;;  %6784 = vmatprep.subr.bf16.mxu1 %v12127_v30 }
 0xaef   :  { %6744 = vmatpush1.bf16.msra.mxu0 %v13107_v35  ;;  %6785 = vmatpush1.bf16.msra.mxu1 %v13108_v52 }
 0xaf0   :  { %6745 = vmatprep.subr.bf16.mxu0 %v13109_v26  ;;  %6786 = vmatprep.subr.bf16.mxu1 %v13110_v14 }
 0xaf3   :  { %6746 = vmatpush1.bf16.msra.mxu0 %v13111_v53  ;;  %6787 = vmatpush1.bf16.msra.mxu1 %v13112_v28 }
 0xaf4   :  { %6747 = vmatprep.subr.bf16.mxu0 %v13113_v25  ;;  %6788 = vmatprep.subr.bf16.mxu1 %v13114_v36 }
 0xaf7   :  { %6748 = vmatpush1.bf16.msra.mxu0 %v13115_v3  ;;  %6789 = vmatpush1.bf16.msra.mxu1 %v13116_v13 }
 0xaf8   :  { %6749 = vmatprep.subr.bf16.mxu0 %v13117_v10  ;;  %6790 = vmatprep.subr.bf16.mxu1 %v13118_v24  ;;  %v13128_v10 = vld [vmem:[#allocation31_spill] sm:$0xff]  ;;  %v13129_v24 = vld [vmem:[#allocation10_spill] sm:$0xff] }
 0xafb   :  { %6750 = vmatpush1.bf16.msra.mxu0 %v13119_v55  ;;  %6791 = vmatpush1.bf16.msra.mxu1 %v13120_v6  ;;  %v13130_v55 = vld [vmem:[#allocation11_spill] sm:$0xff]  ;;  %v13132_v6 = vld [vmem:[#allocation9_spill] sm:$0xff] }
 0xafc   :  { %6751 = vmatprep.subr.bf16.mxu0 %v13121_v11  ;;  %6792 = vmatprep.subr.bf16.mxu1 %v13122_v15  ;;  %v9264_v15 = vld [vmem:[%s12687_s2 + $0x4] sm:$0xf] }
 0xafd   :  { %v13131_v11 = vld [vmem:[#allocation8_spill] sm:$0xff]  ;;  %v5878_v14 = vrot.slane %v9264_v15, %v13053_v20 }
 0xaff   :  { %6752 = vmatpush1.bf16.msra.mxu0 %v13123_v44  ;;  %6793 = vmatpush1.bf16.msra.mxu1 %v13124_v7  ;;  %v5866_v44 = vrot.slane %v9264_v15, %v13131_v11  ;;  %v5870_v7 = vrot.slane %v9264_v15, %v13132_v6  ;;  %v5874_v11 = vrot.slane %v9264_v15, %v13054_v12 }
 0xb00   :  { %6753 = vmatprep.subr.bf16.mxu0 %v13125_v37  ;;  %6794 = vmatprep.subr.bf16.mxu1 %v13126_v38 }
 0xb03   :  { %6754 = vmatpush1.bf16.msra.mxu0 %v13127_v27  ;;  %6795 = vmatpush1.bf16.msra.mxu1 %v13128_v10 }
 0xb04   :  { %7243 = vmatprep.subr.bf16.mxu0 %v13129_v24  ;;  %7284 = vmatprep.subr.bf16.mxu1 %v13130_v55 }
 0xb99   :  { %v6237_v13 = vpop.f32.mrb[44].mxu0  ;;  %v6278_v37 = vpop.f32.mrb[44].mxu1 }
 0xb9a   :  { %v6238_v3 = vadd.f32 %v6237_v13, %v5866_v44  ;;  %v6239_v38 = vpop.f32.mrb[45].mxu0  ;;  %v6280_v36 = vpop.f32.mrb[45].mxu1  ;;  %v6279_v52 = vadd.f32 %v6278_v37, %v5874_v11  ;;  %v13133_v11 = vld [vmem:[#allocation13_spill] sm:$0xff] }
 0xb9b   :  { %v6240_v27 = vadd.f32 %v6239_v38, %v5870_v7  ;;  %v6241_v25 = vpop.f32.mrb[46].mxu0  ;;  %v6282_v10 = vpop.f32.mrb[46].mxu1  ;;  %v6281_v26 = vadd.f32 %v6280_v36, %v5878_v14 }
 0xb9c   :  { %v9329_v28 = vmul.f32 -1.442695, %v6238_v3  ;;  %v6242_v24 = vpop.f32.mrb[47].mxu0  ;;  %v6283_v53 = vpop.f32.mrb[47].mxu1 }
 0xb9d   :  { %v9330_v55 = vmul.f32 -1.442695, %v6240_v27  ;;  %v9331_v6 = vmul.f32 -1.442695, %v6281_v26 }
 0xb9e   :  { %10443 = vpow2.f32 %v9329_v28 }
 0xb9f   :  { %10445 = vpow2.f32 %v9330_v55 }
 0xba0   :  { %10447 = vpow2.f32 %v9331_v6 }
 0xba1   :  { %10449 = vtanh.f32 %v6279_v52 }
 0xba8   :  { %v10444_v35 = vpop.eup %10443 }
 0xba9   :  { %v10446_v13 = vpop.eup %10445  ;;  %v6288_v44 = vadd.f32 1.0, %v10444_v35 }
 0xbaa   :  { %v6294_v25 = vadd.f32 1.0, %v10446_v13  ;;  %v10448_v3 = vpop.eup %10447 }
 0xbab   :  { %10451 = vrcp.f32 %v6288_v44  ;;  %v10450_v53 = vpop.eup %10449  ;;  %v6301_v28 = vadd.f32 1.0, %v10448_v3 }
 0xbac   :  { %10453 = vrcp.f32 %v6294_v25 }
 0xbad   :  { %10455 = vrcp.f32 %v6301_v28 }
 0xbb5   :  { %v10452_v10 = vpop.eup %10451 }
 0xbb6   :  { %v10454_v7 = vpop.eup %10453  ;;  %v6305_v38 = vmul.f32 %v10452_v10, %v10450_v53 }
 0xbb7   :  { %v6304_v14 = vmul.f32 %v10454_v7, %v12207_v62  ;;  %v10456_v26 = vpop.eup %10455 }
 0xbb9   :  { %v12284_v36 = vadd.f32 %v6305_v38, %v6304_v14 }
 0xbbb   :  { %10457 = vtanh.f32 %v12284_v36 }
 0xbc5   :  { %v10458_v35 = vpop.eup %10457 }
 0xbc6   :  { %v6308_v6 = vmul.f32 %v10458_v35, %v10456_v26 }
 0xbc8   :  { %v6316_v52 = vpack.c.bf16 %v6308_v6, %v6308_v6 }
 0xbca   :  { %6755 = vmatprep.mubr.bf16.mxu0 %v6316_v52  ;;  %6796 = vmatprep.mubr.bf16.mxu1 %v6316_v52 }
 0xbcb   :  { %6756 = vmatmul.mubr.bf16.vlgmr.msra.gmra.mrb[48].mxu0 %v13133_v11  ;;  %6797 = vmatmul.mubr.bf16.vlgmr.msra.gmra.mrb[48].mxu1 %v13133_v11 }
 0xbcc   :  { %7244 = vmatpush1.bf16.msra.mxu0 %v12009_v39  ;;  %7285 = vmatpush1.bf16.msra.mxu1 %v12011_v23  ;;  %v13134_v39 = vld [vmem:[#allocation14_spill] sm:$0xff]  ;;  %v13135_v23 = vld [vmem:[#allocation15_spill] sm:$0xff] }
 0xbcd   :  { %7245 = vmatprep.subr.bf16.mxu0 %v12013_v56  ;;  %7286 = vmatprep.subr.bf16.mxu1 %v12015_v40  ;;  %v13136_v56 = vld [vmem:[#allocation16_spill] sm:$0xff] }
 0xbce   :  { %v13137_v40 = vld [vmem:[#allocation20_spill] sm:$0xff] }
 0xbd0   :  { %7246 = vmatpush1.bf16.msra.mxu0 %v12021_v42  ;;  %7287 = vmatpush1.bf16.msra.mxu1 %v12023_v43  ;;  %v13138_v42 = vld [vmem:[#allocation23_spill] sm:$0xff]  ;;  %v13139_v43 = vld [vmem:[#allocation21_spill] sm:$0xff] }
 0xbd1   :  { %7247 = vmatprep.subr.bf16.mxu0 %v12027_v45  ;;  %7288 = vmatprep.subr.bf16.mxu1 %v12029_v47  ;;  %v13140_v45 = vld [vmem:[#allocation17_spill] sm:$0xff]  ;;  %v13141_v47 = vld [vmem:[#allocation22_spill] sm:$0xff] }
 0xbd4   :  { %7248 = vmatpush1.bf16.msra.mxu0 %v12033_v48  ;;  %7289 = vmatpush1.bf16.msra.mxu1 %v12035_v49  ;;  %v13142_v48 = vld [vmem:[#allocation26_spill] sm:$0xff]  ;;  %v13143_v49 = vld [vmem:[#allocation25_spill] sm:$0xff] }
 0xbd5   :  { %7249 = vmatprep.subr.bf16.mxu0 %v12039_v50  ;;  %7290 = vmatprep.subr.bf16.mxu1 %v12041_v51  ;;  %v13144_v50 = vld [vmem:[#allocation18_spill] sm:$0xff]  ;;  %v13145_v51 = vld [vmem:[#allocation35_spill] sm:$0xff] }
 0xbd8   :  { %7250 = vmatpush1.bf16.msra.mxu0 %v12045_v57  ;;  %7291 = vmatpush1.bf16.msra.mxu1 %v12047_v58  ;;  %v13146_v57 = vld [vmem:[#allocation28_spill] sm:$0xff]  ;;  %v13147_v58 = vld [vmem:[#allocation27_spill] sm:$0xff] }
 0xbd9   :  { %7251 = vmatprep.subr.bf16.mxu0 %v12053_v0  ;;  %7292 = vmatprep.subr.bf16.mxu1 %v12055_v60  ;;  %v13148_v0 = vld [vmem:[#allocation30_spill] sm:$0xff]  ;;  %v13149_v60 = vld [vmem:[#allocation36_spill] sm:$0xff] }
 0xbdc   :  { %7252 = vmatpush1.bf16.msra.mxu0 %v12057_v54  ;;  %7293 = vmatpush1.bf16.msra.mxu1 %v12059_v2  ;;  %v13150_v54 = vld [vmem:[#allocation32_spill] sm:$0xff]  ;;  %v13151_v2 = vld [vmem:[#allocation29_spill] sm:$0xff] }
 0xbdd   :  { %7253 = vmatprep.subr.bf16.mxu0 %v12065_v4  ;;  %7294 = vmatprep.subr.bf16.mxu1 %v12067_v8  ;;  %v13152_v4 = vld [vmem:[#allocation33_spill] sm:$0xff] }
 0xbde   :  { %v13153_v8 = vld [vmem:[#allocation37_spill] sm:$0xff] }
 0xbe0   :  { %7254 = vmatpush1.bf16.msra.mxu0 %v12069_v1  ;;  %7295 = vmatpush1.bf16.msra.mxu1 %v12071_v17  ;;  %v13154_v1 = vld [vmem:[#allocation34_spill] sm:$0xff]  ;;  %v13155_v17 = vld [vmem:[#allocation31_spill] sm:$0xff] }
 0xbe1   :  { %7255 = vmatprep.subr.bf16.mxu0 %v12077_v19  ;;  %7296 = vmatprep.subr.bf16.mxu1 %v12079_v59  ;;  %v12351_v19 = vld [vmem:[#allocation5 + $0x204] ss:$16 sps:$4 sm:$0xff]   ;;  %v12353_v59 = vld [vmem:[#allocation5 + $0x20c] ss:$16 sps:$4 sm:$0xff]  }
 0xbe4   :  { %7256 = vmatpush1.bf16.msra.mxu0 %v12081_v46  ;;  %7297 = vmatpush1.bf16.msra.mxu1 %v12083_v29  ;;  %v9332_v46 = vld [vmem:[%s12687_s2 + $0x4] sm:$0xf] }
 0xbe5   :  { %7257 = vmatprep.subr.bf16.mxu0 %v12089_v32  ;;  %7298 = vmatprep.subr.bf16.mxu1 %v12091_v22  ;;  %v13156_v29 = vld [vmem:[#allocation8_spill] sm:$0xff]  ;;  %v13157_v22 = vld [vmem:[#allocation9_spill] sm:$0xff]  ;;  %v6398_v15 = vrot.slane %v9332_v46, %v13053_v20  ;;  %v6394_v27 = vrot.slane %v9332_v46, %v13054_v12 }
 0xbe6   :  { %v6386_v32 = vrot.slane %v9332_v46, %v13156_v29 }
 0xbe8   :  { %7258 = vmatpush1.bf16.msra.mxu0 %v12093_v18  ;;  %7299 = vmatpush1.bf16.msra.mxu1 %v12095_v31  ;;  %v6390_v18 = vrot.slane %v9332_v46, %v13157_v22  ;;  %v12430_v46 = vld [vmem:[#allocation5 + $0x2a8] ss:$16 sps:$4 sm:$0xff]  }
 0xbe9   :  { %7259 = vmatprep.subr.bf16.mxu0 %v12101_v41  ;;  %7300 = vmatprep.subr.bf16.mxu1 %v12103_v34 }
 0xbec   :  { %7260 = vmatpush1.bf16.msra.mxu0 %v12105_v61  ;;  %7301 = vmatpush1.bf16.msra.mxu1 %v12107_v63 }
 0xbed   :  { %7261 = vmatprep.subr.bf16.mxu0 %v12113_v5  ;;  %7302 = vmatprep.subr.bf16.mxu1 %v12115_v33 }
 0xbf0   :  { %7262 = vmatpush1.bf16.msra.mxu0 %v12117_v9  ;;  %7303 = vmatpush1.bf16.msra.mxu1 %v12119_v16 }
 0xbf1   :  { %7263 = vmatprep.subr.bf16.mxu0 %v12125_v21  ;;  %7304 = vmatprep.subr.bf16.mxu1 %v12127_v30 }
 0xbf4   :  { %7264 = vmatpush1.bf16.msra.mxu0 %v13134_v39  ;;  %7305 = vmatpush1.bf16.msra.mxu1 %v13135_v23  ;;  %v12368_v23 = vld [vmem:[#allocation5 + $0x200] ss:$16 sps:$4 sm:$0xff]  }
 0xbf5   :  { %7265 = vmatprep.subr.bf16.mxu0 %v13136_v56  ;;  %7306 = vmatprep.subr.bf16.mxu1 %v13137_v40  ;;  %v12370_v56 = vld [vmem:[#allocation5 + $0x208] ss:$16 sps:$4 sm:$0xff]   ;;  %v12372_v40 = vld [vmem:[#allocation5 + $0x224] ss:$16 sps:$4 sm:$0xff]  }
 0xbf8   :  { %7266 = vmatpush1.bf16.msra.mxu0 %v13138_v42  ;;  %7307 = vmatpush1.bf16.msra.mxu1 %v13139_v43  ;;  %v12374_v42 = vld [vmem:[#allocation5 + $0x22c] ss:$16 sps:$4 sm:$0xff]   ;;  %v12380_v43 = vld [vmem:[#allocation5 + $0x220] ss:$16 sps:$4 sm:$0xff]  }
 0xbf9   :  { %7267 = vmatprep.subr.bf16.mxu0 %v13140_v45  ;;  %7308 = vmatprep.subr.bf16.mxu1 %v13141_v47  ;;  %v12382_v45 = vld [vmem:[#allocation5 + $0x228] ss:$16 sps:$4 sm:$0xff]   ;;  %v12386_v47 = vld [vmem:[#allocation5 + $0x244] ss:$16 sps:$4 sm:$0xff]  }
 0xbfc   :  { %7268 = vmatpush1.bf16.msra.mxu0 %v13142_v48  ;;  %7309 = vmatpush1.bf16.msra.mxu1 %v13143_v49  ;;  %v12388_v48 = vld [vmem:[#allocation5 + $0x24c] ss:$16 sps:$4 sm:$0xff]   ;;  %v12392_v49 = vld [vmem:[#allocation5 + $0x240] ss:$16 sps:$4 sm:$0xff]  }
 0xbfd   :  { %7269 = vmatprep.subr.bf16.mxu0 %v13144_v50  ;;  %7310 = vmatprep.subr.bf16.mxu1 %v13145_v51  ;;  %v12394_v50 = vld [vmem:[#allocation5 + $0x248] ss:$16 sps:$4 sm:$0xff]   ;;  %v12398_v51 = vld [vmem:[#allocation5 + $0x264] ss:$16 sps:$4 sm:$0xff]  }
 0xc00   :  { %7270 = vmatpush1.bf16.msra.mxu0 %v13146_v57  ;;  %7311 = vmatpush1.bf16.msra.mxu1 %v13147_v58  ;;  %v12400_v57 = vld [vmem:[#allocation5 + $0x26c] ss:$16 sps:$4 sm:$0xff]   ;;  %v12404_v58 = vld [vmem:[#allocation5 + $0x260] ss:$16 sps:$4 sm:$0xff]  }
 0xc01   :  { %7271 = vmatprep.subr.bf16.mxu0 %v13148_v0  ;;  %7312 = vmatprep.subr.bf16.mxu1 %v13149_v60  ;;  %v12406_v0 = vld [vmem:[#allocation5 + $0x268] ss:$16 sps:$4 sm:$0xff]   ;;  %v12412_v60 = vld [vmem:[#allocation5 + $0x284] ss:$16 sps:$4 sm:$0xff]  }
 0xc04   :  { %7272 = vmatpush1.bf16.msra.mxu0 %v13150_v54  ;;  %7313 = vmatpush1.bf16.msra.mxu1 %v13151_v2  ;;  %v12414_v54 = vld [vmem:[#allocation5 + $0x28c] ss:$16 sps:$4 sm:$0xff]   ;;  %v12416_v2 = vld [vmem:[#allocation5 + $0x280] ss:$16 sps:$4 sm:$0xff]  }
 0xc05   :  { %7273 = vmatprep.subr.bf16.mxu0 %v13152_v4  ;;  %7314 = vmatprep.subr.bf16.mxu1 %v13153_v8  ;;  %v12418_v4 = vld [vmem:[#allocation5 + $0x288] ss:$16 sps:$4 sm:$0xff]   ;;  %v12424_v8 = vld [vmem:[#allocation5 + $0x2a4] ss:$16 sps:$4 sm:$0xff]  }
 0xc08   :  { %7274 = vmatpush1.bf16.msra.mxu0 %v13154_v1  ;;  %7315 = vmatpush1.bf16.msra.mxu1 %v13155_v17  ;;  %v12426_v1 = vld [vmem:[#allocation5 + $0x2ac] ss:$16 sps:$4 sm:$0xff]   ;;  %v12428_v17 = vld [vmem:[#allocation5 + $0x2a0] ss:$16 sps:$4 sm:$0xff]  }
 0xc09   :  { %7763 = vmatprep.subr.bf16.mxu0 %v12351_v19  ;;  %7804 = vmatprep.subr.bf16.mxu1 %v12353_v59 }
 0xc9e   :  { %v6757_v31 = vpop.f32.mrb[48].mxu0  ;;  %v6798_v41 = vpop.f32.mrb[48].mxu1 }
 0xc9f   :  { %v6758_v34 = vadd.f32 %v6757_v31, %v6386_v32  ;;  %v6759_v61 = vpop.f32.mrb[49].mxu0  ;;  %v6800_v63 = vpop.f32.mrb[49].mxu1  ;;  %v6799_v55 = vadd.f32 %v6798_v41, %v6394_v27  ;;  %v12436_v32 = vld [vmem:[#allocation5 + $0x2c4] ss:$16 sps:$4 sm:$0xff]   ;;  %v12440_v31 = vld [vmem:[#allocation5 + $0x2c0] ss:$16 sps:$4 sm:$0xff]  }
 0xca0   :  { %v6760_v5 = vadd.f32 %v6759_v61, %v6390_v18  ;;  %v6761_v33 = vpop.f32.mrb[50].mxu0  ;;  %v6802_v9 = vpop.f32.mrb[50].mxu1  ;;  %v6801_v37 = vadd.f32 %v6800_v63, %v6398_v15  ;;  %v12438_v18 = vld [vmem:[#allocation5 + $0x2cc] ss:$16 sps:$4 sm:$0xff]   ;;  %v12442_v41 = vld [vmem:[#allocation5 + $0x2c8] ss:$16 sps:$4 sm:$0xff]  }
 0xca1   :  { %v9397_v16 = vmul.f32 -1.442695, %v6758_v34  ;;  %v6762_v21 = vpop.f32.mrb[51].mxu0  ;;  %v6803_v30 = vpop.f32.mrb[51].mxu1  ;;  %v12448_v34 = vld [vmem:[#allocation5 + $0x2e4] ss:$16 sps:$4 sm:$0xff]  }
 0xca2   :  { %v9398_v62 = vmul.f32 -1.442695, %v6760_v5  ;;  %v9399_v24 = vmul.f32 -1.442695, %v6801_v37  ;;  %v12450_v61 = vld [vmem:[#allocation5 + $0x2ec] ss:$16 sps:$4 sm:$0xff]  }
 0xca3   :  { %10459 = vpow2.f32 %v9397_v16  ;;  %v12452_v63 = vld [vmem:[#allocation5 + $0x2e0] ss:$16 sps:$4 sm:$0xff]   ;;  %v12454_v5 = vld [vmem:[#allocation5 + $0x2e8] ss:$16 sps:$4 sm:$0xff]   ;;  %v12460_v33 = vld [vmem:[#allocation5 + $0x304] ss:$16 sps:$4 sm:$0xff]  }
 0xca4   :  { %10461 = vpow2.f32 %v9398_v62  ;;  %v12462_v9 = vld [vmem:[#allocation5 + $0x30c] ss:$16 sps:$4 sm:$0xff]   ;;  %v12464_v16 = vld [vmem:[#allocation5 + $0x300] ss:$16 sps:$4 sm:$0xff]   ;;  %v12466_v21 = vld [vmem:[#allocation5 + $0x308] ss:$16 sps:$4 sm:$0xff]  }
 0xca5   :  { %10463 = vpow2.f32 %v9399_v24  ;;  %v12472_v30 = vld [vmem:[#allocation5 + $0x324] ss:$16 sps:$4 sm:$0xff]   ;;  %v12474_v62 = vld [vmem:[#allocation5 + $0x32c] ss:$16 sps:$4 sm:$0xff]   ;;  %v12476_v15 = vld [vmem:[#allocation5 + $0x320] ss:$16 sps:$4 sm:$0xff]  }
 0xca6   :  { %10465 = vtanh.f32 %v6799_v55  ;;  %v12478_v37 = vld [vmem:[#allocation5 + $0x328] ss:$16 sps:$4 sm:$0xff]   ;;  %v12484_v27 = vld [vmem:[#allocation5 + $0x344] ss:$16 sps:$4 sm:$0xff]   ;;  %v12486_v24 = vld [vmem:[#allocation5 + $0x34c] ss:$16 sps:$4 sm:$0xff]  }
 0xca7   :  { %v12488_v55 = vld [vmem:[#allocation5 + $0x340] ss:$16 sps:$4 sm:$0xff]  }
 0xca8   :  { %13159 = vst [vmem:[#allocation40_spill] sm:$0xff] %v12488_v55 }
 0xcad   :  { %v10460_v13 = vpop.eup %10459 }
 0xcae   :  { %v10462_v44 = vpop.eup %10461  ;;  %v6808_v25 = vadd.f32 1.0, %v10460_v13  ;;  %v12490_v13 = vld [vmem:[#allocation5 + $0x348] ss:$16 sps:$4 sm:$0xff]  }
 0xcaf   :  { %v6814_v3 = vadd.f32 1.0, %v10462_v44  ;;  %v10464_v53 = vpop.eup %10463  ;;  %13160 = vst [vmem:[#allocation41_spill] sm:$0xff] %v12490_v13  ;;  %v12496_v44 = vld [vmem:[#allocation5 + $0x364] ss:$16 sps:$4 sm:$0xff]  }
 0xcb0   :  { %10467 = vrcp.f32 %v6808_v25  ;;  %v10466_v10 = vpop.eup %10465  ;;  %v6821_v14 = vadd.f32 1.0, %v10464_v53  ;;  %13161 = vst [vmem:[#allocation42_spill] sm:$0xff] %v12496_v44  ;;  %v12498_v25 = vld [vmem:[#allocation5 + $0x36c] ss:$16 sps:$4 sm:$0xff]   ;;  %v12502_v53 = vld [vmem:[#allocation5 + $0x368] ss:$16 sps:$4 sm:$0xff]  }
 0xcb1   :  { %10469 = vrcp.f32 %v6814_v3  ;;  %13162 = vst [vmem:[#allocation39_spill] sm:$0xff] %v12498_v25  ;;  %v12500_v3 = vld [vmem:[#allocation5 + $0x360] ss:$16 sps:$4 sm:$0xff]   ;;  %13164 = vst [vmem:[#allocation10_spill] sm:$0xff] %v12502_v53 }
 0xcb2   :  { %10471 = vrcp.f32 %v6821_v14  ;;  %13163 = vst [vmem:[#allocation24_spill] sm:$0xff] %v12500_v3  ;;  %v12518_v14 = vld [vmem:[#allocation5 + $0x3a4] ss:$16 sps:$4 sm:$0xff]  }
 0xcb3   :  { %13169 = vst [vmem:[#allocation16_spill] sm:$0xff] %v12518_v14 }
 0xcba   :  { %v10468_v7 = vpop.eup %10467 }
 0xcbb   :  { %v10470_v38 = vpop.eup %10469  ;;  %v6825_v28 = vmul.f32 %v10468_v7, %v10466_v10  ;;  %v12506_v10 = vld [vmem:[#allocation5 + $0x384] ss:$16 sps:$4 sm:$0xff]   ;;  %v12508_v7 = vld [vmem:[#allocation5 + $0x38c] ss:$16 sps:$4 sm:$0xff]  }
 0xcbc   :  { %v6824_v26 = vmul.f32 %v10470_v38, %v12284_v36  ;;  %v10472_v6 = vpop.eup %10471  ;;  %v13158_v36 = vld [vmem:[#allocation38_spill] sm:$0xff]  ;;  %13165 = vst [vmem:[#allocation11_spill] sm:$0xff] %v12506_v10  ;;  %13166 = vst [vmem:[#allocation13_spill] sm:$0xff] %v12508_v7 }
 0xcbd   :  { %v12512_v38 = vld [vmem:[#allocation5 + $0x380] ss:$16 sps:$4 sm:$0xff]  }
 0xcbe   :  { %v12365_v35 = vadd.f32 %v6825_v28, %v6824_v26  ;;  %13167 = vst [vmem:[#allocation14_spill] sm:$0xff] %v12512_v38  ;;  %v12514_v28 = vld [vmem:[#allocation5 + $0x388] ss:$16 sps:$4 sm:$0xff]   ;;  %v12520_v26 = vld [vmem:[#allocation5 + $0x3ac] ss:$16 sps:$4 sm:$0xff]  }
 0xcbf   :  { %13168 = vst [vmem:[#allocation15_spill] sm:$0xff] %v12514_v28  ;;  %13170 = vst [vmem:[#allocation20_spill] sm:$0xff] %v12520_v26 }
 0xcc0   :  { %10473 = vtanh.f32 %v12365_v35 }
 0xcca   :  { %v10474_v52 = vpop.eup %10473 }
 0xccb   :  { %v6828_v11 = vmul.f32 %v10474_v52, %v10472_v6  ;;  %v12524_v6 = vld [vmem:[#allocation5 + $0x3a0] ss:$16 sps:$4 sm:$0xff]   ;;  %v12526_v52 = vld [vmem:[#allocation5 + $0x3a8] ss:$16 sps:$4 sm:$0xff]  }
 0xccc   :  { %13171 = vst [vmem:[#allocation23_spill] sm:$0xff] %v12524_v6  ;;  %13172 = vst [vmem:[#allocation21_spill] sm:$0xff] %v12526_v52 }
 0xccd   :  { %v6836_v39 = vpack.c.bf16 %v6828_v11, %v6828_v11  ;;  %v12530_v11 = vld [vmem:[#allocation5 + $0x3c4] ss:$16 sps:$4 sm:$0xff]  }
 0xcce   :  { %13173 = vst [vmem:[#allocation17_spill] sm:$0xff] %v12530_v11 }
 0xccf   :  { %7275 = vmatprep.mubr.bf16.mxu0 %v6836_v39  ;;  %7316 = vmatprep.mubr.bf16.mxu1 %v6836_v39  ;;  %v12532_v39 = vld [vmem:[#allocation5 + $0x3cc] ss:$16 sps:$4 sm:$0xff]  }
 0xcd0   :  { %7276 = vmatmul.mubr.bf16.vlgmr.msra.gmra.mrb[52].mxu0 %v13158_v36  ;;  %7317 = vmatmul.mubr.bf16.vlgmr.msra.gmra.mrb[52].mxu1 %v13158_v36  ;;  %13174 = vst [vmem:[#allocation22_spill] sm:$0xff] %v12532_v39  ;;  %v12536_v36 = vld [vmem:[#allocation5 + $0x3c0] ss:$16 sps:$4 sm:$0xff]  }
 0xcd1   :  { %7764 = vmatpush1.bf16.msra.mxu0 %v12368_v23  ;;  %7805 = vmatpush1.bf16.msra.mxu1 %v12370_v56  ;;  %13175 = vst [vmem:[#allocation26_spill] sm:$0xff] %v12536_v36 }
 0xcd2   :  { %7765 = vmatprep.subr.bf16.mxu0 %v12372_v40  ;;  %7806 = vmatprep.subr.bf16.mxu1 %v12374_v42 }
 0xcd5   :  { %7766 = vmatpush1.bf16.msra.mxu0 %v12380_v43  ;;  %7807 = vmatpush1.bf16.msra.mxu1 %v12382_v45 }
 0xcd6   :  { %7767 = vmatprep.subr.bf16.mxu0 %v12386_v47  ;;  %7808 = vmatprep.subr.bf16.mxu1 %v12388_v48 }
 0xcd9   :  { %7768 = vmatpush1.bf16.msra.mxu0 %v12392_v49  ;;  %7809 = vmatpush1.bf16.msra.mxu1 %v12394_v50 }
 0xcda   :  { %7769 = vmatprep.subr.bf16.mxu0 %v12398_v51  ;;  %7810 = vmatprep.subr.bf16.mxu1 %v12400_v57 }
 0xcdd   :  { %7770 = vmatpush1.bf16.msra.mxu0 %v12404_v58  ;;  %7811 = vmatpush1.bf16.msra.mxu1 %v12406_v0 }
 0xcde   :  { %7771 = vmatprep.subr.bf16.mxu0 %v12412_v60  ;;  %7812 = vmatprep.subr.bf16.mxu1 %v12414_v54 }
 0xce1   :  { %7772 = vmatpush1.bf16.msra.mxu0 %v12416_v2  ;;  %7813 = vmatpush1.bf16.msra.mxu1 %v12418_v4 }
 0xce2   :  { %7773 = vmatprep.subr.bf16.mxu0 %v12424_v8  ;;  %7814 = vmatprep.subr.bf16.mxu1 %v12426_v1 }
 0xce5   :  { %7774 = vmatpush1.bf16.msra.mxu0 %v12428_v17  ;;  %7815 = vmatpush1.bf16.msra.mxu1 %v12430_v46 }
 0xce6   :  { %7775 = vmatprep.subr.bf16.mxu0 %v12436_v32  ;;  %7816 = vmatprep.subr.bf16.mxu1 %v12438_v18 }
 0xce9   :  { %7776 = vmatpush1.bf16.msra.mxu0 %v12440_v31  ;;  %7817 = vmatpush1.bf16.msra.mxu1 %v12442_v41 }
 0xcea   :  { %7777 = vmatprep.subr.bf16.mxu0 %v12448_v34  ;;  %7818 = vmatprep.subr.bf16.mxu1 %v12450_v61 }
 0xced   :  { %7778 = vmatpush1.bf16.msra.mxu0 %v12452_v63  ;;  %7819 = vmatpush1.bf16.msra.mxu1 %v12454_v5 }
 0xcee   :  { %7779 = vmatprep.subr.bf16.mxu0 %v12460_v33  ;;  %7820 = vmatprep.subr.bf16.mxu1 %v12462_v9 }
 0xcf1   :  { %7780 = vmatpush1.bf16.msra.mxu0 %v12464_v16  ;;  %7821 = vmatpush1.bf16.msra.mxu1 %v12466_v21 }
 0xcf2   :  { %7781 = vmatprep.subr.bf16.mxu0 %v12472_v30  ;;  %7822 = vmatprep.subr.bf16.mxu1 %v12474_v62 }
 0xcf5   :  { %7782 = vmatpush1.bf16.msra.mxu0 %v12476_v15  ;;  %7823 = vmatpush1.bf16.msra.mxu1 %v12478_v37 }
 0xcf6   :  { %7783 = vmatprep.subr.bf16.mxu0 %v12484_v27  ;;  %7824 = vmatprep.subr.bf16.mxu1 %v12486_v24 }
 0xcf9   :  { %7784 = vmatpush1.bf16.msra.mxu0 %v12488_v55  ;;  %7825 = vmatpush1.bf16.msra.mxu1 %v12490_v13 }
 0xcfa   :  { %7785 = vmatprep.subr.bf16.mxu0 %v12496_v44  ;;  %7826 = vmatprep.subr.bf16.mxu1 %v12498_v25 }
 0xcfd   :  { %7786 = vmatpush1.bf16.msra.mxu0 %v12500_v3  ;;  %7827 = vmatpush1.bf16.msra.mxu1 %v12502_v53 }
 0xcfe   :  { %7787 = vmatprep.subr.bf16.mxu0 %v12506_v10  ;;  %7828 = vmatprep.subr.bf16.mxu1 %v12508_v7 }
 0xd01   :  { %7788 = vmatpush1.bf16.msra.mxu0 %v12512_v38  ;;  %7829 = vmatpush1.bf16.msra.mxu1 %v12514_v28  ;;  %v12538_v38 = vld [vmem:[#allocation5 + $0x3c8] ss:$16 sps:$4 sm:$0xff]   ;;  %v12542_v28 = vld [vmem:[#allocation5 + $0x3e4] ss:$16 sps:$4 sm:$0xff]  }
 0xd02   :  { %7789 = vmatprep.subr.bf16.mxu0 %v12518_v14  ;;  %7830 = vmatprep.subr.bf16.mxu1 %v12520_v26  ;;  %13176 = vst [vmem:[#allocation25_spill] sm:$0xff] %v12538_v38  ;;  %13177 = vst [vmem:[#allocation18_spill] sm:$0xff] %v12542_v28  ;;  %v12544_v14 = vld [vmem:[#allocation5 + $0x3ec] ss:$16 sps:$4 sm:$0xff]   ;;  %v12548_v26 = vld [vmem:[#allocation5 + $0x3e0] ss:$16 sps:$4 sm:$0xff]  }
 0xd03   :  { %13178 = vst [vmem:[#allocation35_spill] sm:$0xff] %v12544_v14  ;;  %13179 = vst [vmem:[#allocation28_spill] sm:$0xff] %v12548_v26 }
 0xd05   :  { %7790 = vmatpush1.bf16.msra.mxu0 %v12524_v6  ;;  %7831 = vmatpush1.bf16.msra.mxu1 %v12526_v52  ;;  %v12550_v6 = vld [vmem:[#allocation5 + $0x3e8] ss:$16 sps:$4 sm:$0xff]  }
 0xd06   :  { %7791 = vmatprep.subr.bf16.mxu0 %v12530_v11  ;;  %7832 = vmatprep.subr.bf16.mxu1 %v12532_v39  ;;  %13180 = vst [vmem:[#allocation27_spill] sm:$0xff] %v12550_v6 }
 0xd09   :  { %7792 = vmatpush1.bf16.msra.mxu0 %v12536_v36  ;;  %7833 = vmatpush1.bf16.msra.mxu1 %v12538_v38  ;;  %v9400_v38 = vld [vmem:[%s12687_s2 + $0x4] sm:$0xf] }
 0xd0a   :  { %7793 = vmatprep.subr.bf16.mxu0 %v12542_v28  ;;  %7834 = vmatprep.subr.bf16.mxu1 %v12544_v14  ;;  %v6906_v36 = vrot.slane %v9400_v38, %v13156_v29  ;;  %v6910_v39 = vrot.slane %v9400_v38, %v13157_v22  ;;  %v6918_v25 = vrot.slane %v9400_v38, %v13053_v20 }
 0xd0b   :  { %v6914_v29 = vrot.slane %v9400_v38, %v13054_v12 }
 0xd0d   :  { %7794 = vmatpush1.bf16.msra.mxu0 %v12548_v26  ;;  %7835 = vmatpush1.bf16.msra.mxu1 %v12550_v6 }
 0xd0e   :  { %8283 = vmatprep.subr.bf16.mxu0 %v12351_v19  ;;  %8324 = vmatprep.subr.bf16.mxu1 %v12353_v59 }
 0xda3   :  { %v7277_v11 = vpop.f32.mrb[52].mxu0  ;;  %v7318_v28 = vpop.f32.mrb[52].mxu1 }
 0xda4   :  { %v7278_v52 = vadd.f32 %v7277_v11, %v6906_v36  ;;  %v7279_v14 = vpop.f32.mrb[53].mxu0  ;;  %v7320_v7 = vpop.f32.mrb[53].mxu1  ;;  %v7319_v13 = vadd.f32 %v7318_v28, %v6914_v29 }
 0xda5   :  { %v7280_v26 = vadd.f32 %v7279_v14, %v6910_v39  ;;  %v7281_v10 = vpop.f32.mrb[54].mxu0  ;;  %v7322_v6 = vpop.f32.mrb[54].mxu1  ;;  %v7321_v44 = vadd.f32 %v7320_v7, %v6918_v25 }
 0xda6   :  { %v9465_v53 = vmul.f32 -1.442695, %v7278_v52  ;;  %v7282_v19 = vpop.f32.mrb[55].mxu0  ;;  %v7323_v3 = vpop.f32.mrb[55].mxu1 }
 0xda7   :  { %v9466_v59 = vmul.f32 -1.442695, %v7280_v26  ;;  %v9467_v22 = vmul.f32 -1.442695, %v7321_v44  ;;  %v13181_v44 = vld [vmem:[#allocation19_spill] sm:$0xff] }
 0xda8   :  { %10475 = vpow2.f32 %v9465_v53 }
 0xda9   :  { %10477 = vpow2.f32 %v9466_v59 }
 0xdaa   :  { %10479 = vpow2.f32 %v9467_v22 }
 0xdab   :  { %10481 = vtanh.f32 %v7319_v13 }
 0xdb2   :  { %v10476_v55 = vpop.eup %10475 }
 0xdb3   :  { %v10478_v11 = vpop.eup %10477  ;;  %v7328_v36 = vadd.f32 1.0, %v10476_v55 }
 0xdb4   :  { %v7334_v10 = vadd.f32 1.0, %v10478_v11  ;;  %v10480_v14 = vpop.eup %10479 }
 0xdb5   :  { %10483 = vrcp.f32 %v7328_v36  ;;  %v10482_v3 = vpop.eup %10481  ;;  %v7341_v53 = vadd.f32 1.0, %v10480_v14 }
 0xdb6   :  { %10485 = vrcp.f32 %v7334_v10 }
 0xdb7   :  { %10487 = vrcp.f32 %v7341_v53 }
 0xdbf   :  { %v10484_v26 = vpop.eup %10483 }
 0xdc0   :  { %v10486_v6 = vpop.eup %10485  ;;  %v7345_v52 = vmul.f32 %v10484_v26, %v10482_v3 }
 0xdc1   :  { %v7344_v25 = vmul.f32 %v10486_v6, %v12365_v35  ;;  %v10488_v29 = vpop.eup %10487  ;;  %v13182_v35 = vld [vmem:[#allocation40_spill] sm:$0xff] }
 0xdc3   :  { %v12566_v7 = vadd.f32 %v7345_v52, %v7344_v25 }
 0xdc5   :  { %10489 = vtanh.f32 %v12566_v7 }
 0xdcf   :  { %v10490_v55 = vpop.eup %10489 }
 0xdd0   :  { %v7348_v22 = vmul.f32 %v10490_v55, %v10488_v29 }
 0xdd2   :  { %v7356_v13 = vpack.c.bf16 %v7348_v22, %v7348_v22 }
 0xdd4   :  { %7795 = vmatprep.mubr.bf16.mxu0 %v7356_v13  ;;  %7836 = vmatprep.mubr.bf16.mxu1 %v7356_v13 }
 0xdd5   :  { %7796 = vmatmul.mubr.bf16.vlgmr.msra.gmra.mrb[56].mxu0 %v13181_v44  ;;  %7837 = vmatmul.mubr.bf16.vlgmr.msra.gmra.mrb[56].mxu1 %v13181_v44  ;;  %v13206_v44 = vld [vmem:[#allocation12_spill] sm:$0xff] }
 0xdd6   :  { %8284 = vmatpush1.bf16.msra.mxu0 %v12368_v23  ;;  %8325 = vmatpush1.bf16.msra.mxu1 %v12370_v56  ;;  %v13183_v23 = vld [vmem:[#allocation41_spill] sm:$0xff]  ;;  %v13184_v56 = vld [vmem:[#allocation42_spill] sm:$0xff] }
 0xdd7   :  { %8285 = vmatprep.subr.bf16.mxu0 %v12372_v40  ;;  %8326 = vmatprep.subr.bf16.mxu1 %v12374_v42  ;;  %v13185_v40 = vld [vmem:[#allocation39_spill] sm:$0xff]  ;;  %v13186_v42 = vld [vmem:[#allocation24_spill] sm:$0xff] }
 0xdda   :  { %8286 = vmatpush1.bf16.msra.mxu0 %v12380_v43  ;;  %8327 = vmatpush1.bf16.msra.mxu1 %v12382_v45  ;;  %v13187_v43 = vld [vmem:[#allocation10_spill] sm:$0xff]  ;;  %v13188_v45 = vld [vmem:[#allocation11_spill] sm:$0xff] }
 0xddb   :  { %8287 = vmatprep.subr.bf16.mxu0 %v12386_v47  ;;  %8328 = vmatprep.subr.bf16.mxu1 %v12388_v48  ;;  %v13189_v47 = vld [vmem:[#allocation13_spill] sm:$0xff]  ;;  %v13190_v48 = vld [vmem:[#allocation14_spill] sm:$0xff] }
 0xdde   :  { %8288 = vmatpush1.bf16.msra.mxu0 %v12392_v49  ;;  %8329 = vmatpush1.bf16.msra.mxu1 %v12394_v50  ;;  %v13191_v49 = vld [vmem:[#allocation15_spill] sm:$0xff]  ;;  %v13192_v50 = vld [vmem:[#allocation16_spill] sm:$0xff] }
 0xddf   :  { %8289 = vmatprep.subr.bf16.mxu0 %v12398_v51  ;;  %8330 = vmatprep.subr.bf16.mxu1 %v12400_v57  ;;  %v13193_v51 = vld [vmem:[#allocation20_spill] sm:$0xff]  ;;  %v13194_v57 = vld [vmem:[#allocation23_spill] sm:$0xff] }
 0xde2   :  { %8290 = vmatpush1.bf16.msra.mxu0 %v12404_v58  ;;  %8331 = vmatpush1.bf16.msra.mxu1 %v12406_v0  ;;  %v13195_v58 = vld [vmem:[#allocation21_spill] sm:$0xff] }
 0xde3   :  { %8291 = vmatprep.subr.bf16.mxu0 %v12412_v60  ;;  %8332 = vmatprep.subr.bf16.mxu1 %v12414_v54  ;;  %v13196_v0 = vld [vmem:[#allocation17_spill] sm:$0xff]  ;;  %v13197_v60 = vld [vmem:[#allocation22_spill] sm:$0xff] }
 0xde4   :  { %v13198_v54 = vld [vmem:[#allocation26_spill] sm:$0xff] }
 0xde6   :  { %8292 = vmatpush1.bf16.msra.mxu0 %v12416_v2  ;;  %8333 = vmatpush1.bf16.msra.mxu1 %v12418_v4  ;;  %v13199_v2 = vld [vmem:[#allocation25_spill] sm:$0xff]  ;;  %v13200_v4 = vld [vmem:[#allocation18_spill] sm:$0xff] }
 0xde7   :  { %8293 = vmatprep.subr.bf16.mxu0 %v12424_v8  ;;  %8334 = vmatprep.subr.bf16.mxu1 %v12426_v1  ;;  %v13201_v8 = vld [vmem:[#allocation35_spill] sm:$0xff]  ;;  %v13202_v1 = vld [vmem:[#allocation28_spill] sm:$0xff] }
 0xdea   :  { %8294 = vmatpush1.bf16.msra.mxu0 %v12428_v17  ;;  %8335 = vmatpush1.bf16.msra.mxu1 %v12430_v46  ;;  %v13203_v17 = vld [vmem:[#allocation27_spill] sm:$0xff]  ;;  %v9468_v46 = vld [vmem:[%s12687_s2 + $0x4] sm:$0xf] }
 0xdeb   :  { %8295 = vmatprep.subr.bf16.mxu0 %v12436_v32  ;;  %8336 = vmatprep.subr.bf16.mxu1 %v12438_v18  ;;  %v13204_v32 = vld [vmem:[#allocation8_spill] sm:$0xff]  ;;  %v7434_v38 = vrot.slane %v9468_v46, %v13054_v12 }
 0xdec   :  { %v7426_v18 = vrot.slane %v9468_v46, %v13204_v32 }
 0xdee   :  { %8296 = vmatpush1.bf16.msra.mxu0 %v12440_v31  ;;  %8337 = vmatpush1.bf16.msra.mxu1 %v12442_v41  ;;  %v13205_v31 = vld [vmem:[#allocation9_spill] sm:$0xff] }
 0xdef   :  { %8297 = vmatprep.subr.bf16.mxu0 %v12448_v34  ;;  %8338 = vmatprep.subr.bf16.mxu1 %v12450_v61  ;;  %v7430_v41 = vrot.slane %v9468_v46, %v13205_v31 }
 0xdf2   :  { %8298 = vmatpush1.bf16.msra.mxu0 %v12452_v63  ;;  %8339 = vmatpush1.bf16.msra.mxu1 %v12454_v5 }
 0xdf3   :  { %8299 = vmatprep.subr.bf16.mxu0 %v12460_v33  ;;  %8340 = vmatprep.subr.bf16.mxu1 %v12462_v9 }
 0xdf6   :  { %8300 = vmatpush1.bf16.msra.mxu0 %v12464_v16  ;;  %8341 = vmatpush1.bf16.msra.mxu1 %v12466_v21 }
 0xdf7   :  { %8301 = vmatprep.subr.bf16.mxu0 %v12472_v30  ;;  %8342 = vmatprep.subr.bf16.mxu1 %v12474_v62 }
 0xdfa   :  { %8302 = vmatpush1.bf16.msra.mxu0 %v12476_v15  ;;  %8343 = vmatpush1.bf16.msra.mxu1 %v12478_v37 }
 0xdfb   :  { %8303 = vmatprep.subr.bf16.mxu0 %v12484_v27  ;;  %8344 = vmatprep.subr.bf16.mxu1 %v12486_v24  ;;  %v7438_v27 = vrot.slane %v9468_v46, %v13053_v20 }
 0xdfe   :  { %8304 = vmatpush1.bf16.msra.mxu0 %v13182_v35  ;;  %8345 = vmatpush1.bf16.msra.mxu1 %v13183_v23  ;;  %v7875_v35 = vpack.c.bf16 %v13206_v44, %v13206_v44  ;;  %v10610_v23 = vmov 0.0  }
 0xdff   :  { %8305 = vmatprep.subr.bf16.mxu0 %v13184_v56  ;;  %8346 = vmatprep.subr.bf16.mxu1 %v13185_v40  ;;  %v10260_v56 = vld [vmem:[%s12688_s3 + $0x8] sm:$0xff]   ;;  %v10261_v40 = vld [vmem:[%s12688_s3 + $0x10] sm:$0xff]  }
 0xe02   :  { %8306 = vmatpush1.bf16.msra.mxu0 %v13186_v42  ;;  %8347 = vmatpush1.bf16.msra.mxu1 %v13187_v43  ;;  %v10262_v42 = vld [vmem:[%s12688_s3 + $0x18] sm:$0xff]   ;;  %v10263_v43 = vld [vmem:[%s12688_s3 + $0x20] sm:$0xff]  }
 0xe03   :  { %8307 = vmatprep.subr.bf16.mxu0 %v13188_v45  ;;  %8348 = vmatprep.subr.bf16.mxu1 %v13189_v47  ;;  %v10264_v45 = vld [vmem:[%s12688_s3 + $0x28] sm:$0xff]   ;;  %v10265_v47 = vld [vmem:[%s12688_s3 + $0x30] sm:$0xff]  }
 0xe06   :  { %8308 = vmatpush1.bf16.msra.mxu0 %v13190_v48  ;;  %8349 = vmatpush1.bf16.msra.mxu1 %v13191_v49  ;;  %v10266_v48 = vld [vmem:[%s12688_s3 + $0x38] sm:$0xff]   ;;  %v9536_v49 = vld [vmem:[%s12687_s2 + $0x4] sm:$0xf] }
 0xe07   :  { %8309 = vmatprep.subr.bf16.mxu0 %v13192_v50  ;;  %8350 = vmatprep.subr.bf16.mxu1 %v13193_v51  ;;  %v7946_v50 = vrot.slane %v9536_v49, %v13204_v32  ;;  %v7950_v51 = vrot.slane %v9536_v49, %v13205_v31  ;;  %v7954_v32 = vrot.slane %v9536_v49, %v13054_v12 }
 0xe0a   :  { %8310 = vmatpush1.bf16.msra.mxu0 %v13194_v57  ;;  %8351 = vmatpush1.bf16.msra.mxu1 %v13195_v58 }
 0xe0b   :  { %8311 = vmatprep.subr.bf16.mxu0 %v13196_v0  ;;  %8352 = vmatprep.subr.bf16.mxu1 %v13197_v60 }
 0xe0e   :  { %8312 = vmatpush1.bf16.msra.mxu0 %v13198_v54  ;;  %8353 = vmatpush1.bf16.msra.mxu1 %v13199_v2 }
 0xe0f   :  { %8313 = vmatprep.subr.bf16.mxu0 %v13200_v4  ;;  %8354 = vmatprep.subr.bf16.mxu1 %v13201_v8 }
 0xe12   :  { %8314 = vmatpush1.bf16.msra.mxu0 %v13202_v1  ;;  %8355 = vmatpush1.bf16.msra.mxu1 %v13203_v17 }
 0xe13   :  { %9649 = vmatprep.subr.bf16.mxu0 %v10610_v23 }
 0xea8   :  { %v7797_v34 = vpop.f32.mrb[56].mxu0  ;;  %v7838_v61 = vpop.f32.mrb[56].mxu1 }
 0xea9   :  { %v7798_v63 = vadd.f32 %v7797_v34, %v7426_v18  ;;  %v7799_v5 = vpop.f32.mrb[57].mxu0  ;;  %v7840_v33 = vpop.f32.mrb[57].mxu1  ;;  %v7839_v39 = vadd.f32 %v7838_v61, %v7434_v38 }
 0xeaa   :  { %v7800_v9 = vadd.f32 %v7799_v5, %v7430_v41  ;;  %v7801_v16 = vpop.f32.mrb[58].mxu0  ;;  %v7842_v21 = vpop.f32.mrb[58].mxu1  ;;  %v7841_v24 = vadd.f32 %v7840_v33, %v7438_v27  ;;  %v7958_v41 = vrot.slane %v9536_v49, %v13053_v20 }
 0xeab   :  { %v9533_v30 = vmul.f32 -1.442695, %v7798_v63  ;;  %v7802_v62 = vpop.f32.mrb[59].mxu0  ;;  %v7843_v15 = vpop.f32.mrb[59].mxu1 }
 0xeac   :  { %v9534_v37 = vmul.f32 -1.442695, %v7800_v9  ;;  %v9535_v28 = vmul.f32 -1.442695, %v7841_v24 }
 0xead   :  { %10491 = vpow2.f32 %v9533_v30 }
 0xeae   :  { %10493 = vpow2.f32 %v9534_v37 }
 0xeaf   :  { %10495 = vpow2.f32 %v9535_v28 }
 0xeb0   :  { %10497 = vtanh.f32 %v7839_v39  ;;  %v13207_v39 = vlaneseq }
 0xeb7   :  { %v10492_v19 = vpop.eup %10491 }
 0xeb8   :  { %v10494_v59 = vpop.eup %10493  ;;  %v7848_v11 = vadd.f32 1.0, %v10492_v19  ;;  %v8506_v19 = vand.u32 127, %v13207_v39 }
 0xeb9   :  { %v7854_v36 = vadd.f32 1.0, %v10494_v59  ;;  %v10496_v10 = vpop.eup %10495  ;;  %v9604_v59 = vld [vmem:[%s12689_s4] ss:$0 sm:$0xff] }
 0xeba   :  { %10499 = vrcp.f32 %v7848_v11  ;;  %v10498_v14 = vpop.eup %10497  ;;  %v7861_v52 = vadd.f32 1.0, %v10496_v10  ;;  %vm8507_vm1 = vcmp.lt.s32.totalorder %v8506_v19, 4 }
 0xebb   :  { %10501 = vrcp.f32 %v7854_v36 }
 0xebc   :  { %10503 = vrcp.f32 %v7861_v52 }
 0xec4   :  { %v10500_v3 = vpop.eup %10499 }
 0xec5   :  { %v10502_v26 = vpop.eup %10501  ;;  %v7865_v6 = vmul.f32 %v10500_v3, %v10498_v14 }
 0xec6   :  { %v7864_v53 = vmul.f32 %v10502_v26, %v12566_v7  ;;  %v10504_v29 = vpop.eup %10503  ;;  %v10259_v7 = vld [vmem:[%s12688_s3] sm:$0xff]  }
 0xec8   :  { %v12641_v25 = vadd.f32 %v7865_v6, %v7864_v53 }
 0xeca   :  { %10505 = vtanh.f32 %v12641_v25 }
 0xed4   :  { %v10506_v55 = vpop.eup %10505 }
 0xed5   :  { %v7868_v22 = vmul.f32 %v10506_v55, %v10504_v29 }
 0xed7   :  { %v7876_v13 = vpack.c.bf16 %v7868_v22, %v7868_v22 }
 0xed9   :  { %8315 = vmatprep.mubr.bf16.mxu0 %v7876_v13  ;;  %8356 = vmatprep.mubr.bf16.mxu1 %v7876_v13 }
 0xeda   :  { %8316 = vmatmul.mubr.bf16.vlgmr.msra.gmra.mrb[60].mxu0 %v7875_v35  ;;  %8357 = vmatmul.mubr.bf16.vlgmr.msra.gmra.mrb[60].mxu1 %v7875_v35 }
 0xedb   :  { %9650 = vmatpush3.bf16.msra.mxu0 %v10259_v7  ;;  %9665 = vmatprep.mubr.msk.bf16.mxu0 %vm10611_vm0, %v10610_v23 }
 0xedc   :  { %9651 = vmatprep.subr.bf16.mxu0 %v10610_v23 }
 0xedf   :  { %9652 = vmatpush3.bf16.msra.mxu0 %v10260_v56 }
 0xee0   :  { %9653 = vmatprep.subr.bf16.mxu0 %v10610_v23 }
 0xee3   :  { %9654 = vmatpush3.bf16.msra.mxu0 %v10261_v40 }
 0xee4   :  { %9655 = vmatprep.subr.bf16.mxu0 %v10610_v23 }
 0xee7   :  { %9656 = vmatpush3.bf16.msra.mxu0 %v10262_v42 }
 0xee8   :  { %9657 = vmatprep.subr.bf16.mxu0 %v10610_v23 }
 0xeeb   :  { %9658 = vmatpush3.bf16.msra.mxu0 %v10263_v43 }
 0xeec   :  { %9659 = vmatprep.subr.bf16.mxu0 %v10610_v23 }
 0xeef   :  { %9660 = vmatpush3.bf16.msra.mxu0 %v10264_v45 }
 0xef0   :  { %9661 = vmatprep.subr.bf16.mxu0 %v10610_v23 }
 0xef3   :  { %9662 = vmatpush3.bf16.msra.mxu0 %v10265_v47 }
 0xef4   :  { %9663 = vmatprep.subr.bf16.mxu0 %v10610_v23 }
 0xef7   :  { %9664 = vmatpush3.bf16.msra.mxu0 %v10266_v48 }
 0xfad   :  { %v8317_v57 = vpop.f32.mrb[60].mxu0  ;;  %v8358_v58 = vpop.f32.mrb[60].mxu1 }
 0xfae   :  { %v8318_v0 = vadd.f32 %v8317_v57, %v7946_v50  ;;  %v8319_v60 = vpop.f32.mrb[61].mxu0  ;;  %v8360_v54 = vpop.f32.mrb[61].mxu1  ;;  %v8359_v61 = vadd.f32 %v8358_v58, %v7954_v32 }
 0xfaf   :  { %v8320_v2 = vadd.f32 %v8319_v60, %v7950_v51  ;;  %v8321_v4 = vpop.f32.mrb[62].mxu0  ;;  %v8362_v8 = vpop.f32.mrb[62].mxu1  ;;  %v8361_v34 = vadd.f32 %v8360_v54, %v7958_v41 }
 0xfb0   :  { %v9601_v1 = vmul.f32 -1.442695, %v8318_v0  ;;  %v8322_v17 = vpop.f32.mrb[63].mxu0  ;;  %v8363_v46 = vpop.f32.mrb[63].mxu1 }
 0xfb1   :  { %v9602_v18 = vmul.f32 -1.442695, %v8320_v2  ;;  %v9603_v31 = vmul.f32 -1.442695, %v8361_v34 }
 0xfb2   :  { %10507 = vpow2.f32 %v9601_v1 }
 0xfb3   :  { %10509 = vpow2.f32 %v9602_v18 }
 0xfb4   :  { %10511 = vpow2.f32 %v9603_v31 }
 0xfb5   :  { %10513 = vtanh.f32 %v8359_v61 }
 0xfbc   :  { %v10508_v63 = vpop.eup %10507 }
 0xfbd   :  { %v10510_v5 = vpop.eup %10509  ;;  %v8368_v33 = vadd.f32 1.0, %v10508_v63 }
 0xfbe   :  { %v8374_v9 = vadd.f32 1.0, %v10510_v5  ;;  %v10512_v16 = vpop.eup %10511 }
 0xfbf   :  { %10515 = vrcp.f32 %v8368_v33  ;;  %v10514_v21 = vpop.eup %10513  ;;  %v8381_v15 = vadd.f32 1.0, %v10512_v16 }
 0xfc0   :  { %10517 = vrcp.f32 %v8374_v9 }
 0xfc1   :  { %10519 = vrcp.f32 %v8381_v15 }
 0xfc9   :  { %v10516_v30 = vpop.eup %10515 }
 0xfca   :  { %v10518_v62 = vpop.eup %10517  ;;  %v8385_v20 = vmul.f32 %v10516_v30, %v10514_v21 }
 0xfcb   :  { %v8384_v37 = vmul.f32 %v10518_v62, %v12641_v25  ;;  %v10520_v12 = vpop.eup %10519 }
 0xfcd   :  { %v8386_v27 = vadd.f32 %v8385_v20, %v8384_v37 }
 0xfcf   :  { %10521 = vtanh.f32 %v8386_v27 }
 0xfd9   :  { %v10522_v24 = vpop.eup %10521 }
 0xfda   :  { %v8388_v38 = vmul.f32 %v10522_v24, %v10520_v12 }
 0xfdc   :  { %v8393_v28 = vpack.c.bf16 %v8388_v38, %v8388_v38 }
 0xfde   :  { %9666 = vmatmul.mubr.bf16.vlgmr.msra.gmra.mrb[64].mxu0 %v8393_v28 }
0x10b1   :  { %v8499_v11 = vpop.f32.mrb[64].mxu0 }
0x10b2   :  { %v8500_v36 = vadd.f32 %v9604_v59, %v8499_v11  ;;  %v9667_v10 = vpop.f32.mrb[65].mxu0 }
0x10b3   :  { %v8502_v14 = vpop.f32.mrb[66].mxu0 }
0x10b4   :  { %v9668_v3 = vpop.f32.mrb[67].mxu0  ;;  %v8508_v26 = vsel %vm8507_vm1, %v8500_v36, -1e+30 }
0x10b5   :  { %8509 = vmax.xlane.f32.xlu0 %v8508_v26 }
0x1142   :  { %v8510_v6 = vpop.xlane.xlu0 %8509 }
0x1143   :  { %v8511_v52 = vsub.f32 %v8508_v26, %v8510_v6 }
0x1145   :  { %v8512_v53 = vmul.f32 1.442695, %v8511_v52 }
0x1147   :  { %10523 = vpow2.f32 %v8512_v53 }
0x1151   :  { %v10524_v25 = vpop.eup %10523 }
0x1152   :  { %8514 = vadd.xlane.f32.xlu0 %v10524_v25 }
0x11df   :  { %v8515_v29 = vpop.xlane.xlu0 %8514 }
0x11e0   :  { %10525 = vrcp.f32 %v8515_v29 }
0x11ea   :  { %v10526_v55 = vpop.eup %10525 }
0x11eb   :  { %v8517_v22 = vmul.f32 %v10526_v55, %v10524_v25 }
0x11ed   :  { %8518 = vst [vmem:[%s12690_s5] sm:$0xff] %v8517_v22 }
0x11ee   :  { %8523 = vsyncpa [#allocation6], 1 }

</bundles_post_ra>
